<compile_context>
chip_gen: v7x
topology: tpu7x:2x2x1
jax: 0.10.0
libtpu: 0.0.40
codegen_flags: <defaults>
</compile_context>

<pallas_src>
import functools

import jax
import jax.numpy as jnp
from jax import lax
from jax.experimental import pallas as pl
from jax.experimental.pallas import tpu as pltpu


def _round_up(x, m):
    return (x + m - 1) // m * m


# ---------------------------------------------------------------------------
# Pallas kernels
# ---------------------------------------------------------------------------
def _head_kernel(x_ref, wd_ref, bd_ref, wt_ref, bt_ref, o_ref):
    """Fused Linear + deconv_first (1x1 spatial input) + ReLU epilogue.

    out (B, R) = relu( (x @ WdT + bd) @ Wt2 + bt ),  R = k1*k1*C0 on lanes.
    """
    h = jnp.dot(x_ref[...], wd_ref[...], preferred_element_type=jnp.float32)
    h = h + bd_ref[...]
    y = jnp.dot(h.astype(wt_ref.dtype), wt_ref[...],
                preferred_element_type=jnp.float32)
    y = y + bt_ref[...]
    y = jnp.maximum(y, 0.0)            # fused ReLU (next deconv consumes relu(x))
    o_ref[...] = y.astype(o_ref.dtype)


def _upconv_kernel(x_ref, w_ref, b_ref, o_ref, *, nr, wpad, act):
    """One ConvTranspose2d(4, stride 2, pad 1) for one sample.

    x_ref: (1, (H+3)*wpad, Ci)   zero-bordered activation, rows = i*wpad + j
    w_ref: (4, Ci, Cpad)         4 taps (dh,dw), lanes ordered (ph_h, ph_w, co)
    b_ref: (1, Cpad)
    o_ref: (1, nr, Cpad)         nr = (H+1)*wpad  output-position grid
    In-kernel im2col: the 4 taps are static row-shifted slices of the flat
    slab (shift = dh*wpad + dw); accumulate in f32, fused bias + relu/tanh.
    """
    xf = x_ref[0]                                       # (NRtot, Ci) in VMEM
    shifts = (0, 1, wpad, wpad + 1)
    acc = jnp.dot(xf[0:nr, :], w_ref[0],
                  preferred_element_type=jnp.float32)
    for t in range(1, 4):
        s = shifts[t]
        acc = acc + jnp.dot(xf[s:s + nr, :], w_ref[t],
                            preferred_element_type=jnp.float32)
    acc = acc + b_ref[...]
    if act == "relu":
        acc = jnp.maximum(acc, 0.0)
    elif act == "tanh":
        acc = jnp.tanh(acc)
    o_ref[0] = acc.astype(o_ref.dtype)


# ---------------------------------------------------------------------------
# pallas_call wrappers
# ---------------------------------------------------------------------------
def _head_call(x, wd_t, bd_row, wt2, bt_row, out_dtype):
    B, L = x.shape
    Hd = wd_t.shape[1]
    R = wt2.shape[1]
    return pl.pallas_call(
        _head_kernel,
        out_shape=jax.ShapeDtypeStruct((B, R), out_dtype),
        grid=(1,),
        in_specs=[
            pl.BlockSpec((B, L), lambda i: (0, 0)),
            pl.BlockSpec((L, Hd), lambda i: (0, 0)),
            pl.BlockSpec((1, Hd), lambda i: (0, 0)),
            pl.BlockSpec((Hd, R), lambda i: (0, 0)),
            pl.BlockSpec((1, R), lambda i: (0, 0)),
        ],
        out_specs=pl.BlockSpec((B, R), lambda i: (0, 0)),
        compiler_params=pltpu.CompilerParams(
            dimension_semantics=("arbitrary",)),
    )(x, wd_t, bd_row, wt2, bt_row)


def _upconv_call(xflat, w4, brow, *, nr, wpad, act, out_dtype):
    N, nrtot, ci = xflat.shape
    cpad = w4.shape[-1]
    kern = functools.partial(_upconv_kernel, nr=nr, wpad=wpad, act=act)
    return pl.pallas_call(
        kern,
        out_shape=jax.ShapeDtypeStruct((N, nr, cpad), out_dtype),
        grid=(N,),                                   # >= 2 steps -> both v7x TCs
        in_specs=[
            pl.BlockSpec((1, nrtot, ci), lambda n: (n, 0, 0)),   # per-sample slab
            pl.BlockSpec((4, ci, cpad), lambda n: (0, 0, 0)),    # weights resident
            pl.BlockSpec((1, cpad), lambda n: (0, 0)),           # bias resident
        ],
        out_specs=pl.BlockSpec((1, nr, cpad), lambda n: (n, 0, 0)),
        compiler_params=pltpu.CompilerParams(
            dimension_semantics=("parallel",)),
    )(xflat, w4, brow)


# ---------------------------------------------------------------------------
# JAX glue: padding, phase interleave, parameter repacking (done once)
# ---------------------------------------------------------------------------
def upconv_layer(x_nhwc, layer, *, act, out_dtype):
    """ConvTranspose2d(4, s=2, p=1) on an NHWC activation (already ReLU'd)."""
    N, H, W, _ = x_nhwc.shape
    Co = layer["co"]
    wpad = _round_up(W + 2, 8)
    # zero border: 1 top / 2 bottom / 1 left / (wpad - W - 1) right.
    xp = lax.pad(x_nhwc, jnp.zeros((), x_nhwc.dtype),
                 ((0, 0, 0), (1, 2, 0), (1, wpad - W - 1, 0), (0, 0, 0)))
    xflat = xp.reshape(N, (H + 3) * wpad, xp.shape[-1])
    nr = (H + 1) * wpad

    z = _upconv_call(xflat, layer["w4"], layer["brow"],
                     nr=nr, wpad=wpad, act=act, out_dtype=out_dtype)

    # Phase de-interleave (cheap reshape/slice on a small tensor):
    # z rows index (i, j) over (H+1, wpad); lanes index (ph_h, ph_w, co).
    z = z[:, :, :4 * Co].reshape(N, H + 1, wpad, 2, 2, Co)
    p00 = z[:, 0:H, 0:W, 0, 0, :]
    p01 = z[:, 0:H, 1:1 + W, 0, 1, :]
    p10 = z[:, 1:1 + H, 0:W, 1, 0, :]
    p11 = z[:, 1:1 + H, 1:1 + W, 1, 1, :]
    row0 = jnp.stack([p00, p01], axis=3)     # (N,H,W,2,Co)   index [n,r,c,b,co]
    row1 = jnp.stack([p10, p11], axis=3)
    y = jnp.stack([row0, row1], axis=2)      # (N,H,2,W,2,Co) index [n,r,a,c,b,co]
    return y.reshape(N, 2 * H, 2 * W, Co)


def _prep_deconv(w, b):
    """Repack ConvTranspose2d(Ci,Co,4,4) weights into 4 stacked phase/tap mats."""
    Ci, Co = w.shape[0], w.shape[1]
    cpad = max(128, _round_up(4 * Co, 128))
    taps = []
    for dh in (0, 1):
        for dw in (0, 1):
            # phase a uses kernel row kh = 3 - a - 2*dh (same for width).
            sub = w[:, :, [3 - 2 * dh, 2 - 2 * dh], :]
            sub = sub[:, :, :, [3 - 2 * dw, 2 - 2 * dw]]          # (Ci,Co,a,b)
            taps.append(sub.transpose(0, 2, 3, 1).reshape(Ci, 4 * Co))
    w4 = jnp.stack(taps, axis=0)                                   # (4,Ci,4Co)
    w4 = jnp.pad(w4, ((0, 0), (0, 0), (0, cpad - 4 * Co))).astype(jnp.bfloat16)
    brow = jnp.pad(jnp.tile(b, 4), (0, cpad - 4 * Co))
    brow = brow.astype(jnp.float32).reshape(1, cpad)
    return {"w4": w4, "brow": brow, "co": Co}


def _prep_head(wd, bd, wf, bf):
    C0, k1 = wf.shape[1], wf.shape[2]
    wt2 = wf.transpose(0, 2, 3, 1).reshape(wf.shape[0], k1 * k1 * C0)
    return {
        "wd_t": wd.T.astype(jnp.bfloat16),
        "bd_row": bd.reshape(1, -1).astype(jnp.float32),
        "wt2": wt2.astype(jnp.bfloat16),
        "bt_row": jnp.tile(bf, k1 * k1).reshape(1, -1).astype(jnp.float32),
        "c0": C0, "k1": k1,
    }


def build_plan(params):
    """One-time weight repacking (kept out of the per-step jitted path)."""
    wd, bd = params["dense"]
    wf, bf = params["deconv_first"]
    return {"head": _prep_head(wd, bd, wf, bf),
            "layers": [_prep_deconv(w, b) for (w, b) in params["deconv"]]}


def decoder_forward(x_, plan, *, ds=1):
    head = plan["head"]
    B = x_.shape[0]
    y = _head_call(x_.astype(jnp.bfloat16), head["wd_t"], head["bd_row"],
                   head["wt2"], head["bt_row"], jnp.bfloat16)
    x = y.reshape(B, head["k1"], head["k1"], head["c0"])   # NHWC, ReLU'd

    layers = plan["layers"]
    n_up = len(layers)
    for i, layer in enumerate(layers):
        last = (i == n_up - 1)
        act = ("tanh" if ds == 1 else None) if last else "relu"
        out_dtype = jnp.float32 if last else jnp.bfloat16
        x = upconv_layer(x, layer, act=act, out_dtype=out_dtype)

    y = jnp.transpose(x, (0, 3, 1, 2))                      # single NHWC->NCHW
    if ds > 1:
        # TODO(synk): bilinear upsample has no Pallas equivalent here; JAX glue.
        N_, C_, H_, W_ = y.shape
        y = jax.image.resize(y, (N_, C_, H_ * ds, W_ * ds), method="bilinear")
        y = jnp.tanh(y)
    return y


# ---------------------------------------------------------------------------
# Parameter init (matches the PyTorch module's shapes)
# ---------------------------------------------------------------------------
def init_params(key, latent_dim, d, n_clayers, n_channels, kernel1_size,
                std=0.02):
    chan_in = int(d * 2 ** (n_clayers - 2))
    n_tensors = 2 * (2 + (n_clayers - 1))
    keys = iter(jax.random.split(key, n_tensors))

    def nrm(shape, s):
        return s * jax.random.normal(next(keys), shape, jnp.float32)

    params = {
        'dense': (nrm((100, latent_dim), std), nrm((100,), 0.01)),
        'deconv_first': (nrm((100, chan_in, kernel1_size, kernel1_size), std),
                         nrm((chan_in,), 0.01)),
    }
    deconv = []
    ci = chan_in
    for i in range(n_clayers - 1):
        co = ci // 2 if i < n_clayers - 2 else n_channels
        deconv.append((nrm((ci, co, 4, 4), std), nrm((co,), 0.01)))
        ci = co
    params['deconv'] = deconv
    return params


# ---------------------------------------------------------------------------
# Pure-JAX f32 reference (lax.conv_general_dilated) for correctness check
# ---------------------------------------------------------------------------
def _ref_deconv(x, w_t, b, stride, padding):
    K = w_t.shape[2]
    w_conv = jnp.flip(w_t, (2, 3)).transpose(1, 0, 2, 3)
    y = jax.lax.conv_general_dilated(
        x, w_conv, window_strides=(1, 1),
        padding=((K - 1 - padding,) * 2,) * 2,
        lhs_dilation=(stride, stride),
        dimension_numbers=('NCHW', 'OIHW', 'NCHW'),
        precision=jax.lax.Precision.HIGHEST)
    return y + b[None, :, None, None]


def reference_forward(x_, params, *, ds=1):
    wd, bd = params['dense']
    h = x_ @ wd.T + bd
    wf, bf = params['deconv_first']
    x = _ref_deconv(h.reshape(-1, wf.shape[0], 1, 1), wf, bf, 1, 0)
    for (w, b) in params['deconv']:
        x = _ref_deconv(jax.nn.relu(x), w, b, 2, 1)
    if ds > 1:
        N_, C_, H_, W_ = x.shape
        x = jax.image.resize(x, (N_, C_, H_ * ds, W_ * ds), method='bilinear')
    return jnp.tanh(x)


if __name__ == "__main__":
    # Small config: latent_dim=10, d=16, n_clayers=4, n_channels=1, k1=4, ds=1.
    # Head -> (64, 4, 4); three upconvs: 4->8->16->32; output (2, 1, 32, 32).
    latent_dim, d, n_clayers, n_channels, k1, ds = 10, 16, 4, 1, 4, 1
    B = 2
    key = jax.random.PRNGKey(0)
    kx, kp = jax.random.split(key)
    x_ = jax.random.normal(kx, (B, latent_dim), jnp.float32)
    params = init_params(kp, latent_dim, d, n_clayers, n_channels, k1)

    plan = build_plan(params)                  # one-time weight repacking
    fwd = jax.jit(lambda z: decoder_forward(z, plan, ds=ds))
    out = jax.block_until_ready(fwd(x_))

    ref = reference_forward(x_, params, ds=ds)
    assert out.shape == (B, n_channels, 32, 32), out.shape
    max_err = float(jnp.max(jnp.abs(out - ref)))
    assert jnp.allclose(out, ref, atol=5e-3, rtol=5e-2), max_err
    print("KERNEL_OK")
</pallas_src>

<mosaic_0001>
module attributes {stable_mosaic.version = 11 : i64} {
  func.func @_head_kernel(%arg0: i32, %arg1: memref<2x10xbf16, #tpu.memory_space<vmem>>, %arg2: memref<10x100xbf16, #tpu.memory_space<vmem>>, %arg3: memref<1x100xf32, #tpu.memory_space<vmem>>, %arg4: memref<100x1024xbf16, #tpu.memory_space<vmem>>, %arg5: memref<1x1024xf32, #tpu.memory_space<vmem>>, %arg6: memref<2x1024xbf16, #tpu.memory_space<vmem>>) attributes {dimension_semantics = [#tpu.dimension_semantics<arbitrary>], iteration_bounds = array<i64: 1>, scalar_prefetch = 0 : i64, scratch_operands = 0 : i64, tpu.core_type = #tpu.core_type<tc>, window_params = [{pipeline_mode = #tpu.pipeline_mode<synchronous>, transform_indices = @transform_0, window_bounds = array<i64: 2, 10>}, {pipeline_mode = #tpu.pipeline_mode<synchronous>, transform_indices = @transform_1, window_bounds = array<i64: 10, 100>}, {pipeline_mode = #tpu.pipeline_mode<synchronous>, transform_indices = @transform_2, window_bounds = array<i64: 1, 100>}, {pipeline_mode = #tpu.pipeline_mode<synchronous>, transform_indices = @transform_3, window_bounds = array<i64: 100, 1024>}, {pipeline_mode = #tpu.pipeline_mode<synchronous>, transform_indices = @transform_4, window_bounds = array<i64: 1, 1024>}, {pipeline_mode = #tpu.pipeline_mode<synchronous>, transform_indices = @transform_5, window_bounds = array<i64: 2, 1024>}]} {
    %c0 = arith.constant 0 : index
    %c0_0 = arith.constant 0 : index
    %0 = vector.load %arg1[%c0, %c0_0] : memref<2x10xbf16, #tpu.memory_space<vmem>>, vector<2x10xbf16>
    %c0_1 = arith.constant 0 : index
    %c0_2 = arith.constant 0 : index
    %1 = vector.load %arg2[%c0_1, %c0_2] : memref<10x100xbf16, #tpu.memory_space<vmem>>, vector<10x100xbf16>
    %cst = arith.constant dense<0.000000e+00> : vector<2x100xf32>
    %2 = tpu.matmul %0, %1, %cst {dimension_numbers = #tpu.dot_dimension_numbers<[1], [0], [0], [1], [0, 0, 1, 1], [], []>} : vector<2x10xbf16>, vector<10x100xbf16>, vector<2x100xf32> -> vector<2x100xf32>
    %c0_3 = arith.constant 0 : index
    %c0_4 = arith.constant 0 : index
    %3 = vector.load %arg3[%c0_3, %c0_4] : memref<1x100xf32, #tpu.memory_space<vmem>>, vector<1x100xf32>
    %4 = vector.broadcast %3 : vector<1x100xf32> to vector<2x100xf32>
    %5 = arith.addf %2, %4 : vector<2x100xf32>
    %6 = arith.truncf %5 : vector<2x100xf32> to vector<2x100xbf16>
    %c0_5 = arith.constant 0 : index
    %c0_6 = arith.constant 0 : index
    %7 = vector.load %arg4[%c0_5, %c0_6] : memref<100x1024xbf16, #tpu.memory_space<vmem>>, vector<100x1024xbf16>
    %cst_7 = arith.constant dense<0.000000e+00> : vector<2x1024xf32>
    %8 = tpu.matmul %6, %7, %cst_7 {dimension_numbers = #tpu.dot_dimension_numbers<[1], [0], [0], [1], [0, 0, 1, 1], [], []>} : vector<2x100xbf16>, vector<100x1024xbf16>, vector<2x1024xf32> -> vector<2x1024xf32>
    %c0_8 = arith.constant 0 : index
    %c0_9 = arith.constant 0 : index
    %9 = vector.load %arg5[%c0_8, %c0_9] : memref<1x1024xf32, #tpu.memory_space<vmem>>, vector<1x1024xf32>
    %10 = vector.broadcast %9 : vector<1x1024xf32> to vector<2x1024xf32>
    %11 = arith.addf %8, %10 : vector<2x1024xf32>
    %cst_10 = arith.constant 0.000000e+00 : f32
    %12 = vector.broadcast %cst_10 : f32 to vector<2x1024xf32>
    %13 = arith.maximumf %11, %12 : vector<2x1024xf32>
    %14 = arith.truncf %13 : vector<2x1024xf32> to vector<2x1024xbf16>
    %c0_11 = arith.constant 0 : index
    %c0_12 = arith.constant 0 : index
    %15 = vector.load %arg6[%c0_11, %c0_12] : memref<2x1024xbf16, #tpu.memory_space<vmem>>, vector<2x1024xbf16>
    tpu.vector_store %arg6[%c0_11, %c0_12], %14 {strides = array<i32>} : memref<2x1024xbf16, #tpu.memory_space<vmem>>, vector<2x1024xbf16>,
    return
  }
  func.func @transform_0(%arg0: i32) -> (i32, i32) {
    %c0_i32 = arith.constant 0 : i32
    %c0_i32_0 = arith.constant 0 : i32
    %c0_i32_1 = arith.constant 0 : i32
    return %c0_i32, %c0_i32_0 : i32, i32
  }
  func.func @transform_1(%arg0: i32) -> (i32, i32) {
    %c0_i32 = arith.constant 0 : i32
    %c0_i32_0 = arith.constant 0 : i32
    %c0_i32_1 = arith.constant 0 : i32
    return %c0_i32, %c0_i32_0 : i32, i32
  }
  func.func @transform_2(%arg0: i32) -> (i32, i32) {
    %c0_i32 = arith.constant 0 : i32
    %c0_i32_0 = arith.constant 0 : i32
    %c0_i32_1 = arith.constant 0 : i32
    return %c0_i32, %c0_i32_0 : i32, i32
  }
  func.func @transform_3(%arg0: i32) -> (i32, i32) {
    %c0_i32 = arith.constant 0 : i32
    %c0_i32_0 = arith.constant 0 : i32
    %c0_i32_1 = arith.constant 0 : i32
    return %c0_i32, %c0_i32_0 : i32, i32
  }
  func.func @transform_4(%arg0: i32) -> (i32, i32) {
    %c0_i32 = arith.constant 0 : i32
    %c0_i32_0 = arith.constant 0 : i32
    %c0_i32_1 = arith.constant 0 : i32
    return %c0_i32, %c0_i32_0 : i32, i32
  }
  func.func @transform_5(%arg0: i32) -> (i32, i32) {
    %c0_i32 = arith.constant 0 : i32
    %c0_i32_0 = arith.constant 0 : i32
    %c0_i32_1 = arith.constant 0 : i32
    return %c0_i32, %c0_i32_0 : i32, i32
  }
}

module attributes {stable_mosaic.version = 11 : i64} {
  func.func @_upconv_kernel(%arg0: i32, %arg1: memref<1x56x64xbf16, #tpu.memory_space<vmem>>, %arg2: memref<4x64x128xbf16, #tpu.memory_space<vmem>>, %arg3: memref<1x128xf32, #tpu.memory_space<vmem>>, %arg4: memref<1x40x128xbf16, #tpu.memory_space<vmem>>) attributes {dimension_semantics = [#tpu.dimension_semantics<parallel>], iteration_bounds = array<i64: 2>, scalar_prefetch = 0 : i64, scratch_operands = 0 : i64, tpu.core_type = #tpu.core_type<tc>, window_params = [{transform_indices = @transform_0, window_bounds = array<i64: 1, 56, 64>}, {pipeline_mode = #tpu.pipeline_mode<synchronous>, transform_indices = @transform_1, window_bounds = array<i64: 4, 64, 128>}, {pipeline_mode = #tpu.pipeline_mode<synchronous>, transform_indices = @transform_2, window_bounds = array<i64: 1, 128>}, {transform_indices = @transform_3, window_bounds = array<i64: 1, 40, 128>}]} {
    %c0 = arith.constant 0 : index
    %c0_0 = arith.constant 0 : index
    %c0_1 = arith.constant 0 : index
    %0 = vector.load %arg1[%c0, %c0_0, %c0_1] : memref<1x56x64xbf16, #tpu.memory_space<vmem>>, vector<1x56x64xbf16>
    %1 = vector.shape_cast %0 : vector<1x56x64xbf16> to vector<56x64xbf16>
    %2 = vector.extract_strided_slice %1 {offsets = [0, 0], sizes = [40, 64], strides = [1, 1]} : vector<56x64xbf16> to vector<40x64xbf16>
    %c0_2 = arith.constant 0 : index
    %c0_3 = arith.constant 0 : index
    %c0_4 = arith.constant 0 : index
    %3 = vector.load %arg2[%c0_2, %c0_3, %c0_4] : memref<4x64x128xbf16, #tpu.memory_space<vmem>>, vector<1x64x128xbf16>
    %4 = vector.shape_cast %3 : vector<1x64x128xbf16> to vector<64x128xbf16>
    %cst = arith.constant dense<0.000000e+00> : vector<40x128xf32>
    %5 = tpu.matmul %2, %4, %cst {dimension_numbers = #tpu.dot_dimension_numbers<[1], [0], [0], [1], [0, 0, 1, 1], [], []>} : vector<40x64xbf16>, vector<64x128xbf16>, vector<40x128xf32> -> vector<40x128xf32>
    %6 = vector.extract_strided_slice %1 {offsets = [1, 0], sizes = [40, 64], strides = [1, 1]} : vector<56x64xbf16> to vector<40x64xbf16>
    %c1 = arith.constant 1 : index
    %c0_5 = arith.constant 0 : index
    %c0_6 = arith.constant 0 : index
    %7 = vector.load %arg2[%c1, %c0_5, %c0_6] : memref<4x64x128xbf16, #tpu.memory_space<vmem>>, vector<1x64x128xbf16>
    %8 = vector.shape_cast %7 : vector<1x64x128xbf16> to vector<64x128xbf16>
    %cst_7 = arith.constant dense<0.000000e+00> : vector<40x128xf32>
    %9 = tpu.matmul %6, %8, %cst_7 {dimension_numbers = #tpu.dot_dimension_numbers<[1], [0], [0], [1], [0, 0, 1, 1], [], []>} : vector<40x64xbf16>, vector<64x128xbf16>, vector<40x128xf32> -> vector<40x128xf32>
    %10 = arith.addf %5, %9 : vector<40x128xf32>
    %11 = vector.extract_strided_slice %1 {offsets = [8, 0], sizes = [40, 64], strides = [1, 1]} : vector<56x64xbf16> to vector<40x64xbf16>
    %c2 = arith.constant 2 : index
    %c0_8 = arith.constant 0 : index
    %c0_9 = arith.constant 0 : index
    %12 = vector.load %arg2[%c2, %c0_8, %c0_9] : memref<4x64x128xbf16, #tpu.memory_space<vmem>>, vector<1x64x128xbf16>
    %13 = vector.shape_cast %12 : vector<1x64x128xbf16> to vector<64x128xbf16>
    %cst_10 = arith.constant dense<0.000000e+00> : vector<40x128xf32>
    %14 = tpu.matmul %11, %13, %cst_10 {dimension_numbers = #tpu.dot_dimension_numbers<[1], [0], [0], [1], [0, 0, 1, 1], [], []>} : vector<40x64xbf16>, vector<64x128xbf16>, vector<40x128xf32> -> vector<40x128xf32>
    %15 = arith.addf %10, %14 : vector<40x128xf32>
    %16 = vector.extract_strided_slice %1 {offsets = [9, 0], sizes = [40, 64], strides = [1, 1]} : vector<56x64xbf16> to vector<40x64xbf16>
    %c3 = arith.constant 3 : index
    %c0_11 = arith.constant 0 : index
    %c0_12 = arith.constant 0 : index
    %17 = vector.load %arg2[%c3, %c0_11, %c0_12] : memref<4x64x128xbf16, #tpu.memory_space<vmem>>, vector<1x64x128xbf16>
    %18 = vector.shape_cast %17 : vector<1x64x128xbf16> to vector<64x128xbf16>
    %cst_13 = arith.constant dense<0.000000e+00> : vector<40x128xf32>
    %19 = tpu.matmul %16, %18, %cst_13 {dimension_numbers = #tpu.dot_dimension_numbers<[1], [0], [0], [1], [0, 0, 1, 1], [], []>} : vector<40x64xbf16>, vector<64x128xbf16>, vector<40x128xf32> -> vector<40x128xf32>
    %20 = arith.addf %15, %19 : vector<40x128xf32>
    %c0_14 = arith.constant 0 : index
    %c0_15 = arith.constant 0 : index
    %21 = vector.load %arg3[%c0_14, %c0_15] : memref<1x128xf32, #tpu.memory_space<vmem>>, vector<1x128xf32>
    %22 = vector.broadcast %21 : vector<1x128xf32> to vector<40x128xf32>
    %23 = arith.addf %20, %22 : vector<40x128xf32>
    %cst_16 = arith.constant 0.000000e+00 : f32
    %24 = vector.broadcast %cst_16 : f32 to vector<40x128xf32>
    %25 = arith.maximumf %23, %24 : vector<40x128xf32>
    %26 = arith.truncf %25 : vector<40x128xf32> to vector<40x128xbf16>
    %c0_17 = arith.constant 0 : index
    %c0_18 = arith.constant 0 : index
    %c0_19 = arith.constant 0 : index
    %27 = vector.load %arg4[%c0_17, %c0_18, %c0_19] : memref<1x40x128xbf16, #tpu.memory_space<vmem>>, vector<1x40x128xbf16>
    %28 = vector.shape_cast %27 : vector<1x40x128xbf16> to vector<40x128xbf16>
    %29 = vector.shape_cast %26 : vector<40x128xbf16> to vector<1x40x128xbf16>
    tpu.vector_store %arg4[%c0_17, %c0_18, %c0_19], %29 {strides = array<i32>} : memref<1x40x128xbf16, #tpu.memory_space<vmem>>, vector<1x40x128xbf16>,
    return
  }
  func.func @transform_0(%arg0: i32) -> (i32, i32, i32) {
    %c0_i32 = arith.constant 0 : i32
    %c0_i32_0 = arith.constant 0 : i32
    %c0_i32_1 = arith.constant 0 : i32
    return %arg0, %c0_i32, %c0_i32_0 : i32, i32, i32
  }
  func.func @transform_1(%arg0: i32) -> (i32, i32, i32) {
    %c0_i32 = arith.constant 0 : i32
    %c0_i32_0 = arith.constant 0 : i32
    %c0_i32_1 = arith.constant 0 : i32
    %c0_i32_2 = arith.constant 0 : i32
    return %c0_i32, %c0_i32_0, %c0_i32_1 : i32, i32, i32
  }
  func.func @transform_2(%arg0: i32) -> (i32, i32) {
    %c0_i32 = arith.constant 0 : i32
    %c0_i32_0 = arith.constant 0 : i32
    %c0_i32_1 = arith.constant 0 : i32
    return %c0_i32, %c0_i32_0 : i32, i32
  }
  func.func @transform_3(%arg0: i32) -> (i32, i32, i32) {
    %c0_i32 = arith.constant 0 : i32
    %c0_i32_0 = arith.constant 0 : i32
    %c0_i32_1 = arith.constant 0 : i32
    return %arg0, %c0_i32, %c0_i32_0 : i32, i32, i32
  }
}

module attributes {stable_mosaic.version = 11 : i64} {
  func.func @_upconv_kernel(%arg0: i32, %arg1: memref<1x176x32xbf16, #tpu.memory_space<vmem>>, %arg2: memref<4x32x128xbf16, #tpu.memory_space<vmem>>, %arg3: memref<1x128xf32, #tpu.memory_space<vmem>>, %arg4: memref<1x144x128xbf16, #tpu.memory_space<vmem>>) attributes {dimension_semantics = [#tpu.dimension_semantics<parallel>], iteration_bounds = array<i64: 2>, scalar_prefetch = 0 : i64, scratch_operands = 0 : i64, tpu.core_type = #tpu.core_type<tc>, window_params = [{transform_indices = @transform_0, window_bounds = array<i64: 1, 176, 32>}, {pipeline_mode = #tpu.pipeline_mode<synchronous>, transform_indices = @transform_1, window_bounds = array<i64: 4, 32, 128>}, {pipeline_mode = #tpu.pipeline_mode<synchronous>, transform_indices = @transform_2, window_bounds = array<i64: 1, 128>}, {transform_indices = @transform_3, window_bounds = array<i64: 1, 144, 128>}]} {
    %c0 = arith.constant 0 : index
    %c0_0 = arith.constant 0 : index
    %c0_1 = arith.constant 0 : index
    %0 = vector.load %arg1[%c0, %c0_0, %c0_1] : memref<1x176x32xbf16, #tpu.memory_space<vmem>>, vector<1x176x32xbf16>
    %1 = vector.shape_cast %0 : vector<1x176x32xbf16> to vector<176x32xbf16>
    %2 = vector.extract_strided_slice %1 {offsets = [0, 0], sizes = [144, 32], strides = [1, 1]} : vector<176x32xbf16> to vector<144x32xbf16>
    %c0_2 = arith.constant 0 : index
    %c0_3 = arith.constant 0 : index
    %c0_4 = arith.constant 0 : index
    %3 = vector.load %arg2[%c0_2, %c0_3, %c0_4] : memref<4x32x128xbf16, #tpu.memory_space<vmem>>, vector<1x32x128xbf16>
    %4 = vector.shape_cast %3 : vector<1x32x128xbf16> to vector<32x128xbf16>
    %cst = arith.constant dense<0.000000e+00> : vector<144x128xf32>
    %5 = tpu.matmul %2, %4, %cst {dimension_numbers = #tpu.dot_dimension_numbers<[1], [0], [0], [1], [0, 0, 1, 1], [], []>} : vector<144x32xbf16>, vector<32x128xbf16>, vector<144x128xf32> -> vector<144x128xf32>
    %6 = vector.extract_strided_slice %1 {offsets = [1, 0], sizes = [144, 32], strides = [1, 1]} : vector<176x32xbf16> to vector<144x32xbf16>
    %c1 = arith.constant 1 : index
    %c0_5 = arith.constant 0 : index
    %c0_6 = arith.constant 0 : index
    %7 = vector.load %arg2[%c1, %c0_5, %c0_6] : memref<4x32x128xbf16, #tpu.memory_space<vmem>>, vector<1x32x128xbf16>
    %8 = vector.shape_cast %7 : vector<1x32x128xbf16> to vector<32x128xbf16>
    %cst_7 = arith.constant dense<0.000000e+00> : vector<144x128xf32>
    %9 = tpu.matmul %6, %8, %cst_7 {dimension_numbers = #tpu.dot_dimension_numbers<[1], [0], [0], [1], [0, 0, 1, 1], [], []>} : vector<144x32xbf16>, vector<32x128xbf16>, vector<144x128xf32> -> vector<144x128xf32>
    %10 = arith.addf %5, %9 : vector<144x128xf32>
    %11 = vector.extract_strided_slice %1 {offsets = [16, 0], sizes = [144, 32], strides = [1, 1]} : vector<176x32xbf16> to vector<144x32xbf16>
    %c2 = arith.constant 2 : index
    %c0_8 = arith.constant 0 : index
    %c0_9 = arith.constant 0 : index
    %12 = vector.load %arg2[%c2, %c0_8, %c0_9] : memref<4x32x128xbf16, #tpu.memory_space<vmem>>, vector<1x32x128xbf16>
    %13 = vector.shape_cast %12 : vector<1x32x128xbf16> to vector<32x128xbf16>
    %cst_10 = arith.constant dense<0.000000e+00> : vector<144x128xf32>
    %14 = tpu.matmul %11, %13, %cst_10 {dimension_numbers = #tpu.dot_dimension_numbers<[1], [0], [0], [1], [0, 0, 1, 1], [], []>} : vector<144x32xbf16>, vector<32x128xbf16>, vector<144x128xf32> -> vector<144x128xf32>
    %15 = arith.addf %10, %14 : vector<144x128xf32>
    %16 = vector.extract_strided_slice %1 {offsets = [17, 0], sizes = [144, 32], strides = [1, 1]} : vector<176x32xbf16> to vector<144x32xbf16>
    %c3 = arith.constant 3 : index
    %c0_11 = arith.constant 0 : index
    %c0_12 = arith.constant 0 : index
    %17 = vector.load %arg2[%c3, %c0_11, %c0_12] : memref<4x32x128xbf16, #tpu.memory_space<vmem>>, vector<1x32x128xbf16>
    %18 = vector.shape_cast %17 : vector<1x32x128xbf16> to vector<32x128xbf16>
    %cst_13 = arith.constant dense<0.000000e+00> : vector<144x128xf32>
    %19 = tpu.matmul %16, %18, %cst_13 {dimension_numbers = #tpu.dot_dimension_numbers<[1], [0], [0], [1], [0, 0, 1, 1], [], []>} : vector<144x32xbf16>, vector<32x128xbf16>, vector<144x128xf32> -> vector<144x128xf32>
    %20 = arith.addf %15, %19 : vector<144x128xf32>
    %c0_14 = arith.constant 0 : index
    %c0_15 = arith.constant 0 : index
    %21 = vector.load %arg3[%c0_14, %c0_15] : memref<1x128xf32, #tpu.memory_space<vmem>>, vector<1x128xf32>
    %22 = vector.broadcast %21 : vector<1x128xf32> to vector<144x128xf32>
    %23 = arith.addf %20, %22 : vector<144x128xf32>
    %cst_16 = arith.constant 0.000000e+00 : f32
    %24 = vector.broadcast %cst_16 : f32 to vector<144x128xf32>
    %25 = arith.maximumf %23, %24 : vector<144x128xf32>
    %26 = arith.truncf %25 : vector<144x128xf32> to vector<144x128xbf16>
    %c0_17 = arith.constant 0 : index
    %c0_18 = arith.constant 0 : index
    %c0_19 = arith.constant 0 : index
    %27 = vector.load %arg4[%c0_17, %c0_18, %c0_19] : memref<1x144x128xbf16, #tpu.memory_space<vmem>>, vector<1x144x128xbf16>
    %28 = vector.shape_cast %27 : vector<1x144x128xbf16> to vector<144x128xbf16>
    %29 = vector.shape_cast %26 : vector<144x128xbf16> to vector<1x144x128xbf16>
    tpu.vector_store %arg4[%c0_17, %c0_18, %c0_19], %29 {strides = array<i32>} : memref<1x144x128xbf16, #tpu.memory_space<vmem>>, vector<1x144x128xbf16>,
    return
  }
  func.func @transform_0(%arg0: i32) -> (i32, i32, i32) {
    %c0_i32 = arith.constant 0 : i32
    %c0_i32_0 = arith.constant 0 : i32
    %c0_i32_1 = arith.constant 0 : i32
    return %arg0, %c0_i32, %c0_i32_0 : i32, i32, i32
  }
  func.func @transform_1(%arg0: i32) -> (i32, i32, i32) {
    %c0_i32 = arith.constant 0 : i32
    %c0_i32_0 = arith.constant 0 : i32
    %c0_i32_1 = arith.constant 0 : i32
    %c0_i32_2 = arith.constant 0 : i32
    return %c0_i32, %c0_i32_0, %c0_i32_1 : i32, i32, i32
  }
  func.func @transform_2(%arg0: i32) -> (i32, i32) {
    %c0_i32 = arith.constant 0 : i32
    %c0_i32_0 = arith.constant 0 : i32
    %c0_i32_1 = arith.constant 0 : i32
    return %c0_i32, %c0_i32_0 : i32, i32
  }
  func.func @transform_3(%arg0: i32) -> (i32, i32, i32) {
    %c0_i32 = arith.constant 0 : i32
    %c0_i32_0 = arith.constant 0 : i32
    %c0_i32_1 = arith.constant 0 : i32
    return %arg0, %c0_i32, %c0_i32_0 : i32, i32, i32
  }
}

module attributes {stable_mosaic.version = 11 : i64} {
  func.func @_upconv_kernel(%arg0: i32, %arg1: memref<1x456x16xbf16, #tpu.memory_space<vmem>>, %arg2: memref<4x16x128xbf16, #tpu.memory_space<vmem>>, %arg3: memref<1x128xf32, #tpu.memory_space<vmem>>, %arg4: memref<1x408x128xf32, #tpu.memory_space<vmem>>) attributes {dimension_semantics = [#tpu.dimension_semantics<parallel>], iteration_bounds = array<i64: 2>, scalar_prefetch = 0 : i64, scratch_operands = 0 : i64, tpu.core_type = #tpu.core_type<tc>, window_params = [{transform_indices = @transform_0, window_bounds = array<i64: 1, 456, 16>}, {pipeline_mode = #tpu.pipeline_mode<synchronous>, transform_indices = @transform_1, window_bounds = array<i64: 4, 16, 128>}, {pipeline_mode = #tpu.pipeline_mode<synchronous>, transform_indices = @transform_2, window_bounds = array<i64: 1, 128>}, {transform_indices = @transform_3, window_bounds = array<i64: 1, 408, 128>}]} {
    %c0 = arith.constant 0 : index
    %c0_0 = arith.constant 0 : index
    %c0_1 = arith.constant 0 : index
    %0 = vector.load %arg1[%c0, %c0_0, %c0_1] : memref<1x456x16xbf16, #tpu.memory_space<vmem>>, vector<1x456x16xbf16>
    %1 = vector.shape_cast %0 : vector<1x456x16xbf16> to vector<456x16xbf16>
    %2 = vector.extract_strided_slice %1 {offsets = [0, 0], sizes = [408, 16], strides = [1, 1]} : vector<456x16xbf16> to vector<408x16xbf16>
    %c0_2 = arith.constant 0 : index
    %c0_3 = arith.constant 0 : index
    %c0_4 = arith.constant 0 : index
    %3 = vector.load %arg2[%c0_2, %c0_3, %c0_4] : memref<4x16x128xbf16, #tpu.memory_space<vmem>>, vector<1x16x128xbf16>
    %4 = vector.shape_cast %3 : vector<1x16x128xbf16> to vector<16x128xbf16>
    %cst = arith.constant dense<0.000000e+00> : vector<408x128xf32>
    %5 = tpu.matmul %2, %4, %cst {dimension_numbers = #tpu.dot_dimension_numbers<[1], [0], [0], [1], [0, 0, 1, 1], [], []>} : vector<408x16xbf16>, vector<16x128xbf16>, vector<408x128xf32> -> vector<408x128xf32>
    %6 = vector.extract_strided_slice %1 {offsets = [1, 0], sizes = [408, 16], strides = [1, 1]} : vector<456x16xbf16> to vector<408x16xbf16>
    %c1 = arith.constant 1 : index
    %c0_5 = arith.constant 0 : index
    %c0_6 = arith.constant 0 : index
    %7 = vector.load %arg2[%c1, %c0_5, %c0_6] : memref<4x16x128xbf16, #tpu.memory_space<vmem>>, vector<1x16x128xbf16>
    %8 = vector.shape_cast %7 : vector<1x16x128xbf16> to vector<16x128xbf16>
    %cst_7 = arith.constant dense<0.000000e+00> : vector<408x128xf32>
    %9 = tpu.matmul %6, %8, %cst_7 {dimension_numbers = #tpu.dot_dimension_numbers<[1], [0], [0], [1], [0, 0, 1, 1], [], []>} : vector<408x16xbf16>, vector<16x128xbf16>, vector<408x128xf32> -> vector<408x128xf32>
    %10 = arith.addf %5, %9 : vector<408x128xf32>
    %11 = vector.extract_strided_slice %1 {offsets = [24, 0], sizes = [408, 16], strides = [1, 1]} : vector<456x16xbf16> to vector<408x16xbf16>
    %c2 = arith.constant 2 : index
    %c0_8 = arith.constant 0 : index
    %c0_9 = arith.constant 0 : index
    %12 = vector.load %arg2[%c2, %c0_8, %c0_9] : memref<4x16x128xbf16, #tpu.memory_space<vmem>>, vector<1x16x128xbf16>
    %13 = vector.shape_cast %12 : vector<1x16x128xbf16> to vector<16x128xbf16>
    %cst_10 = arith.constant dense<0.000000e+00> : vector<408x128xf32>
    %14 = tpu.matmul %11, %13, %cst_10 {dimension_numbers = #tpu.dot_dimension_numbers<[1], [0], [0], [1], [0, 0, 1, 1], [], []>} : vector<408x16xbf16>, vector<16x128xbf16>, vector<408x128xf32> -> vector<408x128xf32>
    %15 = arith.addf %10, %14 : vector<408x128xf32>
    %16 = vector.extract_strided_slice %1 {offsets = [25, 0], sizes = [408, 16], strides = [1, 1]} : vector<456x16xbf16> to vector<408x16xbf16>
    %c3 = arith.constant 3 : index
    %c0_11 = arith.constant 0 : index
    %c0_12 = arith.constant 0 : index
    %17 = vector.load %arg2[%c3, %c0_11, %c0_12] : memref<4x16x128xbf16, #tpu.memory_space<vmem>>, vector<1x16x128xbf16>
    %18 = vector.shape_cast %17 : vector<1x16x128xbf16> to vector<16x128xbf16>
    %cst_13 = arith.constant dense<0.000000e+00> : vector<408x128xf32>
    %19 = tpu.matmul %16, %18, %cst_13 {dimension_numbers = #tpu.dot_dimension_numbers<[1], [0], [0], [1], [0, 0, 1, 1], [], []>} : vector<408x16xbf16>, vector<16x128xbf16>, vector<408x128xf32> -> vector<408x128xf32>
    %20 = arith.addf %15, %19 : vector<408x128xf32>
    %c0_14 = arith.constant 0 : index
    %c0_15 = arith.constant 0 : index
    %21 = vector.load %arg3[%c0_14, %c0_15] : memref<1x128xf32, #tpu.memory_space<vmem>>, vector<1x128xf32>
    %22 = vector.broadcast %21 : vector<1x128xf32> to vector<408x128xf32>
    %23 = arith.addf %20, %22 : vector<408x128xf32>
    %24 = math.tanh %23 : vector<408x128xf32>
    %c0_16 = arith.constant 0 : index
    %c0_17 = arith.constant 0 : index
    %c0_18 = arith.constant 0 : index
    %25 = vector.load %arg4[%c0_16, %c0_17, %c0_18] : memref<1x408x128xf32, #tpu.memory_space<vmem>>, vector<1x408x128xf32>
    %26 = vector.shape_cast %25 : vector<1x408x128xf32> to vector<408x128xf32>
    %27 = vector.shape_cast %24 : vector<408x128xf32> to vector<1x408x128xf32>
    tpu.vector_store %arg4[%c0_16, %c0_17, %c0_18], %27 {strides = array<i32>} : memref<1x408x128xf32, #tpu.memory_space<vmem>>, vector<1x408x128xf32>,
    return
  }
  func.func @transform_0(%arg0: i32) -> (i32, i32, i32) {
    %c0_i32 = arith.constant 0 : i32
    %c0_i32_0 = arith.constant 0 : i32
    %c0_i32_1 = arith.constant 0 : i32
    return %arg0, %c0_i32, %c0_i32_0 : i32, i32, i32
  }
  func.func @transform_1(%arg0: i32) -> (i32, i32, i32) {
    %c0_i32 = arith.constant 0 : i32
    %c0_i32_0 = arith.constant 0 : i32
    %c0_i32_1 = arith.constant 0 : i32
    %c0_i32_2 = arith.constant 0 : i32
    return %c0_i32, %c0_i32_0, %c0_i32_1 : i32, i32, i32
  }
  func.func @transform_2(%arg0: i32) -> (i32, i32) {
    %c0_i32 = arith.constant 0 : i32
    %c0_i32_0 = arith.constant 0 : i32
    %c0_i32_1 = arith.constant 0 : i32
    return %c0_i32, %c0_i32_0 : i32, i32
  }
  func.func @transform_3(%arg0: i32) -> (i32, i32, i32) {
    %c0_i32 = arith.constant 0 : i32
    %c0_i32_0 = arith.constant 0 : i32
    %c0_i32_1 = arith.constant 0 : i32
    return %arg0, %c0_i32, %c0_i32_0 : i32, i32, i32
  }
}

</mosaic_0001>

<bundles_post_ra>
// kernel: _lambda_.4
= control target key start
LH: loop header
LB: loop body
LE: loop exit
PB: predicated region body
PF: predicated region fallthrough
CT: control target
= control target key end

     0   :  { %10 = vsyncpa [#allocation3], 0  ;;  %s845_s18 = smov [#allocation2]   ;;  %s928_s0 = inlined_call_operand.vmem [shape: bf16[2,10], index: 0, kind: input, shape index: {}]   ;;  %s929_s1 = inlined_call_operand.vmem [shape: bf16[10,100], index: 1, kind: input, shape index: {}]   ;;  %s930_s2 = inlined_call_operand.vmem [shape: f32[1,100], index: 2, kind: input, shape index: {}]   ;;  %s931_s3 = inlined_call_operand.hbm [shape: bf16[100,1024], index: 3, kind: input, shape index: {}]   ;;  %s932_s4 = inlined_call_operand.vmem [shape: f32[1,1024], index: 4, kind: input, shape index: {}]   ;;  %s933_s5 = inlined_call_operand.vmem [shape: bf16[2,1024], index: 5, kind: output, shape index: {}]  }
   0x1   :  { %s22_s19 = sshll.u32 %s845_s18, 4  ;;  %s821_s22 = scalar_lea.hbm %s931_s3, 6656  ;;  %s23_s19 = int_to_ptr.vmem [resolvable:$true] %s22_s19 }
   0x2   :  { %p822_p0 = scmp.ne.s32.totalorder %s931_s3, %s821_s22  ;;  %p825_p1 = scmp.lt.u32.totalorder %s821_s22, %s931_s3 }
   0x4   :  { %p827_p2 = pnand %p825_p1, %p822_p0 }
   0x6   :  { %830 = shalt.err (!%p827_p2)
}
   0x7   :  { %s831_s27 = scalar_lea.vmem %s23_s19, 6656  ;;  %p836_p4 = scmp.lt.s32.totalorder %s23_s19, %s23_s19 }
   0x8   :  { %p832_p3 = scmp.ne.s32.totalorder %s23_s19, %s831_s27  ;;  %p837_p5 = scmp.lt.s32.totalorder %s831_s27, %s831_s27 }
   0xa   :  { %p838_p6 = por %p837_p5, %p836_p4 }
   0xc   :  { %p839_p7 = pnand %p838_p6, %p832_p3 }
   0xe   :  { %842 = shalt.err (!%p839_p7)
}
   0xf   :  { %s846_s28 = smov 512   ;;  %s847_s29 = smov 32  }
  0x10   :  { %28 = dma.hbm_to_vmem [thread:$0]  %s931_s3, 6656, %s23_s19, [#allocation3], %s846_s28, %s846_s28, %s847_s29  }
  0x11   :  { %843 = dma.done.wait [#allocation3], 6656  }
  0x12   :  { %844 = vsyncadd [#allocation3], 4294960640  ;;  %v848_v0 = vmov 0.0   ;;  %vm849_vm0 = vmmov 0   ;;  %vm54_vm1 = vcmask 1044480   ;;  %v99_v3 = vld [vmem:[#allocation2] sm:$0xff] }
  0x13   :  { %799 = vmatprep.subr.bf16.mxu0 %v848_v0  ;;  %801 = vmatprep.mubr.msk.bf16.mxu0 %vm849_vm0, %v848_v0  ;;  %v812_v1 = vld [vmem:[%s929_s1] sm:$0x1f]   ;;  %v100_v7 = vld [vmem:[#allocation2 + $0x8] sm:$0xff]  ;;  %vm50_vm2 = vcmask 80896   ;;  %vm457_vm3 = vcmask 1041408   ;;  %v101_v60 = vld [vmem:[#allocation2 + $0x10] sm:$0xff] }
  0x14   :  { %v35_v2 = vld [vmem:[%s928_s0] sm:$0x1]  ;;  %v56_v5 = vsel %vm54_vm1, %v812_v1, 0  ;;  %v104_v8 = vld [vmem:[#allocation2 + $0x28] sm:$0xff]  ;;  %v105_v61 = vld [vmem:[#allocation2 + $0x30] sm:$0xff]  ;;  %vm453_vm4 = vcmask 818176  }
  0x15   :  { %v103_v4 = vld [vmem:[#allocation2 + $0x20] sm:$0xff]  ;;  %800 = vmatpush3.bf16.msra.mxu0 %v56_v5  ;;  %v731_v11 = vcombine.low %v100_v7, %v104_v8  ;;  %v732_v12 = vcombine.high %v100_v7, %v104_v8  ;;  %v108_v14 = vld [vmem:[#allocation2 + $0x48] sm:$0xff]  ;;  %v102_v62 = vld [vmem:[#allocation2 + $0x18] sm:$0xff]  ;;  %v734_v63 = vcombine.high %v101_v60, %v105_v61  ;;  %v733_v1 = vcombine.low %v101_v60, %v105_v61 }
  0x16   :  { %v730_v6 = vcombine.high %v99_v3, %v103_v4  ;;  %v729_v9 = vcombine.low %v99_v3, %v103_v4  ;;  %v107_v10 = vld [vmem:[#allocation2 + $0x40] sm:$0xff]  ;;  %v112_v15 = vld [vmem:[#allocation2 + $0x68] sm:$0xff]  ;;  %v106_v0 = vld [vmem:[#allocation2 + $0x38] sm:$0xff]  ;;  %v850_v4 = vmov 0   ;;  %v153_v60 = vlaneseq }
  0x17   :  { %v111_v13 = vld [vmem:[#allocation2 + $0x60] sm:$0xff]  ;;  %v740_v17 = vcombine.high %v108_v14, %v112_v15  ;;  %523 = vmatprep.subr.bf16.mxu0 %v732_v12  ;;  %v116_v21 = vld [vmem:[#allocation2 + $0x88] sm:$0xff]  ;;  %v739_v24 = vcombine.low %v108_v14, %v112_v15  ;;  %v736_v3 = vcombine.high %v102_v62, %v106_v0  ;;  %514 = vmatprep.mubr.bf16.mxu1 %v850_v4  ;;  %v113_v8 = vld [vmem:[#allocation2 + $0x70] sm:$0xff] }
  0x18   :  { %482 = vmatprep.subr.bf16.mxu1 %v730_v6  ;;  %v738_v16 = vcombine.high %v107_v10, %v111_v13  ;;  %v115_v18 = vld [vmem:[#allocation2 + $0x80] sm:$0xff]  ;;  %v737_v20 = vcombine.low %v107_v10, %v111_v13  ;;  %v120_v22 = vld [vmem:[#allocation2 + $0xa8] sm:$0xff]  ;;  %802 = vmatmul.mubr.msk.bf16.vlgmr.msra.gmra.mrb[0].mxu0 %vm50_vm2, %v35_v2  ;;  %v735_v2 = vcombine.low %v102_v62, %v106_v0  ;;  %v109_v6 = vld [vmem:[#allocation2 + $0x50] sm:$0xff]  ;;  %v154_v61 = vshrl.u32 %v153_v60, 7 }
  0x19   :  { %v119_v19 = vld [vmem:[#allocation2 + $0xa0] sm:$0xff]  ;;  %483 = vmatpush1.bf16.msra.mxu1 %v729_v9  ;;  %524 = vmatpush1.bf16.msra.mxu0 %v731_v11  ;;  %v748_v27 = vcombine.high %v116_v21, %v120_v22  ;;  %v124_v29 = vld [vmem:[#allocation2 + $0xc8] sm:$0xff]  ;;  %v747_v32 = vcombine.low %v116_v21, %v120_v22  ;;  %v110_v9 = vld [vmem:[#allocation2 + $0x58] sm:$0xff]  ;;  %v741_v22 = vcombine.low %v109_v6, %v113_v8 }
  0x1a   :  { %484 = vmatprep.subr.bf16.mxu1 %v738_v16  ;;  %v746_v23 = vcombine.high %v115_v18, %v119_v19  ;;  %v123_v25 = vld [vmem:[#allocation2 + $0xc0] sm:$0xff]  ;;  %525 = vmatprep.subr.bf16.mxu0 %v740_v17  ;;  %v745_v28 = vcombine.low %v115_v18, %v119_v19  ;;  %v128_v30 = vld [vmem:[#allocation2 + $0xe8] sm:$0xff]  ;;  %v114_v10 = vld [vmem:[#allocation2 + $0x78] sm:$0xff]  ;;  %v742_v16 = vcombine.high %v109_v6, %v113_v8  ;;  %v155_v62 = vsub.s32 0, %v154_v61 }
  0x1b   :  { %v127_v26 = vld [vmem:[#allocation2 + $0xe0] sm:$0xff]  ;;  %v756_v35 = vcombine.high %v124_v29, %v128_v30  ;;  %v132_v37 = vld [vmem:[#allocation2 + $0x108] sm:$0xff]  ;;  %v755_v40 = vcombine.low %v124_v29, %v128_v30  ;;  %555 = vmatprep.mubr.bf16.mxu0 %v850_v4  ;;  %v744_v17 = vcombine.high %v110_v9, %v114_v10  ;;  %v117_v18 = vld [vmem:[#allocation2 + $0x90] sm:$0xff] }
  0x1c   :  { %v754_v31 = vcombine.high %v123_v25, %v127_v26  ;;  %v131_v33 = vld [vmem:[#allocation2 + $0x100] sm:$0xff]  ;;  %v753_v36 = vcombine.low %v123_v25, %v127_v26  ;;  %v136_v38 = vld [vmem:[#allocation2 + $0x128] sm:$0xff]  ;;  %v121_v19 = vld [vmem:[#allocation2 + $0xb0] sm:$0xff] }
  0x1d   :  { %485 = vmatpush1.bf16.msra.mxu1 %v737_v20  ;;  %526 = vmatpush1.bf16.msra.mxu0 %v739_v24  ;;  %v135_v34 = vld [vmem:[#allocation2 + $0x120] sm:$0xff]  ;;  %v764_v43 = vcombine.high %v132_v37, %v136_v38  ;;  %v140_v45 = vld [vmem:[#allocation2 + $0x148] sm:$0xff]  ;;  %v763_v48 = vcombine.low %v132_v37, %v136_v38  ;;  %v118_v20 = vld [vmem:[#allocation2 + $0x98] sm:$0xff]  ;;  %v750_v24 = vcombine.high %v117_v18, %v121_v19 }
  0x1e   :  { %486 = vmatprep.subr.bf16.mxu1 %v746_v23  ;;  %527 = vmatprep.subr.bf16.mxu0 %v748_v27  ;;  %v762_v39 = vcombine.high %v131_v33, %v135_v34  ;;  %v139_v41 = vld [vmem:[#allocation2 + $0x140] sm:$0xff]  ;;  %v761_v44 = vcombine.low %v131_v33, %v135_v34  ;;  %v144_v46 = vld [vmem:[#allocation2 + $0x168] sm:$0xff]  ;;  %v122_v21 = vld [vmem:[#allocation2 + $0xb8] sm:$0xff]  ;;  %v743_v23 = vcombine.low %v110_v9, %v114_v10 }
  0x1f   :  { %v143_v42 = vld [vmem:[#allocation2 + $0x160] sm:$0xff]  ;;  %v772_v49 = vcombine.high %v140_v45, %v144_v46  ;;  %v771_v51 = vcombine.low %v140_v45, %v144_v46  ;;  %v148_v53 = vld [vmem:[#allocation2 + $0x188] sm:$0x33]  ;;  %v752_v25 = vcombine.high %v118_v20, %v122_v21  ;;  %v125_v26 = vld [vmem:[#allocation2 + $0xd0] sm:$0xff]  ;;  %v749_v30 = vcombine.low %v117_v18, %v121_v19 }
  0x20   :  { %v770_v47 = vcombine.high %v139_v41, %v143_v42  ;;  %v769_v50 = vcombine.low %v139_v41, %v143_v42  ;;  %v147_v52 = vld [vmem:[#allocation2 + $0x180] sm:$0x33]  ;;  %v780_v55 = vcombine.high %v148_v53, %v148_v53  ;;  %v779_v57 = vcombine.low %v148_v53, %v148_v53  ;;  %v129_v27 = vld [vmem:[#allocation2 + $0xf0] sm:$0xff]  ;;  %v130_v29 = vld [vmem:[#allocation2 + $0xf8] sm:$0xff] }
  0x21   :  { %487 = vmatpush1.bf16.msra.mxu1 %v745_v28  ;;  %528 = vmatpush1.bf16.msra.mxu0 %v747_v32  ;;  %v778_v54 = vcombine.high %v147_v52, %v147_v52  ;;  %v777_v56 = vcombine.low %v147_v52, %v147_v52  ;;  %v726_v5 = vld [vmem:[%s930_s2] ss:$0 sm:$0xff]  ;;  %v126_v28 = vld [vmem:[#allocation2 + $0xd8] sm:$0xff]  ;;  %v758_v32 = vcombine.high %v125_v26, %v129_v27  ;;  %v133_v34 = vld [vmem:[#allocation2 + $0x110] sm:$0xff] }
  0x22   :  { %488 = vmatprep.subr.bf16.mxu1 %v754_v31  ;;  %529 = vmatprep.subr.bf16.mxu0 %v756_v35  ;;  %v465_v59 = vsel %vm457_vm3, %v779_v57, 0  ;;  %v751_v31 = vcombine.low %v118_v20, %v122_v21  ;;  %v760_v33 = vcombine.high %v126_v28, %v130_v29  ;;  %v137_v35 = vld [vmem:[#allocation2 + $0x130] sm:$0xff]  ;;  %v138_v37 = vld [vmem:[#allocation2 + $0x138] sm:$0xff]  ;;  %v757_v38 = vcombine.low %v125_v26, %v129_v27  ;;  %v151_v0 = vld [vmem:[%s932_s4] sm:$0xff] }
  0x23   :  { %v459_v58 = vsel %vm457_vm3, %v777_v56, 0  ;;  %v141_v42 = vld [vmem:[#allocation2 + $0x150] sm:$0xff]  ;;  %v146_v45 = vld [vmem:[#allocation2 + $0x178] sm:$0xff]  ;;  %v765_v46 = vcombine.low %v133_v34, %v137_v35 }
  0x25   :  { %489 = vmatpush1.bf16.msra.mxu1 %v753_v36  ;;  %530 = vmatpush1.bf16.msra.mxu0 %v755_v40  ;;  %v134_v36 = vld [vmem:[#allocation2 + $0x118] sm:$0xff]  ;;  %v766_v40 = vcombine.high %v133_v34, %v137_v35  ;;  %v175_v34 = vsub.s32 5, %v154_v61  ;;  %v183_v35 = vsub.s32 7, %v154_v61 }
  0x26   :  { %490 = vmatprep.subr.bf16.mxu1 %v762_v39  ;;  %531 = vmatprep.subr.bf16.mxu0 %v764_v43  ;;  %v759_v39 = vcombine.low %v126_v28, %v130_v29  ;;  %v768_v41 = vcombine.high %v134_v36, %v138_v37  ;;  %v145_v43 = vld [vmem:[#allocation2 + $0x170] sm:$0xff] }
  0x27   :  { %v773_v52 = vcombine.low %v141_v42, %v145_v43 }
  0x29   :  { %491 = vmatpush1.bf16.msra.mxu1 %v761_v44  ;;  %532 = vmatpush1.bf16.msra.mxu0 %v763_v48  ;;  %v142_v44 = vld [vmem:[#allocation2 + $0x158] sm:$0xff]  ;;  %v774_v48 = vcombine.high %v141_v42, %v145_v43 }
  0x2a   :  { %492 = vmatprep.subr.bf16.mxu1 %v770_v47  ;;  %533 = vmatprep.subr.bf16.mxu0 %v772_v49  ;;  %v767_v47 = vcombine.low %v134_v36, %v138_v37  ;;  %v776_v49 = vcombine.high %v142_v44, %v146_v45  ;;  %v775_v53 = vcombine.low %v142_v44, %v146_v45 }
  0x2d   :  { %493 = vmatpush1.bf16.msra.mxu1 %v769_v50  ;;  %534 = vmatpush1.bf16.msra.mxu0 %v771_v51  ;;  %v149_v50 = vld [vmem:[#allocation2 + $0x190] sm:$0x33]  ;;  %v150_v51 = vld [vmem:[#allocation2 + $0x198] sm:$0x33] }
  0x2e   :  { %785 = vmatprep.subr.msk.bf16.mxu1 %vm457_vm3, %v778_v54  ;;  %787 = vmatprep.subr.msk.bf16.mxu0 %vm457_vm3, %v780_v55  ;;  %v782_v54 = vcombine.high %v149_v50, %v149_v50  ;;  %v784_v55 = vcombine.high %v150_v51, %v150_v51  ;;  %v781_v56 = vcombine.low %v149_v50, %v149_v50 }
  0x2f   :  { %v783_v57 = vcombine.low %v150_v51, %v150_v51 }
  0x31   :  { %495 = vmatpush1.bf16.msra.mxu1 %v459_v58  ;;  %536 = vmatpush1.bf16.msra.mxu0 %v465_v59  ;;  %v471_v58 = vsel %vm457_vm3, %v781_v56, 0  ;;  %v477_v59 = vsel %vm457_vm3, %v783_v57, 0 }
  0x32   :  { %564 = vmatprep.subr.bf16.mxu1 %v734_v63  ;;  %605 = vmatprep.subr.bf16.mxu0 %v736_v3  ;;  %v163_v63 = vsub.s32 2, %v154_v61  ;;  %v851_v3 = vmov 1966171168  }
  0x34   :  { %v164_v6 = vrot.slane %v151_v0, %v163_v63 }
  0xeb   :  { %v92_v7 = vpop.f32.mrb[0].mxu0 }
  0xec   :  { %v93_v11 = vadd.f32 %v726_v5, %v92_v7  ;;  %v803_v12 = vpop.f32.mrb[1].mxu0  ;;  %v156_v5 = vrot.slane %v151_v0, %v155_v62 }
  0xed   :  { %v95_v13 = vpop.f32.mrb[2].mxu0 }
  0xee   :  { %v908_v14 = vpack.c.bf16 %v93_v11, %v93_v11  ;;  %v804_v15 = vpop.f32.mrb[3].mxu0 }
  0xf0   :  { %786 = vmatmul.mubr.msk.bf16.vlgmr.msra.gmra.mrb[0].mxu1 %vm453_vm4, %v908_v14  ;;  %788 = vmatmul.mubr.msk.bf16.vlgmr.msra.gmra.mrb[4].mxu0 %vm453_vm4, %v908_v14 }
  0xf1   :  { %565 = vmatpush1.bf16.msra.mxu1 %v733_v1  ;;  %606 = vmatpush1.bf16.msra.mxu0 %v735_v2  ;;  %v159_v1 = vsub.s32 1, %v154_v61  ;;  %v167_v2 = vsub.s32 3, %v154_v61 }
  0xf2   :  { %566 = vmatprep.subr.bf16.mxu1 %v742_v16  ;;  %607 = vmatprep.subr.bf16.mxu0 %v744_v17 }
  0xf3   :  { %596 = vmatprep.mubr.bf16.mxu1 %v850_v4  ;;  %637 = vmatprep.mubr.bf16.mxu0 %v850_v4  ;;  %v675_v4 = vunpack.c.l.s4 %v851_v3  ;;  %v160_v7 = vrot.slane %v151_v0, %v159_v1  ;;  %v168_v8 = vrot.slane %v151_v0, %v167_v2 }
  0xf5   :  { %567 = vmatpush1.bf16.msra.mxu1 %v741_v22  ;;  %608 = vmatpush1.bf16.msra.mxu0 %v743_v23  ;;  %v676_v11 = vunpack.c.0.s8 %v675_v4 }
  0xf6   :  { %568 = vmatprep.subr.bf16.mxu1 %v750_v24  ;;  %609 = vmatprep.subr.bf16.mxu0 %v752_v25 }
  0xf7   :  { %v679_v25 = vsub.s32 %v676_v11, %v154_v61 }
  0xf9   :  { %569 = vmatpush1.bf16.msra.mxu1 %v749_v30  ;;  %610 = vmatpush1.bf16.msra.mxu0 %v751_v31 }
  0xfa   :  { %570 = vmatprep.subr.bf16.mxu1 %v758_v32  ;;  %611 = vmatprep.subr.bf16.mxu0 %v760_v33  ;;  %v171_v32 = vsub.s32 4, %v154_v61  ;;  %v179_v33 = vsub.s32 6, %v154_v61 }
  0xfc   :  { %v172_v36 = vrot.slane %v151_v0, %v171_v32  ;;  %v180_v37 = vrot.slane %v151_v0, %v179_v33 }
  0xfd   :  { %571 = vmatpush1.bf16.msra.mxu1 %v757_v38  ;;  %612 = vmatpush1.bf16.msra.mxu0 %v759_v39  ;;  %v176_v38 = vrot.slane %v151_v0, %v175_v34  ;;  %v184_v39 = vrot.slane %v151_v0, %v183_v35 }
  0xfe   :  { %572 = vmatprep.subr.bf16.mxu1 %v766_v40  ;;  %613 = vmatprep.subr.bf16.mxu0 %v768_v41 }
 0x101   :  { %573 = vmatpush1.bf16.msra.mxu1 %v765_v46  ;;  %614 = vmatpush1.bf16.msra.mxu0 %v767_v47 }
 0x102   :  { %574 = vmatprep.subr.bf16.mxu1 %v774_v48  ;;  %615 = vmatprep.subr.bf16.mxu0 %v776_v49 }
 0x105   :  { %575 = vmatpush1.bf16.msra.mxu1 %v773_v52  ;;  %616 = vmatpush1.bf16.msra.mxu0 %v775_v53 }
 0x106   :  { %789 = vmatprep.subr.msk.bf16.mxu1 %vm457_vm3, %v782_v54  ;;  %791 = vmatprep.subr.msk.bf16.mxu0 %vm457_vm3, %v784_v55 }
 0x109   :  { %577 = vmatpush1.bf16.msra.mxu1 %v471_v58  ;;  %618 = vmatpush1.bf16.msra.mxu0 %v477_v59 }
 0x10c   :  { %790 = vmatmul.mubr.msk.bf16.vlgmr.msra.gmra.mrb[4].mxu1 %vm453_vm4, %v908_v14  ;;  %792 = vmatmul.mubr.msk.bf16.vlgmr.msra.gmra.mrb[8].mxu0 %vm453_vm4, %v908_v14 }
 0x1c3   :  { %v516_v9 = vpop.f32.mrb[0].mxu1  ;;  %v557_v10 = vpop.f32.mrb[4].mxu0 }
 0x1c4   :  { %v517_v12 = vadd.f32 %v516_v9, %v156_v5  ;;  %v558_v13 = vadd.f32 %v557_v10, %v164_v6  ;;  %v518_v14 = vpop.f32.mrb[1].mxu1  ;;  %v559_v15 = vpop.f32.mrb[5].mxu0 }
 0x1c5   :  { %v519_v16 = vadd.f32 %v518_v14, %v160_v7  ;;  %v560_v17 = vadd.f32 %v559_v15, %v168_v8  ;;  %v520_v18 = vpop.f32.mrb[2].mxu1  ;;  %v561_v19 = vpop.f32.mrb[6].mxu0 }
 0x1c6   :  { %v646_v20 = vmax.f32 %v517_v12, 0.0  ;;  %v648_v21 = vmax.f32 %v558_v13, 0.0  ;;  %v521_v22 = vpop.f32.mrb[3].mxu1  ;;  %v562_v23 = vpop.f32.mrb[7].mxu0 }
 0x1c7   :  { %v647_v24 = vmax.f32 %v519_v16, 0.0  ;;  %v649_v26 = vmax.f32 %v560_v17, 0.0 }
 0x1c9   :  { %v793_v27 = vpack.c.bf16 %v647_v24, %v646_v20  ;;  %v794_v28 = vpack.c.bf16 %v649_v26, %v648_v21 }
 0x1cb   :  { %v680_v29 = vrot.slane %v793_v27, %v679_v25  ;;  %v687_v30 = vrot.slane %v794_v28, %v679_v25 }
 0x1cd   :  { %v702_v31 = vcombine.low %v680_v29, %v687_v30 }
 0x1cf   :  { %v710_v61 = vrot.slane %v702_v31, %v679_v25 }
 0x1df   :  { %v598_v40 = vpop.f32.mrb[4].mxu1  ;;  %v639_v41 = vpop.f32.mrb[8].mxu0 }
 0x1e0   :  { %v599_v42 = vadd.f32 %v598_v40, %v172_v36  ;;  %v640_v43 = vadd.f32 %v639_v41, %v180_v37  ;;  %v600_v44 = vpop.f32.mrb[5].mxu1  ;;  %v641_v45 = vpop.f32.mrb[9].mxu0 }
 0x1e1   :  { %v601_v46 = vadd.f32 %v600_v44, %v176_v38  ;;  %v642_v47 = vadd.f32 %v641_v45, %v184_v39  ;;  %v602_v48 = vpop.f32.mrb[6].mxu1  ;;  %v643_v49 = vpop.f32.mrb[10].mxu0 }
 0x1e2   :  { %v650_v50 = vmax.f32 %v599_v42, 0.0  ;;  %v652_v51 = vmax.f32 %v640_v43, 0.0  ;;  %v603_v52 = vpop.f32.mrb[7].mxu1  ;;  %v644_v53 = vpop.f32.mrb[11].mxu0 }
 0x1e3   :  { %v651_v54 = vmax.f32 %v601_v46, 0.0  ;;  %v653_v55 = vmax.f32 %v642_v47, 0.0 }
 0x1e5   :  { %v795_v56 = vpack.c.bf16 %v651_v54, %v650_v50  ;;  %v796_v57 = vpack.c.bf16 %v653_v55, %v652_v51 }
 0x1e7   :  { %v694_v58 = vrot.slane %v795_v56, %v679_v25  ;;  %v701_v59 = vrot.slane %v796_v57, %v679_v25 }
 0x1e9   :  { %v703_v60 = vcombine.low %v694_v58, %v701_v59 }
 0x1eb   :  { %v717_v62 = vrot.slane %v703_v60, %v679_v25 }
 0x1ed   :  { %v718_v63 = vcombine.low %v710_v61, %v717_v62 }
 0x1ef   :  { %720 = vst [vmem:[%s933_s5] sm:$0xff] %v718_v63 }
 0x1f0   :  { %725 = vsyncpa [#allocation3], 1 }

// kernel: _lambda_.5
= control target key start
LH: loop header
LB: loop body
LE: loop exit
PB: predicated region body
PF: predicated region fallthrough
CT: control target
= control target key end

     0   :  { %s1009_s12 = smov 0   ;;  %s1152_s0 = inlined_call_operand.vmem [shape: bf16[2,56,64], index: 0, kind: input, shape index: {}]   ;;  %s1153_s1 = inlined_call_operand.vmem [shape: bf16[4,64,128], index: 1, kind: input, shape index: {}]   ;;  %s1154_s2 = inlined_call_operand.vmem [shape: f32[1,128], index: 2, kind: input, shape index: {}]   ;;  %s1155_s3 = inlined_call_operand.vmem [shape: bf16[2,40,128], index: 3, kind: output, shape index: {}]  }
   0x1 LB: > { %s744_s13 = sadd.s32 4294967295, %s985_s12   ;;  %p748_p0 = scmp.ge.s32.totalorder %s985_s12, 1  ;;  %s985_s12 = sphi %s1009_s12, %s13_s12  }
   0x2   : > { %p137_p1 = scmp.lt.s32.totalorder %s985_s12, 3 }
   0x4   : > { %p138_p2 = pnand %p748_p0, %p137_p1 }
   0x5   : > { %v955_v0 = vld [vmem:[%s1153_s1 + $0x20] sm:$0xff] (!%p138_p2)   ;;  %v987_v1 = vmov (!%p138_p2), 0.0   ;;  %v957_v3 = vld [vmem:[%s1153_s1 + $0x28] sm:$0xff] (!%p138_p2)   ;;  %vm988_vm0 = vmmov (!%p138_p2), 0   ;;  %p161_p3 = scmp.lt.s32.totalorder (!%p138_p2), %s744_s13, 1  ;;  %v959_v5 = vld [vmem:[%s1153_s1 + $0x30] sm:$0xff] (!%p138_p2)  }
   0x6   : > { %141 = sbr.rel (%p138_p2) target bundleno = 290 (0x122), region = 32  ;;  %863 = vmatprep.subr.bf16.mxu0 (!%p138_p2), %v987_v1  ;;  %883 = vmatprep.subr.bf16.mxu1 (!%p138_p2), %v987_v1  ;;  %v956_v2 = vld [vmem:[%s1153_s1] sm:$0xff] (!%p138_p2)   ;;  %v958_v4 = vld [vmem:[%s1153_s1 + $0x8] sm:$0xff] (!%p138_p2)   ;;  %v960_v6 = vld [vmem:[%s1153_s1 + $0x10] sm:$0xff] (!%p138_p2)   ;;  %vm211_vm1 = vsmask.f32 (!%p138_p2), 7424 }
   0x7   : > { %864 = vmatpush3.bf16.msra.mxu0 (!%p138_p2), %v955_v0  ;;  %871 = vmatprep.mubr.msk.bf16.mxu0 (!%p138_p2), %vm988_vm0, %v987_v1  ;;  %v961_v10 = vld [vmem:[%s1153_s1 + $0x38] sm:$0xff] (!%p138_p2)   ;;  %vm259_vm2 = vcmask (!%p138_p2), 523264   ;;  %v966_v21 = vld [vmem:[%s1153_s1 + $0x40] sm:$0xff] (!%p138_p2)   ;;  %v971_v29 = vld [vmem:[%s1153_s1 + $0x68] sm:$0xff] (!%p138_p2)  }
   0x8   : > { %884 = vmatpush3.bf16.msra.mxu1 (!%p138_p2), %v956_v2  ;;  %865 = vmatprep.subr.bf16.mxu0 (!%p138_p2), %v987_v1  ;;  %v962_v13 = vld [vmem:[%s1153_s1 + $0x18] sm:$0xff] (!%p138_p2)   ;;  %v967_v24 = vld [vmem:[%s1153_s1 + $0x60] sm:$0xff] (!%p138_p2)   ;;  %v968_v30 = vld [vmem:[%s1153_s1 + $0x48] sm:$0xff] (!%p138_p2)  }
   0x9   : > { %885 = vmatprep.subr.bf16.mxu1 (!%p138_p2), %v987_v1  ;;  %891 = vmatprep.mubr.msk.bf16.mxu1 (!%p138_p2), %vm988_vm0, %v987_v1  ;;  %v972_v35 = vld [vmem:[%s1153_s1 + $0x50] sm:$0xff] (!%p138_p2)   ;;  %v975_v40 = vld [vmem:[%s1153_s1 + $0x58] sm:$0xff] (!%p138_p2)  }
   0xa   : > { %v973_v36 = vld [vmem:[%s1153_s1 + $0x70] sm:$0xff] (!%p138_p2)   ;;  %v976_v41 = vld [vmem:[%s1153_s1 + $0x78] sm:$0xff] (!%p138_p2)  }
   0xb   : > { %866 = vmatpush3.bf16.msra.mxu0 (!%p138_p2), %v957_v3 }
   0xc   : > { %886 = vmatpush3.bf16.msra.mxu1 (!%p138_p2), %v958_v4  ;;  %867 = vmatprep.subr.bf16.mxu0 (!%p138_p2), %v987_v1 }
   0xd   : > { %s1157_s13 = smov (!%p161_p3, %s744_s13), 1  ;;  %887 = vmatprep.subr.bf16.mxu1 %v987_v1 }
   0xe   : > { %s943_s24 = smul.u32 28, %s1157_s13 }
   0xf   : > { %868 = vmatpush3.bf16.msra.mxu0 %v959_v5  ;;  %s944_s27 = smul.u32 20, %s1157_s13 }
  0x10   : > { %s1051_s29 = scalar_lea.vmem %s1152_s0, %s943_s24  ;;  %888 = vmatpush3.bf16.msra.mxu1 %v960_v6  ;;  %869 = vmatprep.subr.bf16.mxu0 %v987_v1 }
  0x11   : > { %v172_v7 = vld [vmem:[%s1051_s29] sm:$0xf]  ;;  %v173_v8 = vld [vmem:[%s1051_s29 + $0x4] sm:$0xf]  ;;  %v174_v9 = vld [vmem:[%s1051_s29 + $0x8] sm:$0xf]  ;;  %889 = vmatprep.subr.bf16.mxu1 %v987_v1  ;;  %s170_s30 = scalar_lea.vmem %s1155_s3, %s944_s27 }
  0x12   : > { %v175_v11 = vld [vmem:[%s1051_s29 + $0xc] sm:$0xf]  ;;  %v759_v12 = vcombine.low %v172_v7, %v173_v8  ;;  %v176_v18 = vld [vmem:[%s1051_s29 + $0x10] sm:$0xf]  ;;  %v1067_v19 = vld [vmem:[%s1051_s29 + $0x14] sm:$0xf]  ;;  %v785_v33 = vcombine.low %v173_v8, %v174_v9 }
  0x13   : > { %v760_v14 = vcombine.low %v174_v9, %v175_v11  ;;  %870 = vmatpush3.bf16.msra.mxu0 %v961_v10  ;;  %v761_v22 = vcombine.low %v176_v18, %v1067_v19  ;;  %v786_v37 = vcombine.low %v175_v11, %v176_v18  ;;  %v769_v42 = vcombine.low %v176_v18, %v176_v18  ;;  %v178_v47 = vld [vmem:[%s1051_s29 + $0x18] sm:$0xf] }
  0x14   : > { %v213_v15 = vshrl.u32 %v759_v12, 16  ;;  %v215_v16 = vshll.u32 %v759_v12, 16  ;;  %890 = vmatpush3.bf16.msra.mxu1 %v962_v13  ;;  %903 = vmatprep.subr.bf16.mxu0 %v987_v1  ;;  %v533_v39 = vshll.u32 %v785_v33, 16  ;;  %v531_v44 = vshrl.u32 %v785_v33, 16 }
  0x15   : > { %v220_v17 = vshll.u32 %v760_v14, 16  ;;  %923 = vmatprep.subr.bf16.mxu1 %v987_v1  ;;  %v224_v26 = vshrl.u32 %v760_v14, 16  ;;  %v228_v27 = vshll.u32 %v761_v22, 16  ;;  %v232_v38 = vshrl.u32 %v761_v22, 16 }
  0x16   : > { %v217_v20 = vrot.slane %v215_v16, 1  ;;  %v535_v45 = vrot.slane %v533_v39, 1  ;;  %v537_v46 = vshll.u32 %v786_v37, 16  ;;  %v803_v50 = vcombine.low %v1067_v19, %v178_v47 }
  0x17   : > { %v222_v23 = vrot.slane %v220_v17, 1  ;;  %892 = vmatmul.mubr.msk.bf16.vlgmr.msra.gmra.mrb[0].mxu1 %vm259_vm2, %v759_v12  ;;  %v230_v32 = vrot.slane %v228_v27, 1  ;;  %v541_v52 = vshrl.u32 %v786_v37, 16  ;;  %v787_v59 = vcombine.low %v1067_v19, %v1067_v19 }
  0x18   : > { %v218_v25 = vor.u32 %v217_v20, %v213_v15  ;;  %924 = vmatpush3.bf16.msra.mxu1 %v967_v24  ;;  %895 = vmatprep.mubr.msk.bf16.mxu1 %vm988_vm0, %v987_v1  ;;  %v536_v48 = vor.u32 %v535_v45, %v531_v44  ;;  %v539_v49 = vrot.slane %v537_v46, 1  ;;  %v545_v53 = vshll.u32 %v803_v50, 16 }
  0x19   : > { %v226_v31 = vor.u32 %v224_v26, %v222_v23  ;;  %925 = vmatprep.subr.bf16.mxu1 %v987_v1  ;;  %v234_v43 = vor.u32 %v232_v38, %v230_v32  ;;  %v549_v57 = vshrl.u32 %v803_v50, 16 }
  0x1a   : > { %v223_v28 = vsel %vm211_vm1, %v218_v25, %v222_v23  ;;  %v540_v51 = vsel %vm211_vm1, %v536_v48, %v539_v49  ;;  %v543_v54 = vor.u32 %v541_v52, %v539_v49  ;;  %v547_v55 = vrot.slane %v545_v53, 1 }
  0x1b   : > { %872 = vmatmul.mubr.msk.bf16.vlgmr.msra.gmra.mrb[0].mxu0 %vm259_vm2, %v223_v28  ;;  %v231_v34 = vsel %vm211_vm1, %v226_v31, %v230_v32  ;;  %v811_v31 = vld [vmem:[%s1154_s2] ss:$0 sm:$0xff] }
  0x1c   : > { %904 = vmatpush3.bf16.msra.mxu0 %v966_v21  ;;  %875 = vmatprep.mubr.msk.bf16.mxu0 %vm988_vm0, %v987_v1  ;;  %v548_v56 = vsel %vm211_vm1, %v543_v54, %v547_v55  ;;  %v551_v58 = vor.u32 %v549_v57, %v547_v55 }
  0x1d   : > { %905 = vmatprep.subr.bf16.mxu0 %v987_v1  ;;  %926 = vmatpush3.bf16.msra.mxu1 %v971_v29 }
  0x1e   : > { %927 = vmatprep.subr.bf16.mxu1 %v987_v1 }
  0x1f   : > { %896 = vmatmul.mubr.msk.bf16.gmra.mrb[4].mxu1 %vm259_vm2, %v760_v14 }
  0x20   : > { %906 = vmatpush3.bf16.msra.mxu0 %v968_v30  ;;  %899 = vmatprep.mubr.msk.bf16.mxu1 %vm988_vm0, %v987_v1 }
  0x21   : > { %907 = vmatprep.subr.bf16.mxu0 %v987_v1  ;;  %928 = vmatpush3.bf16.msra.mxu1 %v973_v36 }
  0x22   : > { %929 = vmatprep.subr.bf16.mxu1 %v987_v1 }
  0x23   : > { %876 = vmatmul.mubr.msk.bf16.gmra.mrb[4].mxu0 %vm259_vm2, %v231_v34 }
  0x24   : > { %908 = vmatpush3.bf16.msra.mxu0 %v972_v35  ;;  %879 = vmatprep.mubr.msk.bf16.mxu0 %vm988_vm0, %v987_v1 }
  0x25   : > { %909 = vmatprep.subr.bf16.mxu0 %v987_v1  ;;  %930 = vmatpush3.bf16.msra.mxu1 %v976_v41 }
  0x27   : > { %900 = vmatmul.mubr.msk.bf16.gmra.mrb[8].mxu1 %vm259_vm2, %v769_v42 }
  0x28   : > { %910 = vmatpush3.bf16.msra.mxu0 %v975_v40  ;;  %931 = vmatprep.mubr.msk.bf16.mxu1 %vm988_vm0, %v987_v1 }
  0x2b   : > { %880 = vmatmul.mubr.msk.bf16.gmra.mrb[8].mxu0 %vm259_vm2, %v234_v43 }
  0x2c   : > { %911 = vmatprep.mubr.msk.bf16.mxu0 %vm988_vm0, %v987_v1 }
  0x2f   : > { %932 = vmatmul.mubr.msk.bf16.vlgmr.msra.gmra.mrb[12].mxu1 %vm259_vm2, %v540_v51 }
  0x30   : > { %935 = vmatprep.mubr.msk.bf16.mxu1 %vm988_vm0, %v987_v1 }
  0x33   : > { %912 = vmatmul.mubr.msk.bf16.vlgmr.msra.gmra.mrb[12].mxu0 %vm259_vm2, %v785_v33 }
  0x34   : > { %915 = vmatprep.mubr.msk.bf16.mxu0 %vm988_vm0, %v987_v1 }
  0x37   : > { %936 = vmatmul.mubr.msk.bf16.gmra.mrb[16].mxu1 %vm259_vm2, %v548_v56 }
  0x38   : > { %939 = vmatprep.mubr.msk.bf16.mxu1 %vm988_vm0, %v987_v1 }
  0x3b   : > { %916 = vmatmul.mubr.msk.bf16.gmra.mrb[16].mxu0 %vm259_vm2, %v786_v37 }
  0x3c   : > { %919 = vmatprep.mubr.msk.bf16.mxu0 %vm988_vm0, %v987_v1 }
  0x3f   : > { %940 = vmatmul.mubr.msk.bf16.gmra.mrb[20].mxu1 %vm259_vm2, %v551_v58 }
  0x43   : > { %920 = vmatmul.mubr.msk.bf16.gmra.mrb[20].mxu0 %vm259_vm2, %v787_v59 }
  0xea   : > { %v391_v60 = vpop.f32.mrb[0].mxu1 }
  0xeb   : > { %v893_v62 = vpop.f32.mrb[1].mxu1 }
  0xec   : > { %v394_v2 = vpop.f32.mrb[2].mxu1 }
  0xed   : > { %v894_v4 = vpop.f32.mrb[3].mxu1 }
  0xee   : > { %v303_v61 = vpop.f32.mrb[0].mxu0 }
  0xef   : > { %v392_v63 = vadd.f32 %v391_v60, %v303_v61  ;;  %v873_v0 = vpop.f32.mrb[1].mxu0 }
  0xf0   : > { %v306_v3 = vpop.f32.mrb[2].mxu0 }
  0xf1   : > { %v395_v5 = vadd.f32 %v394_v2, %v306_v3  ;;  %v874_v6 = vpop.f32.mrb[3].mxu0 }
  0xf2   : > { %v399_v7 = vpop.f32.mrb[4].mxu1 }
  0xf3   : > { %v897_v8 = vpop.f32.mrb[5].mxu1 }
  0xf4   : > { %v402_v11 = vpop.f32.mrb[6].mxu1 }
  0xf5   : > { %v898_v13 = vpop.f32.mrb[7].mxu1 }
  0xf6   : > { %v311_v1 = vpop.f32.mrb[4].mxu0 }
  0xf7   : > { %v400_v9 = vadd.f32 %v399_v7, %v311_v1  ;;  %v877_v10 = vpop.f32.mrb[5].mxu0 }
  0xf8   : > { %v314_v12 = vpop.f32.mrb[6].mxu0 }
  0xf9   : > { %v403_v14 = vadd.f32 %v402_v11, %v314_v12  ;;  %v878_v15 = vpop.f32.mrb[7].mxu0 }
  0xfa   : > { %v407_v16 = vpop.f32.mrb[8].mxu1 }
  0xfb   : > { %v901_v18 = vpop.f32.mrb[9].mxu1 }
  0xfc   : > { %v410_v21 = vpop.f32.mrb[10].mxu1 }
  0xfd   : > { %v902_v23 = vpop.f32.mrb[11].mxu1 }
  0xfe   : > { %v319_v17 = vpop.f32.mrb[8].mxu0 }
  0xff   : > { %v408_v19 = vadd.f32 %v407_v16, %v319_v17  ;;  %v881_v20 = vpop.f32.mrb[9].mxu0 }
 0x100   : > { %v322_v22 = vpop.f32.mrb[10].mxu0 }
 0x101   : > { %v882_v24 = vpop.f32.mrb[11].mxu0 }
 0x102   : > { %v619_v25 = vpop.f32.mrb[12].mxu1 }
 0x103   : > { %v933_v27 = vpop.f32.mrb[13].mxu1 }
 0x104   : > { %v622_v30 = vpop.f32.mrb[14].mxu1 }
 0x105   : > { %v934_v33 = vpop.f32.mrb[15].mxu1 }
 0x106   : > { %v492_v26 = vpop.f32.mrb[12].mxu0 }
 0x107   : > { %v514_v28 = vadd.f32 %v492_v26, %v392_v63  ;;  %v913_v29 = vpop.f32.mrb[13].mxu0 }
 0x108   : > { %v495_v32 = vpop.f32.mrb[14].mxu0 }
 0x109   : > { %v641_v34 = vadd.f32 %v619_v25, %v514_v28  ;;  %v515_v35 = vadd.f32 %v495_v32, %v395_v5  ;;  %v914_v36 = vpop.f32.mrb[15].mxu0 }
 0x10a   : > { %v627_v40 = vpop.f32.mrb[16].mxu1 }
 0x10b   : > { %v653_v37 = vadd.f32 %v811_v31, %v641_v34  ;;  %v642_v38 = vadd.f32 %v622_v30, %v515_v35  ;;  %v937_v42 = vpop.f32.mrb[17].mxu1 }
 0x10c   : > { %v630_v47 = vpop.f32.mrb[18].mxu1 }
 0x10d   : > { %v654_v39 = vadd.f32 %v811_v31, %v642_v38  ;;  %v658_v43 = vmax.f32 %v653_v37, 0.0  ;;  %v938_v49 = vpop.f32.mrb[19].mxu1 }
 0x10e   : > { %v500_v41 = vpop.f32.mrb[16].mxu0 }
 0x10f   : > { %v659_v44 = vmax.f32 %v654_v39, 0.0  ;;  %v516_v45 = vadd.f32 %v500_v41, %v400_v9  ;;  %v917_v46 = vpop.f32.mrb[17].mxu0 }
 0x110   : > { %v503_v48 = vpop.f32.mrb[18].mxu0 }
 0x111   : > { %v827_v50 = vpack.c.bf16 %v659_v44, %v658_v43  ;;  %v643_v51 = vadd.f32 %v627_v40, %v516_v45  ;;  %v517_v52 = vadd.f32 %v503_v48, %v403_v14  ;;  %v918_v53 = vpop.f32.mrb[19].mxu0 }
 0x112   : > { %v635_v57 = vpop.f32.mrb[20].mxu1 }
 0x113   : > { %828 = vst [vmem:[%s170_s30] sm:$0xff] %v827_v50   ;;  %v655_v54 = vadd.f32 %v811_v31, %v643_v51  ;;  %v644_v55 = vadd.f32 %v630_v47, %v517_v52  ;;  %v941_v59 = vpop.f32.mrb[21].mxu1 }
 0x114   : > { %v638_v0 = vpop.f32.mrb[22].mxu1 }
 0x115   : > { %v656_v56 = vadd.f32 %v811_v31, %v644_v55  ;;  %v660_v60 = vmax.f32 %v655_v54, 0.0  ;;  %v942_v3 = vpop.f32.mrb[23].mxu1 }
 0x116   : > { %v508_v58 = vpop.f32.mrb[20].mxu0 }
 0x117   : > { %v661_v61 = vmax.f32 %v656_v56, 0.0  ;;  %v518_v62 = vadd.f32 %v508_v58, %v408_v19  ;;  %v921_v63 = vpop.f32.mrb[21].mxu0 }
 0x118   : > { %v511_v2 = vpop.f32.mrb[22].mxu0 }
 0x119   : > { %v832_v4 = vpack.c.bf16 %v661_v61, %v660_v60  ;;  %v645_v5 = vadd.f32 %v635_v57, %v518_v62  ;;  %v922_v6 = vpop.f32.mrb[23].mxu0 }
 0x11b   : > { %834 = vst [vmem:[%s170_s30 + $0x8] sm:$0xff] %v832_v4   ;;  %v657_v7 = vadd.f32 %v811_v31, %v645_v5 }
 0x11d   : > { %v662_v1 = vmax.f32 %v657_v7, 0.0 }
 0x11f   : > { %v823_v8 = vpack.c.bf16 %v662_v1, %v662_v1 }
 0x121   : > { %688 = vst [vmem:[%s170_s30 + $0x10] sm:$0xf] %v823_v8 }
 0x122 PF: > { %s13_s12 = sadd.s32 1, %s985_s12  }
 0x123   : > { %p10_p4 = scmp.ge.s32.totalorder %s13_s12, 4  }
 0x125   :  { %12 = sbr.rel (!%p10_p4) target bundleno = 1 (0x1), region = 65 }

// kernel: _lambda_.6
= control target key start
LH: loop header
LB: loop body
LE: loop exit
PB: predicated region body
PF: predicated region fallthrough
CT: control target
= control target key end

     0   :  { %s1535_s12 = smov 0   ;;  %s1864_s0 = inlined_call_operand.vmem [shape: bf16[2,176,32], index: 0, kind: input, shape index: {}]   ;;  %s1865_s1 = inlined_call_operand.vmem [shape: bf16[4,32,128], index: 1, kind: input, shape index: {}]   ;;  %s1866_s2 = inlined_call_operand.vmem [shape: f32[1,128], index: 2, kind: input, shape index: {}]   ;;  %s1867_s3 = inlined_call_operand.vmem [shape: bf16[2,144,128], index: 3, kind: output, shape index: {}]  }
   0x1 LB: > { %s1102_s13 = sadd.s32 4294967295, %s1511_s12   ;;  %p1106_p0 = scmp.ge.s32.totalorder %s1511_s12, 1  ;;  %s1511_s12 = sphi %s1535_s12, %s13_s12  }
   0x2   : > { %p137_p1 = scmp.lt.s32.totalorder %s1511_s12, 3 }
   0x4   : > { %p138_p2 = pnand %p1106_p0, %p137_p1 }
   0x5   : > { %v1485_v0 = vld [vmem:[%s1865_s1 + $0x10] sm:$0xff] (!%p138_p2)   ;;  %v1513_v1 = vmov (!%p138_p2), 0.0   ;;  %v1486_v2 = vld [vmem:[%s1865_s1] sm:$0xff] (!%p138_p2)   ;;  %v1487_v3 = vld [vmem:[%s1865_s1 + $0x18] sm:$0xff] (!%p138_p2)   ;;  %vm1514_vm0 = vmmov (!%p138_p2), 0   ;;  %p161_p3 = scmp.lt.s32.totalorder (!%p138_p2), %s1102_s13, 1 }
   0x6   : > { %141 = sbr.rel (%p138_p2) target bundleno = 386 (0x182), region = 32  ;;  %1313 = vmatprep.subr.bf16.mxu0 (!%p138_p2), %v1513_v1  ;;  %1353 = vmatprep.subr.bf16.mxu1 (!%p138_p2), %v1513_v1  ;;  %v1488_v4 = vld [vmem:[%s1865_s1 + $0x8] sm:$0xff] (!%p138_p2)   ;;  %vm339_vm1 = vcmask (!%p138_p2), 261120   ;;  %v1492_v5 = vld [vmem:[%s1865_s1 + $0x30] sm:$0xff] (!%p138_p2)   ;;  %v1498_v12 = vld [vmem:[%s1865_s1 + $0x38] sm:$0xff] (!%p138_p2)  }
   0x7   : > { %1314 = vmatpush3.bf16.msra.mxu0 (!%p138_p2), %v1485_v0  ;;  %1357 = vmatprep.mubr.msk.bf16.mxu1 (!%p138_p2), %vm1514_vm0, %v1513_v1  ;;  %vm250_vm2 = vsmask.f32 (!%p138_p2), 7424  ;;  %v1491_v15 = vld [vmem:[%s1865_s1 + $0x20] sm:$0xff] (!%p138_p2)   ;;  %v1497_v23 = vld [vmem:[%s1865_s1 + $0x28] sm:$0xff] (!%p138_p2)  }
   0x8   : > { %1354 = vmatpush3.bf16.msra.mxu1 (!%p138_p2), %v1486_v2  ;;  %1315 = vmatprep.subr.bf16.mxu0 (!%p138_p2), %v1513_v1 }
   0x9   : > { %1355 = vmatprep.subr.bf16.mxu1 (!%p138_p2), %v1513_v1  ;;  %1317 = vmatprep.mubr.msk.bf16.mxu0 (!%p138_p2), %vm1514_vm0, %v1513_v1 }
   0xb   : > { %1316 = vmatpush3.bf16.msra.mxu0 (!%p138_p2), %v1487_v3 }
   0xc   : > { %1356 = vmatpush3.bf16.msra.mxu1 (!%p138_p2), %v1488_v4  ;;  %1393 = vmatprep.subr.bf16.mxu0 (!%p138_p2), %v1513_v1 }
   0xd   : > { %s1869_s13 = smov (!%p161_p3, %s1102_s13), 1  ;;  %1433 = vmatprep.subr.bf16.mxu1 %v1513_v1 }
   0xe   : > { %s1473_s22 = smul.u32 88, %s1869_s13 }
   0xf   : > { %s1474_s9 = smul.u32 72, %s1869_s13 }
  0x10   : > { %s1570_s25 = scalar_lea.vmem %s1864_s0, %s1473_s22 }
  0x11   : > { %v1489_v6 = vld [vmem:[%s1570_s25] sm:$0xff]   ;;  %v1578_v7 = vld [vmem:[%s1570_s25 + $0x8] sm:$0xff]   ;;  %v1585_v11 = vld [vmem:[%s1570_s25 + $0x10] sm:$0xff]   ;;  %s1819_s14 = scalar_lea.vmem %s1867_s3, %s1474_s9 }
  0x12   : > { %1358 = vmatmul.mubr.msk.bf16.vlgmr.msra.gmra.mrb[0].mxu1 %vm339_vm1, %v1489_v6  ;;  %v252_v8 = vshrl.u32 %v1489_v6, 16  ;;  %v254_v9 = vshll.u32 %v1489_v6, 16  ;;  %v259_v10 = vshll.u32 %v1578_v7, 16  ;;  %v263_v17 = vshrl.u32 %v1578_v7, 16  ;;  %v1599_v20 = vld [vmem:[%s1570_s25 + $0x18] sm:$0xff]   ;;  %v1607_v24 = vld [vmem:[%s1570_s25 + $0x40] sm:$0xff]  }
  0x13   : > { %1434 = vmatpush3.bf16.msra.mxu1 %v1492_v5  ;;  %1361 = vmatprep.mubr.msk.bf16.mxu1 %vm1514_vm0, %v1513_v1  ;;  %v267_v18 = vshll.u32 %v1585_v11, 16  ;;  %v190_v25 = vld [vmem:[%s1570_s25 + $0x48] sm:$0xf]  ;;  %v191_v26 = vld [vmem:[%s1570_s25 + $0x4c] sm:$0xf]  ;;  %v315_v27 = vshll.u32 %v1607_v24, 16 }
  0x14   : > { %v256_v13 = vrot.slane %v254_v9, 1  ;;  %1435 = vmatprep.subr.bf16.mxu1 %v1513_v1  ;;  %v261_v14 = vrot.slane %v259_v10, 1  ;;  %v1122_v28 = vcombine.low %v190_v25, %v190_v25  ;;  %v271_v29 = vshrl.u32 %v1585_v11, 16  ;;  %v1504_v32 = vld [vmem:[%s1570_s25 + $0x50] ss:$0 sps:$4 sm:$0xff]   ;;  %v1636_v44 = vld [vmem:[%s1570_s25 + $0x20] sm:$0xff]  }
  0x15   : > { %v269_v22 = vrot.slane %v267_v18, 1  ;;  %v275_v30 = vshll.u32 %v1599_v20, 16  ;;  %v319_v31 = vshrl.u32 %v1607_v24, 16  ;;  %v1624_v34 = vrot.slane %v315_v27, 1  ;;  %v1656_v56 = vld [vmem:[%s1570_s25 + $0x28] sm:$0xff]   ;;  %v1499_v62 = vld [vmem:[%s1570_s25 + $0x30] sm:$0xff]  }
  0x16   : > { %v257_v16 = vor.u32 %v256_v13, %v252_v8  ;;  %v265_v21 = vor.u32 %v263_v17, %v261_v14  ;;  %v323_v35 = vshll.u32 %v1122_v28, 16  ;;  %v1626_v36 = vcombine.low %v190_v25, %v191_v26  ;;  %v1500_v5 = vld [vmem:[%s1570_s25 + $0x38] sm:$0xff]  }
  0x17   : > { %1436 = vmatpush3.bf16.msra.mxu1 %v1498_v12  ;;  %v769_v37 = vshll.u32 %v1504_v32, 16  ;;  %v321_v38 = vor.u32 %v319_v31, %v1624_v34  ;;  %v277_v41 = vrot.slane %v275_v30, 1  ;;  %v273_v43 = vor.u32 %v271_v29, %v269_v22 }
  0x18   : > { %v262_v19 = vsel %vm250_vm2, %v257_v16, %v261_v14  ;;  %v1622_v33 = vsel %vm250_vm2, %v265_v21, %v269_v22  ;;  %v325_v39 = vrot.slane %v323_v35, 1  ;;  %v761_v40 = vshll.u32 %v1626_v36, 16 }
  0x19   : > { %1318 = vmatmul.mubr.msk.bf16.vlgmr.msra.gmra.mrb[0].mxu0 %vm339_vm1, %v262_v19  ;;  %v765_v42 = vshrl.u32 %v1626_v36, 16  ;;  %v771_v47 = vrot.slane %v769_v37, 1  ;;  %v278_v50 = vsel %vm250_vm2, %v273_v43, %v277_v41  ;;  %v279_v51 = vshrl.u32 %v1599_v20, 16 }
  0x1a   : > { %1394 = vmatpush3.bf16.msra.mxu0 %v1491_v15  ;;  %1321 = vmatprep.mubr.msk.bf16.mxu0 %vm1514_vm0, %v1513_v1  ;;  %v326_v45 = vsel %vm250_vm2, %v321_v38, %v325_v39  ;;  %v763_v46 = vrot.slane %v761_v40, 1  ;;  %v283_v52 = vshll.u32 %v1636_v44, 16  ;;  %v287_v58 = vshrl.u32 %v1636_v44, 16 }
  0x1b   : > { %1362 = vmatmul.mubr.msk.bf16.gmra.mrb[4].mxu1 %vm339_vm1, %v1578_v7  ;;  %1395 = vmatprep.subr.bf16.mxu0 %v1513_v1  ;;  %v281_v54 = vor.u32 %v279_v51, %v277_v41  ;;  %v291_v59 = vshll.u32 %v1656_v56, 16  ;;  %v295_v0 = vshrl.u32 %v1656_v56, 16  ;;  %v299_v2 = vshll.u32 %v1499_v62, 16 }
  0x1c   : > { %1365 = vmatprep.mubr.msk.bf16.mxu1 %vm1514_vm0, %v1513_v1  ;;  %v1644_v48 = vsel %vm250_vm2, %v321_v38, %v763_v46  ;;  %v767_v49 = vor.u32 %v765_v42, %v763_v46  ;;  %v285_v55 = vrot.slane %v283_v52, 1  ;;  %v303_v8 = vshrl.u32 %v1499_v62, 16 }
  0x1d   : > { %v293_v61 = vrot.slane %v291_v59, 1  ;;  %v301_v4 = vrot.slane %v299_v2, 1  ;;  %v307_v9 = vshll.u32 %v1500_v5, 16  ;;  %v311_v14 = vshrl.u32 %v1500_v5, 16 }
  0x1e   : > { %1396 = vmatpush3.bf16.msra.mxu0 %v1497_v23  ;;  %v1650_v53 = vsel %vm250_vm2, %v767_v49, %v771_v47  ;;  %v286_v57 = vsel %vm250_vm2, %v281_v54, %v285_v55  ;;  %v289_v60 = vor.u32 %v287_v58, %v285_v55 }
  0x1f   : > { %v297_v3 = vor.u32 %v295_v0, %v293_v61  ;;  %v305_v10 = vor.u32 %v303_v8, %v301_v4  ;;  %v309_v12 = vrot.slane %v307_v9, 1 }
  0x20   : > { %v294_v63 = vsel %vm250_vm2, %v289_v60, %v293_v61 }
  0x21   : > { %1322 = vmatmul.mubr.msk.bf16.gmra.mrb[4].mxu0 %vm339_vm1, %v1622_v33  ;;  %v302_v6 = vsel %vm250_vm2, %v297_v3, %v301_v4  ;;  %v310_v13 = vsel %vm250_vm2, %v305_v10, %v309_v12  ;;  %v313_v15 = vor.u32 %v311_v14, %v309_v12 }
  0x22   : > { %1325 = vmatprep.mubr.msk.bf16.mxu0 %vm1514_vm0, %v1513_v1 }
  0x23   : > { %1366 = vmatmul.mubr.msk.bf16.gmra.mrb[8].mxu1 %vm339_vm1, %v1585_v11  ;;  %v318_v16 = vsel %vm250_vm2, %v313_v15, %v1624_v34 }
  0x24   : > { %1369 = vmatprep.mubr.msk.bf16.mxu1 %vm1514_vm0, %v1513_v1 }
  0x29   : > { %1326 = vmatmul.mubr.msk.bf16.gmra.mrb[8].mxu0 %vm339_vm1, %v278_v50 }
  0x2a   : > { %1329 = vmatprep.mubr.msk.bf16.mxu0 %vm1514_vm0, %v1513_v1 }
  0x2b   : > { %1370 = vmatmul.mubr.msk.bf16.gmra.mrb[12].mxu1 %vm339_vm1, %v1599_v20 }
  0x2c   : > { %1373 = vmatprep.mubr.msk.bf16.mxu1 %vm1514_vm0, %v1513_v1 }
  0x31   : > { %1330 = vmatmul.mubr.msk.bf16.gmra.mrb[12].mxu0 %vm339_vm1, %v286_v57 }
  0x32   : > { %1333 = vmatprep.mubr.msk.bf16.mxu0 %vm1514_vm0, %v1513_v1 }
  0x33   : > { %1374 = vmatmul.mubr.msk.bf16.gmra.mrb[16].mxu1 %vm339_vm1, %v1636_v44 }
  0x34   : > { %1377 = vmatprep.mubr.msk.bf16.mxu1 %vm1514_vm0, %v1513_v1 }
  0x39   : > { %1334 = vmatmul.mubr.msk.bf16.gmra.mrb[16].mxu0 %vm339_vm1, %v294_v63 }
  0x3a   : > { %1337 = vmatprep.mubr.msk.bf16.mxu0 %vm1514_vm0, %v1513_v1 }
  0x3b   : > { %1378 = vmatmul.mubr.msk.bf16.gmra.mrb[20].mxu1 %vm339_vm1, %v1656_v56 }
  0x3c   : > { %1381 = vmatprep.mubr.msk.bf16.mxu1 %vm1514_vm0, %v1513_v1 }
  0x41   : > { %1338 = vmatmul.mubr.msk.bf16.gmra.mrb[20].mxu0 %vm339_vm1, %v302_v6 }
  0x42   : > { %1341 = vmatprep.mubr.msk.bf16.mxu0 %vm1514_vm0, %v1513_v1 }
  0x43   : > { %1382 = vmatmul.mubr.msk.bf16.gmra.mrb[24].mxu1 %vm339_vm1, %v1499_v62 }
  0x44   : > { %1385 = vmatprep.mubr.msk.bf16.mxu1 %vm1514_vm0, %v1513_v1 }
  0x49   : > { %1342 = vmatmul.mubr.msk.bf16.gmra.mrb[24].mxu0 %vm339_vm1, %v310_v13 }
  0x4a   : > { %1345 = vmatprep.mubr.msk.bf16.mxu0 %vm1514_vm0, %v1513_v1 }
  0x4b   : > { %1386 = vmatmul.mubr.msk.bf16.gmra.mrb[28].mxu1 %vm339_vm1, %v1500_v5 }
  0x4c   : > { %1389 = vmatprep.mubr.msk.bf16.mxu1 %vm1514_vm0, %v1513_v1 }
  0x51   : > { %1346 = vmatmul.mubr.msk.bf16.gmra.mrb[28].mxu0 %vm339_vm1, %v318_v16 }
  0x52   : > { %1349 = vmatprep.mubr.msk.bf16.mxu0 %vm1514_vm0, %v1513_v1 }
  0x53   : > { %1390 = vmatmul.mubr.msk.bf16.gmra.mrb[32].mxu1 %vm339_vm1, %v1607_v24 }
  0x54   : > { %1437 = vmatprep.mubr.msk.bf16.mxu1 %vm1514_vm0, %v1513_v1 }
  0x59   : > { %1350 = vmatmul.mubr.msk.bf16.gmra.mrb[32].mxu0 %vm339_vm1, %v326_v45 }
  0x5a   : > { %1397 = vmatprep.mubr.msk.bf16.mxu0 %vm1514_vm0, %v1513_v1 }
  0x5b   : > { %1438 = vmatmul.mubr.msk.bf16.vlgmr.msra.gmra.mrb[36].mxu1 %vm339_vm1, %v1622_v33 }
  0x5c   : > { %1441 = vmatprep.mubr.msk.bf16.mxu1 %vm1514_vm0, %v1513_v1 }
  0x61   : > { %1398 = vmatmul.mubr.msk.bf16.vlgmr.msra.gmra.mrb[36].mxu0 %vm339_vm1, %v1578_v7 }
  0x62   : > { %1401 = vmatprep.mubr.msk.bf16.mxu0 %vm1514_vm0, %v1513_v1 }
  0x63   : > { %1442 = vmatmul.mubr.msk.bf16.gmra.mrb[40].mxu1 %vm339_vm1, %v278_v50 }
  0x64   : > { %1445 = vmatprep.mubr.msk.bf16.mxu1 %vm1514_vm0, %v1513_v1 }
  0x69   : > { %1402 = vmatmul.mubr.msk.bf16.gmra.mrb[40].mxu0 %vm339_vm1, %v1585_v11 }
  0x6a   : > { %1405 = vmatprep.mubr.msk.bf16.mxu0 %vm1514_vm0, %v1513_v1 }
  0x6b   : > { %1446 = vmatmul.mubr.msk.bf16.gmra.mrb[44].mxu1 %vm339_vm1, %v286_v57 }
  0x6c   : > { %1449 = vmatprep.mubr.msk.bf16.mxu1 %vm1514_vm0, %v1513_v1 }
  0x71   : > { %1406 = vmatmul.mubr.msk.bf16.gmra.mrb[44].mxu0 %vm339_vm1, %v1599_v20 }
  0x72   : > { %1409 = vmatprep.mubr.msk.bf16.mxu0 %vm1514_vm0, %v1513_v1 }
  0x73   : > { %1450 = vmatmul.mubr.msk.bf16.gmra.mrb[48].mxu1 %vm339_vm1, %v294_v63 }
  0x74   : > { %1453 = vmatprep.mubr.msk.bf16.mxu1 %vm1514_vm0, %v1513_v1 }
  0x79   : > { %1410 = vmatmul.mubr.msk.bf16.gmra.mrb[48].mxu0 %vm339_vm1, %v1636_v44 }
  0x7a   : > { %1413 = vmatprep.mubr.msk.bf16.mxu0 %vm1514_vm0, %v1513_v1 }
  0x7b   : > { %1454 = vmatmul.mubr.msk.bf16.gmra.mrb[52].mxu1 %vm339_vm1, %v302_v6 }
  0x7c   : > { %1457 = vmatprep.mubr.msk.bf16.mxu1 %vm1514_vm0, %v1513_v1 }
  0x81   : > { %1414 = vmatmul.mubr.msk.bf16.gmra.mrb[52].mxu0 %vm339_vm1, %v1656_v56 }
  0x82   : > { %1417 = vmatprep.mubr.msk.bf16.mxu0 %vm1514_vm0, %v1513_v1 }
  0x83   : > { %1458 = vmatmul.mubr.msk.bf16.gmra.mrb[56].mxu1 %vm339_vm1, %v310_v13 }
  0x84   : > { %1461 = vmatprep.mubr.msk.bf16.mxu1 %vm1514_vm0, %v1513_v1 }
  0x89   : > { %1418 = vmatmul.mubr.msk.bf16.gmra.mrb[56].mxu0 %vm339_vm1, %v1499_v62 }
  0x8a   : > { %1421 = vmatprep.mubr.msk.bf16.mxu0 %vm1514_vm0, %v1513_v1 }
  0x8b   : > { %1462 = vmatmul.mubr.msk.bf16.gmra.mrb[60].mxu1 %vm339_vm1, %v318_v16 }
  0x8c   : > { %1465 = vmatprep.mubr.msk.bf16.mxu1 %vm1514_vm0, %v1513_v1 }
  0x91   : > { %1422 = vmatmul.mubr.msk.bf16.gmra.mrb[60].mxu0 %vm339_vm1, %v1500_v5 }
  0x92   : > { %1425 = vmatprep.mubr.msk.bf16.mxu0 %vm1514_vm0, %v1513_v1 }
  0x93   : > { %1466 = vmatmul.mubr.msk.bf16.gmra.mrb[64].mxu1 %vm339_vm1, %v1644_v48 }
  0x94   : > { %1469 = vmatprep.mubr.msk.bf16.mxu1 %vm1514_vm0, %v1513_v1 }
  0x99   : > { %1426 = vmatmul.mubr.msk.bf16.gmra.mrb[64].mxu0 %vm339_vm1, %v1607_v24 }
  0x9a   : > { %1429 = vmatprep.mubr.msk.bf16.mxu0 %vm1514_vm0, %v1513_v1 }
  0x9b   : > { %1470 = vmatmul.mubr.msk.bf16.gmra.mrb[68].mxu1 %vm339_vm1, %v1650_v53 }
  0xa1   : > { %1430 = vmatmul.mubr.msk.bf16.gmra.mrb[68].mxu0 %vm339_vm1, %v1626_v36 }
  0xe5   : > { %v536_v7 = vpop.f32.mrb[0].mxu1 }
  0xe6   : > { %v1359_v11 = vpop.f32.mrb[1].mxu1 }
  0xe7   : > { %v539_v17 = vpop.f32.mrb[2].mxu1 }
  0xe8   : > { %v1360_v18 = vpop.f32.mrb[3].mxu1 }
  0xec   : > { %v401_v19 = vpop.f32.mrb[0].mxu0 }
  0xed   : > { %v1769_v20 = vadd.f32 %v536_v7, %v401_v19  ;;  %v1319_v21 = vpop.f32.mrb[1].mxu0 }
  0xee   : > { %v404_v22 = vpop.f32.mrb[2].mxu0  ;;  %v544_v23 = vpop.f32.mrb[4].mxu1 }
  0xef   : > { %v1771_v24 = vadd.f32 %v539_v17, %v404_v22  ;;  %v1320_v25 = vpop.f32.mrb[3].mxu0  ;;  %v1363_v1 = vpop.f32.mrb[5].mxu1 }
  0xf0   : > { %v547_v26 = vpop.f32.mrb[6].mxu1 }
  0xf1   : > { %v1364_v27 = vpop.f32.mrb[7].mxu1 }
  0xf4   : > { %v409_v28 = vpop.f32.mrb[4].mxu0 }
  0xf5   : > { %v1773_v29 = vadd.f32 %v544_v23, %v409_v28  ;;  %v1323_v30 = vpop.f32.mrb[5].mxu0 }
  0xf6   : > { %v412_v31 = vpop.f32.mrb[6].mxu0  ;;  %v552_v32 = vpop.f32.mrb[8].mxu1 }
  0xf7   : > { %v1775_v33 = vadd.f32 %v547_v26, %v412_v31  ;;  %v1324_v34 = vpop.f32.mrb[7].mxu0  ;;  %v1367_v35 = vpop.f32.mrb[9].mxu1 }
  0xf8   : > { %v555_v36 = vpop.f32.mrb[10].mxu1 }
  0xf9   : > { %v1368_v37 = vpop.f32.mrb[11].mxu1 }
  0xfc   : > { %v417_v38 = vpop.f32.mrb[8].mxu0 }
  0xfd   : > { %v1777_v39 = vadd.f32 %v552_v32, %v417_v38  ;;  %v1327_v40 = vpop.f32.mrb[9].mxu0 }
  0xfe   : > { %v420_v41 = vpop.f32.mrb[10].mxu0  ;;  %v560_v42 = vpop.f32.mrb[12].mxu1 }
  0xff   : > { %v1779_v43 = vadd.f32 %v555_v36, %v420_v41  ;;  %v1328_v44 = vpop.f32.mrb[11].mxu0  ;;  %v1371_v45 = vpop.f32.mrb[13].mxu1 }
 0x100   : > { %v563_v46 = vpop.f32.mrb[14].mxu1 }
 0x101   : > { %v1372_v47 = vpop.f32.mrb[15].mxu1 }
 0x104   : > { %v425_v48 = vpop.f32.mrb[12].mxu0 }
 0x105   : > { %v1781_v49 = vadd.f32 %v560_v42, %v425_v48  ;;  %v1331_v50 = vpop.f32.mrb[13].mxu0 }
 0x106   : > { %v428_v51 = vpop.f32.mrb[14].mxu0  ;;  %v568_v52 = vpop.f32.mrb[16].mxu1 }
 0x107   : > { %v1783_v53 = vadd.f32 %v563_v46, %v428_v51  ;;  %v1332_v54 = vpop.f32.mrb[15].mxu0  ;;  %v1375_v55 = vpop.f32.mrb[17].mxu1 }
 0x108   : > { %v571_v56 = vpop.f32.mrb[18].mxu1  ;;  %v1809_v55 = vld [vmem:[%s1866_s2] ss:$0 sm:$0xff] }
 0x109   : > { %v1376_v57 = vpop.f32.mrb[19].mxu1 }
 0x10c   : > { %v433_v58 = vpop.f32.mrb[16].mxu0 }
 0x10d   : > { %v1785_v59 = vadd.f32 %v568_v52, %v433_v58  ;;  %v1335_v60 = vpop.f32.mrb[17].mxu0 }
 0x10e   : > { %v436_v61 = vpop.f32.mrb[18].mxu0  ;;  %v576_v62 = vpop.f32.mrb[20].mxu1 }
 0x10f   : > { %v1787_v63 = vadd.f32 %v571_v56, %v436_v61  ;;  %v1336_v0 = vpop.f32.mrb[19].mxu0  ;;  %v1379_v2 = vpop.f32.mrb[21].mxu1 }
 0x110   : > { %v579_v3 = vpop.f32.mrb[22].mxu1 }
 0x111   : > { %v1380_v4 = vpop.f32.mrb[23].mxu1 }
 0x114   : > { %v441_v5 = vpop.f32.mrb[20].mxu0 }
 0x115   : > { %v1789_v6 = vadd.f32 %v576_v62, %v441_v5  ;;  %v1339_v8 = vpop.f32.mrb[21].mxu0 }
 0x116   : > { %v444_v9 = vpop.f32.mrb[22].mxu0  ;;  %v584_v10 = vpop.f32.mrb[24].mxu1 }
 0x117   : > { %v1791_v12 = vadd.f32 %v579_v3, %v444_v9  ;;  %v1340_v13 = vpop.f32.mrb[23].mxu0  ;;  %v1383_v14 = vpop.f32.mrb[25].mxu1 }
 0x118   : > { %v587_v15 = vpop.f32.mrb[26].mxu1 }
 0x119   : > { %v1384_v16 = vpop.f32.mrb[27].mxu1 }
 0x11c   : > { %v449_v7 = vpop.f32.mrb[24].mxu0 }
 0x11d   : > { %v1793_v11 = vadd.f32 %v584_v10, %v449_v7  ;;  %v1343_v17 = vpop.f32.mrb[25].mxu0 }
 0x11e   : > { %v452_v18 = vpop.f32.mrb[26].mxu0  ;;  %v592_v19 = vpop.f32.mrb[28].mxu1 }
 0x11f   : > { %v1795_v21 = vadd.f32 %v587_v15, %v452_v18  ;;  %v1344_v22 = vpop.f32.mrb[27].mxu0  ;;  %v1387_v23 = vpop.f32.mrb[29].mxu1 }
 0x120   : > { %v595_v25 = vpop.f32.mrb[30].mxu1 }
 0x121   : > { %v1388_v1 = vpop.f32.mrb[31].mxu1 }
 0x124   : > { %v457_v26 = vpop.f32.mrb[28].mxu0 }
 0x125   : > { %v1797_v27 = vadd.f32 %v592_v19, %v457_v26  ;;  %v1347_v28 = vpop.f32.mrb[29].mxu0 }
 0x126   : > { %v460_v30 = vpop.f32.mrb[30].mxu0  ;;  %v600_v31 = vpop.f32.mrb[32].mxu1 }
 0x127   : > { %v1799_v32 = vadd.f32 %v595_v25, %v460_v30  ;;  %v1348_v34 = vpop.f32.mrb[31].mxu0  ;;  %v1391_v35 = vpop.f32.mrb[33].mxu1 }
 0x128   : > { %v603_v36 = vpop.f32.mrb[34].mxu1 }
 0x129   : > { %v1392_v37 = vpop.f32.mrb[35].mxu1 }
 0x12c   : > { %v465_v38 = vpop.f32.mrb[32].mxu0 }
 0x12d   : > { %v1801_v40 = vadd.f32 %v600_v31, %v465_v38  ;;  %v1351_v41 = vpop.f32.mrb[33].mxu0 }
 0x12e   : > { %v468_v42 = vpop.f32.mrb[34].mxu0  ;;  %v825_v44 = vpop.f32.mrb[36].mxu1 }
 0x12f   : > { %v1803_v45 = vadd.f32 %v603_v36, %v468_v42  ;;  %v1352_v46 = vpop.f32.mrb[35].mxu0  ;;  %v1439_v47 = vpop.f32.mrb[37].mxu1 }
 0x130   : > { %v828_v48 = vpop.f32.mrb[38].mxu1 }
 0x131   : > { %v1440_v50 = vpop.f32.mrb[39].mxu1 }
 0x134   : > { %v664_v51 = vpop.f32.mrb[36].mxu0 }
 0x135   : > { %v735_v52 = vadd.f32 %v664_v51, %v1769_v20  ;;  %v1399_v54 = vpop.f32.mrb[37].mxu0 }
 0x136   : > { %v667_v56 = vpop.f32.mrb[38].mxu0  ;;  %v833_v57 = vpop.f32.mrb[40].mxu1 }
 0x137   : > { %v896_v58 = vadd.f32 %v825_v44, %v735_v52  ;;  %v736_v60 = vadd.f32 %v667_v56, %v1771_v24  ;;  %v1400_v61 = vpop.f32.mrb[39].mxu0  ;;  %v1443_v62 = vpop.f32.mrb[41].mxu1 }
 0x138   : > { %v836_v0 = vpop.f32.mrb[42].mxu1 }
 0x139   : > { %v921_v2 = vadd.f32 %v1809_v55, %v896_v58  ;;  %v897_v3 = vadd.f32 %v828_v48, %v736_v60  ;;  %v1444_v4 = vpop.f32.mrb[43].mxu1 }
 0x13b   : > { %v922_v20 = vadd.f32 %v1809_v55, %v897_v3  ;;  %v939_v8 = vmax.f32 %v921_v2, 0.0 }
 0x13c   : > { %v672_v5 = vpop.f32.mrb[40].mxu0 }
 0x13d   : > { %v940_v9 = vmax.f32 %v922_v20, 0.0  ;;  %v737_v10 = vadd.f32 %v672_v5, %v1773_v29  ;;  %v1403_v13 = vpop.f32.mrb[41].mxu0 }
 0x13e   : > { %v675_v24 = vpop.f32.mrb[42].mxu0  ;;  %v841_v14 = vpop.f32.mrb[44].mxu1 }
 0x13f   : > { %v1219_v15 = vpack.c.bf16 %v940_v9, %v939_v8  ;;  %v898_v16 = vadd.f32 %v833_v57, %v737_v10  ;;  %v738_v7 = vadd.f32 %v675_v24, %v1775_v33  ;;  %v1404_v17 = vpop.f32.mrb[43].mxu0  ;;  %v1447_v18 = vpop.f32.mrb[45].mxu1 }
 0x140   : > { %v844_v19 = vpop.f32.mrb[46].mxu1 }
 0x141   : > { %1220 = vst [vmem:[%s1819_s14] sm:$0xff] %v1219_v15   ;;  %v923_v22 = vadd.f32 %v1809_v55, %v898_v16  ;;  %v899_v29 = vadd.f32 %v836_v0, %v738_v7  ;;  %v1448_v23 = vpop.f32.mrb[47].mxu1 }
 0x143   : > { %v924_v25 = vadd.f32 %v1809_v55, %v899_v29  ;;  %v941_v26 = vmax.f32 %v923_v22, 0.0 }
 0x144   : > { %v680_v1 = vpop.f32.mrb[44].mxu0 }
 0x145   : > { %v942_v28 = vmax.f32 %v924_v25, 0.0  ;;  %v739_v30 = vadd.f32 %v680_v1, %v1777_v39  ;;  %v1407_v31 = vpop.f32.mrb[45].mxu0 }
 0x146   : > { %v683_v34 = vpop.f32.mrb[46].mxu0  ;;  %v849_v35 = vpop.f32.mrb[48].mxu1 }
 0x147   : > { %v1224_v33 = vpack.c.bf16 %v942_v28, %v941_v26  ;;  %v900_v36 = vadd.f32 %v841_v14, %v739_v30  ;;  %v740_v37 = vadd.f32 %v683_v34, %v1779_v43  ;;  %v1408_v38 = vpop.f32.mrb[47].mxu0  ;;  %v1451_v41 = vpop.f32.mrb[49].mxu1 }
 0x148   : > { %v852_v42 = vpop.f32.mrb[50].mxu1 }
 0x149   : > { %1261 = vst [vmem:[%s1819_s14 + $0x8] sm:$0xff] %v1224_v33   ;;  %v925_v44 = vadd.f32 %v1809_v55, %v900_v36  ;;  %v901_v46 = vadd.f32 %v844_v19, %v740_v37  ;;  %v1452_v47 = vpop.f32.mrb[51].mxu1 }
 0x14b   : > { %v926_v48 = vadd.f32 %v1809_v55, %v901_v46  ;;  %v943_v39 = vmax.f32 %v925_v44, 0.0 }
 0x14c   : > { %v688_v50 = vpop.f32.mrb[48].mxu0 }
 0x14d   : > { %v944_v51 = vmax.f32 %v926_v48, 0.0  ;;  %v741_v52 = vadd.f32 %v688_v50, %v1781_v49  ;;  %v1411_v54 = vpop.f32.mrb[49].mxu0 }
 0x14e   : > { %v691_v56 = vpop.f32.mrb[50].mxu0  ;;  %v857_v57 = vpop.f32.mrb[52].mxu1 }
 0x14f   : > { %v1229_v43 = vpack.c.bf16 %v944_v51, %v943_v39  ;;  %v902_v58 = vadd.f32 %v849_v35, %v741_v52  ;;  %v742_v60 = vadd.f32 %v691_v56, %v1783_v53  ;;  %v1412_v61 = vpop.f32.mrb[51].mxu0  ;;  %v1455_v62 = vpop.f32.mrb[53].mxu1 }
 0x150   : > { %v860_v0 = vpop.f32.mrb[54].mxu1 }
 0x151   : > { %1262 = vst [vmem:[%s1819_s14 + $0x10] sm:$0xff] %v1229_v43   ;;  %v927_v2 = vadd.f32 %v1809_v55, %v902_v58  ;;  %v903_v3 = vadd.f32 %v852_v42, %v742_v60  ;;  %v1456_v4 = vpop.f32.mrb[55].mxu1 }
 0x153   : > { %v928_v20 = vadd.f32 %v1809_v55, %v903_v3  ;;  %v945_v49 = vmax.f32 %v927_v2, 0.0 }
 0x154   : > { %v696_v5 = vpop.f32.mrb[52].mxu0 }
 0x155   : > { %v946_v8 = vmax.f32 %v928_v20, 0.0  ;;  %v743_v9 = vadd.f32 %v696_v5, %v1785_v59  ;;  %v1415_v10 = vpop.f32.mrb[53].mxu0 }
 0x156   : > { %v699_v13 = vpop.f32.mrb[54].mxu0  ;;  %v865_v24 = vpop.f32.mrb[56].mxu1 }
 0x157   : > { %v1234_v53 = vpack.c.bf16 %v946_v8, %v945_v49  ;;  %v904_v14 = vadd.f32 %v857_v57, %v743_v9  ;;  %v744_v15 = vadd.f32 %v699_v13, %v1787_v63  ;;  %v1416_v16 = vpop.f32.mrb[55].mxu0  ;;  %v1459_v7 = vpop.f32.mrb[57].mxu1 }
 0x158   : > { %v868_v17 = vpop.f32.mrb[58].mxu1 }
 0x159   : > { %1263 = vst [vmem:[%s1819_s14 + $0x18] sm:$0xff] %v1234_v53   ;;  %v929_v18 = vadd.f32 %v1809_v55, %v904_v14  ;;  %v905_v19 = vadd.f32 %v860_v0, %v744_v15  ;;  %v1460_v22 = vpop.f32.mrb[59].mxu1 }
 0x15b   : > { %v930_v29 = vadd.f32 %v1809_v55, %v905_v19  ;;  %v947_v59 = vmax.f32 %v929_v18, 0.0 }
 0x15c   : > { %v704_v23 = vpop.f32.mrb[56].mxu0 }
 0x15d   : > { %v948_v25 = vmax.f32 %v930_v29, 0.0  ;;  %v745_v1 = vadd.f32 %v704_v23, %v1789_v6  ;;  %v1419_v26 = vpop.f32.mrb[57].mxu0 }
 0x15e   : > { %v707_v28 = vpop.f32.mrb[58].mxu0  ;;  %v873_v30 = vpop.f32.mrb[60].mxu1 }
 0x15f   : > { %v1239_v63 = vpack.c.bf16 %v948_v25, %v947_v59  ;;  %v906_v31 = vadd.f32 %v865_v24, %v745_v1  ;;  %v746_v34 = vadd.f32 %v707_v28, %v1791_v12  ;;  %v1420_v35 = vpop.f32.mrb[59].mxu0  ;;  %v1463_v33 = vpop.f32.mrb[61].mxu1 }
 0x160   : > { %v876_v36 = vpop.f32.mrb[62].mxu1 }
 0x161   : > { %1264 = vst [vmem:[%s1819_s14 + $0x20] sm:$0xff] %v1239_v63   ;;  %v931_v37 = vadd.f32 %v1809_v55, %v906_v31  ;;  %v907_v38 = vadd.f32 %v868_v17, %v746_v34  ;;  %v1464_v41 = vpop.f32.mrb[63].mxu1 }
 0x163   : > { %v932_v42 = vadd.f32 %v1809_v55, %v907_v38  ;;  %v949_v6 = vmax.f32 %v931_v37, 0.0 }
 0x164   : > { %v712_v44 = vpop.f32.mrb[60].mxu0 }
 0x165   : > { %v950_v46 = vmax.f32 %v932_v42, 0.0  ;;  %v747_v47 = vadd.f32 %v712_v44, %v1793_v11  ;;  %v1423_v48 = vpop.f32.mrb[61].mxu0 }
 0x166   : > { %v715_v50 = vpop.f32.mrb[62].mxu0  ;;  %v881_v39 = vpop.f32.mrb[64].mxu1 }
 0x167   : > { %v1244_v12 = vpack.c.bf16 %v950_v46, %v949_v6  ;;  %v908_v51 = vadd.f32 %v873_v30, %v747_v47  ;;  %v748_v52 = vadd.f32 %v715_v50, %v1795_v21  ;;  %v1424_v54 = vpop.f32.mrb[63].mxu0  ;;  %v1467_v56 = vpop.f32.mrb[65].mxu1 }
 0x168   : > { %v884_v57 = vpop.f32.mrb[66].mxu1 }
 0x169   : > { %1265 = vst [vmem:[%s1819_s14 + $0x28] sm:$0xff] %v1244_v12   ;;  %v933_v43 = vadd.f32 %v1809_v55, %v908_v51  ;;  %v909_v58 = vadd.f32 %v876_v36, %v748_v52  ;;  %v1468_v60 = vpop.f32.mrb[67].mxu1 }
 0x16b   : > { %v934_v61 = vadd.f32 %v1809_v55, %v909_v58  ;;  %v951_v11 = vmax.f32 %v933_v43, 0.0 }
 0x16c   : > { %v720_v62 = vpop.f32.mrb[64].mxu0 }
 0x16d   : > { %v952_v0 = vmax.f32 %v934_v61, 0.0  ;;  %v749_v2 = vadd.f32 %v720_v62, %v1797_v27  ;;  %v1427_v3 = vpop.f32.mrb[65].mxu0 }
 0x16e   : > { %v723_v4 = vpop.f32.mrb[66].mxu0  ;;  %v889_v20 = vpop.f32.mrb[68].mxu1 }
 0x16f   : > { %v1249_v21 = vpack.c.bf16 %v952_v0, %v951_v11  ;;  %v910_v5 = vadd.f32 %v881_v39, %v749_v2  ;;  %v750_v49 = vadd.f32 %v723_v4, %v1799_v32  ;;  %v1428_v8 = vpop.f32.mrb[67].mxu0  ;;  %v1471_v9 = vpop.f32.mrb[69].mxu1 }
 0x170   : > { %v892_v10 = vpop.f32.mrb[70].mxu1 }
 0x171   : > { %1266 = vst [vmem:[%s1819_s14 + $0x30] sm:$0xff] %v1249_v21   ;;  %v935_v13 = vadd.f32 %v1809_v55, %v910_v5  ;;  %v911_v24 = vadd.f32 %v884_v57, %v750_v49  ;;  %v1472_v53 = vpop.f32.mrb[71].mxu1 }
 0x173   : > { %v936_v14 = vadd.f32 %v1809_v55, %v911_v24  ;;  %v953_v27 = vmax.f32 %v935_v13, 0.0 }
 0x174   : > { %v728_v15 = vpop.f32.mrb[68].mxu0 }
 0x175   : > { %v954_v16 = vmax.f32 %v936_v14, 0.0  ;;  %v751_v7 = vadd.f32 %v728_v15, %v1801_v40  ;;  %v1431_v17 = vpop.f32.mrb[69].mxu0 }
 0x176   : > { %v731_v18 = vpop.f32.mrb[70].mxu0 }
 0x177   : > { %v1254_v32 = vpack.c.bf16 %v954_v16, %v953_v27  ;;  %v912_v19 = vadd.f32 %v889_v20, %v751_v7  ;;  %v752_v22 = vadd.f32 %v731_v18, %v1803_v45  ;;  %v1432_v29 = vpop.f32.mrb[71].mxu0 }
 0x179   : > { %1267 = vst [vmem:[%s1819_s14 + $0x38] sm:$0xff] %v1254_v32   ;;  %v937_v23 = vadd.f32 %v1809_v55, %v912_v19  ;;  %v913_v59 = vadd.f32 %v892_v10, %v752_v22 }
 0x17b   : > { %v938_v25 = vadd.f32 %v1809_v55, %v913_v59  ;;  %v955_v1 = vmax.f32 %v937_v23, 0.0 }
 0x17d   : > { %v956_v26 = vmax.f32 %v938_v25, 0.0 }
 0x17f   : > { %v1259_v28 = vpack.c.bf16 %v956_v26, %v955_v1 }
 0x181   : > { %1268 = vst [vmem:[%s1819_s14 + $0x40] sm:$0xff] %v1259_v28  }
 0x182 PF: > { %s13_s12 = sadd.s32 1, %s1511_s12  }
 0x183   : > { %p10_p4 = scmp.ge.s32.totalorder %s13_s12, 4  }
 0x185   :  { %12 = sbr.rel (!%p10_p4) target bundleno = 1 (0x1), region = 65 }

// kernel: _lambda_.7
= control target key start
LH: loop header
LB: loop body
LE: loop exit
PB: predicated region body
PF: predicated region fallthrough
CT: control target
= control target key end

     0   :  { %s3225_s12 = smov 0   ;;  %s4034_s0 = inlined_call_operand.vmem [shape: bf16[2,456,16], index: 0, kind: input, shape index: {}]   ;;  %s4035_s1 = inlined_call_operand.vmem [shape: bf16[4,16,128], index: 1, kind: input, shape index: {}]   ;;  %s4036_s2 = inlined_call_operand.vmem [shape: f32[1,128], index: 2, kind: input, shape index: {}]   ;;  %s4037_s3 = inlined_call_operand.vmem [shape: f32[2,408,128], index: 3, kind: output, shape index: {}]  }
   0x1 LB: > { %s2381_s13 = sadd.s32 4294967295, %s3203_s12   ;;  %p2385_p0 = scmp.ge.s32.totalorder %s3203_s12, 1  ;;  %s3203_s12 = sphi %s3225_s12, %s13_s12  }
   0x2   : > { %p137_p1 = scmp.lt.s32.totalorder %s3203_s12, 3 }
   0x4   : > { %p138_p2 = pnand %p2385_p0, %p137_p1 }
   0x6   : > { %141 = sbr.rel (%p138_p2) target bundleno = 464 (0x1d0), region = 32 }
   0xd   : > { %v3037_v0 = vld [vmem:[%s4035_s1 + $0x10] sm:$0xff]   ;;  %p161_p3 = scmp.lt.s32.totalorder %s2381_s13, 1  ;;  %v3042_v1 = vld [vmem:[%s4035_s1 + $0x8] sm:$0xff]   ;;  %v3244_v2 = vld [vmem:[%s4035_s1] sm:$0xff]   ;;  %vm576_vm0 = vcmask 130048  }
   0xe   : > { %2775 = vmatprep.subr.bf16.mxu0 %v3037_v0  ;;  %2667 = vmatprep.subr.bf16.mxu1 %v3042_v1  ;;  %v3049_v3 = vld [vmem:[%s4035_s1 + $0x18] sm:$0xff]   ;;  %vm362_vm1 = vsmask.f32 7424 }
   0xf   : > { %s4093_s13 = smov (!%p161_p3, %s2381_s13), 1  ;;  %2776 = vmatpush3.bf16.msra.mxu0 %v3037_v0  ;;  %2668 = vmatpush3.bf16.msra.mxu1 %v3042_v1 }
  0x10   : > { %s3027_s20 = smul.u32 228, %s4093_s13  ;;  %2721 = vmatprep.subr.bf16.mxu1 %v3244_v2  ;;  %2829 = vmatprep.subr.bf16.mxu0 %v3049_v3 }
  0x11   : > { %s3028_s28 = smul.u32 408, %s4093_s13 }
  0x12   : > { %s3254_s25 = scalar_lea.vmem %s4034_s0, %s3027_s20 }
  0x13   : > { %v174_v4 = vld [vmem:[%s3254_s25 + $0x8] sm:$0xf]  ;;  %v175_v5 = vld [vmem:[%s3254_s25 + $0xc] sm:$0xf]  ;;  %v176_v6 = vld [vmem:[%s3254_s25 + $0x10] sm:$0xf]  ;;  %s3927_s4 = scalar_lea.vmem %s4037_s3, %s3028_s28 }
  0x14   : > { %v177_v7 = vld [vmem:[%s3254_s25 + $0x14] sm:$0xf]  ;;  %v3260_v8 = vcombine.low %v174_v4, %v175_v5  ;;  %v3262_v9 = vcombine.low %v175_v5, %v176_v6  ;;  %v178_v10 = vld [vmem:[%s3254_s25 + $0x18] sm:$0xf]  ;;  %v3270_v13 = vld [vmem:[%s3254_s25] sm:$0xff]  }
  0x15   : > { %v3265_v11 = vcombine.low %v176_v6, %v177_v7  ;;  %v3267_v12 = vcombine.low %v177_v7, %v178_v10  ;;  %v179_v14 = vld [vmem:[%s3254_s25 + $0x1c] sm:$0xf]  ;;  %v180_v17 = vld [vmem:[%s3254_s25 + $0x20] sm:$0xf]  ;;  %v364_v18 = vshrl.u32 %v3270_v13, 16  ;;  %v366_v19 = vshll.u32 %v3270_v13, 16 }
  0x16   : > { %2777 = vmatprep.mubr.msk.bf16.mxu0 %vm576_vm0, %v3262_v9  ;;  %v371_v15 = vshll.u32 %v3260_v8, 16  ;;  %v375_v16 = vshrl.u32 %v3260_v8, 16  ;;  %v3283_v21 = vcombine.low %v178_v10, %v179_v14  ;;  %v181_v22 = vld [vmem:[%s3254_s25 + $0x24] sm:$0xf]  ;;  %v3286_v24 = vcombine.low %v179_v14, %v180_v17  ;;  %v182_v25 = vld [vmem:[%s3254_s25 + $0x28] sm:$0xf] }
  0x17   : > { %2778 = vmatmul.mubr.msk.bf16.vlgmr.msra.gmra.mrb[0].mxu0 %vm576_vm0, %v3267_v12  ;;  %v379_v20 = vshll.u32 %v3265_v11, 16  ;;  %v3289_v26 = vcombine.low %v180_v17, %v181_v22  ;;  %v183_v27 = vld [vmem:[%s3254_s25 + $0x2c] sm:$0xf]  ;;  %v368_v28 = vrot.slane %v366_v19, 1  ;;  %v383_v30 = vshrl.u32 %v3265_v11, 16 }
  0x18   : > { %4054 = vst [vmem:[#allocation2_spill] sm:$0xff] %v3283_v21  ;;  %v373_v23 = vrot.slane %v371_v15, 1  ;;  %2830 = vmatpush3.bf16.msra.mxu0 %v3049_v3  ;;  %2781 = vmatprep.mubr.msk.bf16.mxu0 %vm576_vm0, %v3286_v24  ;;  %v3295_v32 = vcombine.low %v181_v22, %v182_v25  ;;  %v387_v33 = vshll.u32 %v3283_v21, 16  ;;  %v184_v34 = vld [vmem:[%s3254_s25 + $0x30] sm:$0xf]  ;;  %v3300_v38 = vcombine.low %v182_v25, %v183_v27 }
  0x19   : > { %4055 = vst [vmem:[#allocation3_spill] sm:$0xff] %v3289_v26  ;;  %v381_v29 = vrot.slane %v379_v20, 1  ;;  %v369_v35 = vor.u32 %v368_v28, %v364_v18  ;;  %v395_v37 = vshll.u32 %v3289_v26, 16  ;;  %v391_v41 = vshrl.u32 %v3283_v21, 16  ;;  %v185_v42 = vld [vmem:[%s3254_s25 + $0x34] sm:$0xf] }
  0x1a   : > { %v377_v31 = vor.u32 %v375_v16, %v373_v23  ;;  %4056 = vst [vmem:[#allocation4_spill] sm:$0xff] %v3300_v38  ;;  %v389_v40 = vrot.slane %v387_v33, 1  ;;  %v3306_v44 = vcombine.low %v183_v27, %v184_v34  ;;  %v399_v46 = vshrl.u32 %v3289_v26, 16  ;;  %v187_v48 = vld [vmem:[%s3254_s25 + $0x3c] sm:$0xf] }
  0x1b   : > { %v385_v36 = vor.u32 %v383_v30, %v381_v29  ;;  %v374_v43 = vsel %vm362_vm1, %v369_v35, %v373_v23  ;;  %v403_v47 = vshll.u32 %v3300_v38, 16  ;;  %v397_v49 = vrot.slane %v395_v37, 1  ;;  %v186_v52 = vld [vmem:[%s3254_s25 + $0x38] sm:$0xf]  ;;  %v188_v55 = vld [vmem:[%s3254_s25 + $0x40] sm:$0xf] }
  0x1c   : > { %v382_v39 = vsel %vm362_vm1, %v377_v31, %v381_v29  ;;  %2669 = vmatprep.mubr.msk.bf16.mxu1 %vm576_vm0, %v374_v43  ;;  %v3316_v50 = vcombine.low %v184_v34, %v185_v42  ;;  %v393_v51 = vor.u32 %v391_v41, %v389_v40  ;;  %v3324_v56 = vcombine.low %v186_v52, %v187_v48  ;;  %v189_v57 = vld [vmem:[%s3254_s25 + $0x44] sm:$0xf]  ;;  %v191_v60 = vld [vmem:[%s3254_s25 + $0x4c] sm:$0xf]  ;;  %v193_v6 = vld [vmem:[%s3254_s25 + $0x54] sm:$0xf] }
  0x1d   : > { %v390_v45 = vsel %vm362_vm1, %v385_v36, %v389_v40  ;;  %2670 = vmatmul.mubr.msk.bf16.vlgmr.msra.gmra.mrb[0].mxu1 %vm576_vm0, %v382_v39  ;;  %v401_v53 = vor.u32 %v399_v46, %v397_v49  ;;  %v405_v54 = vrot.slane %v403_v47, 1  ;;  %v3327_v58 = vcombine.low %v185_v42, %v186_v52  ;;  %v192_v16 = vld [vmem:[%s3254_s25 + $0x50] sm:$0xf]  ;;  %v195_v17 = vld [vmem:[%s3254_s25 + $0x5c] sm:$0xf] }
  0x1e   : > { %4057 = vst [vmem:[#allocation5_spill] sm:$0xff] %v3316_v50  ;;  %2722 = vmatpush3.bf16.msra.mxu1 %v3244_v2  ;;  %2673 = vmatprep.mubr.msk.bf16.mxu1 %vm576_vm0, %v390_v45  ;;  %4058 = vst [vmem:[#allocation6_spill] sm:$0xff] %v3324_v56  ;;  %v411_v59 = vshll.u32 %v3316_v50, 16  ;;  %v398_v61 = vsel %vm362_vm1, %v393_v51, %v397_v49  ;;  %v407_v62 = vshrl.u32 %v3300_v38, 16  ;;  %v190_v2 = vld [vmem:[%s3254_s25 + $0x48] sm:$0xf] }
  0x1f   : > { %2782 = vmatmul.mubr.msk.bf16.gmra.mrb[4].mxu0 %vm576_vm0, %v3295_v32  ;;  %v3333_v63 = vcombine.low %v187_v48, %v188_v55  ;;  %v3335_v0 = vcombine.low %v188_v55, %v189_v57  ;;  %v406_v1 = vsel %vm362_vm1, %v401_v53, %v405_v54  ;;  %v415_v3 = vshrl.u32 %v3316_v50, 16  ;;  %v194_v23 = vld [vmem:[%s3254_s25 + $0x58] sm:$0xf]  ;;  %v199_v28 = vld [vmem:[%s3254_s25 + $0x6c] sm:$0xf] }
  0x20   : > { %2785 = vmatprep.mubr.msk.bf16.mxu0 %vm576_vm0, %v3306_v44  ;;  %v419_v4 = vshll.u32 %v3324_v56, 16  ;;  %v3341_v5 = vcombine.low %v190_v2, %v191_v60  ;;  %v413_v7 = vrot.slane %v411_v59, 1  ;;  %v1611_v10 = vshll.u32 %v3262_v9, 16  ;;  %v197_v33 = vld [vmem:[%s3254_s25 + $0x64] sm:$0xf] }
  0x21   : > { %4059 = vst [vmem:[#allocation7_spill] sm:$0xff] %v3335_v0  ;;  %v409_v14 = vor.u32 %v407_v62, %v405_v54  ;;  %v427_v15 = vshll.u32 %v3335_v0, 16  ;;  %v423_v20 = vshrl.u32 %v3324_v56, 16  ;;  %v3355_v22 = vcombine.low %v192_v16, %v193_v6  ;;  %v198_v39 = vld [vmem:[%s3254_s25 + $0x68] sm:$0xf] }
  0x22   : > { %4060 = vst [vmem:[#allocation8_spill] sm:$0xff] %v3341_v5  ;;  %v417_v18 = vor.u32 %v415_v3, %v413_v7  ;;  %v421_v19 = vrot.slane %v419_v4, 1  ;;  %v431_v25 = vshrl.u32 %v3335_v0, 16  ;;  %v435_v27 = vshll.u32 %v3341_v5, 16  ;;  %v3374_v40 = vld [vmem:[%s3254_s25 + $0x7c] sm:$0xf] }
  0x23   : > { %4061 = vst [vmem:[#allocation9_spill] sm:$0xff] %v3355_v22  ;;  %v3362_v30 = vcombine.low %v189_v57, %v190_v2  ;;  %v3364_v31 = vcombine.low %v194_v23, %v195_v17  ;;  %v3367_v34 = vrot.slane %v1611_v10, 1  ;;  %v414_v35 = vsel %vm362_vm1, %v409_v14, %v413_v7  ;;  %v196_v45 = vld [vmem:[%s3254_s25 + $0x60] sm:$0xf]  ;;  %v201_v47 = vld [vmem:[%s3254_s25 + $0x74] sm:$0xf] }
  0x24   : > { %v429_v36 = vrot.slane %v427_v15, 1  ;;  %v3370_v37 = vcombine.low %v191_v60, %v192_v16  ;;  %v422_v41 = vsel %vm362_vm1, %v417_v18, %v421_v19  ;;  %v425_v42 = vor.u32 %v423_v20, %v421_v19  ;;  %v202_v53 = vld [vmem:[%s3254_s25 + $0x78] sm:$0xf]  ;;  %v3387_v54 = vld [vmem:[%s3254_s25 + $0x8c] sm:$0xf] }
  0x25   : > { %2674 = vmatmul.mubr.msk.bf16.gmra.mrb[4].mxu1 %vm576_vm0, %v398_v61  ;;  %4062 = vst [vmem:[#allocation10_spill] sm:$0xff] %v3364_v31  ;;  %v443_v43 = vshll.u32 %v3355_v22, 16  ;;  %v3379_v46 = vcombine.low %v198_v39, %v199_v28  ;;  %v437_v51 = vrot.slane %v435_v27, 1  ;;  %v3383_v52 = vcombine.low %v196_v45, %v197_v33  ;;  %v200_v59 = vld [vmem:[%s3254_s25 + $0x70] sm:$0xf] }
  0x26   : > { %2677 = vmatprep.mubr.msk.bf16.mxu1 %vm576_vm0, %v406_v1  ;;  %v433_v49 = vor.u32 %v431_v25, %v429_v36  ;;  %v439_v55 = vshrl.u32 %v3341_v5, 16  ;;  %v451_v57 = vshll.u32 %v3364_v31, 16  ;;  %v3396_v60 = vcombine.low %v202_v53, %v3374_v40  ;;  %v3399_v61 = vld [vmem:[%s3254_s25 + $0x84] sm:$0xf]  ;;  %v206_v4 = vld [vmem:[%s3254_s25 + $0x88] sm:$0xf] }
  0x27   : > { %2786 = vmatmul.mubr.msk.bf16.gmra.mrb[8].mxu0 %vm576_vm0, %v3327_v58  ;;  %4063 = vst [vmem:[#allocation11_spill] sm:$0xff] %v3379_v46  ;;  %4064 = vst [vmem:[#allocation12_spill] sm:$0xff] %v3383_v52  ;;  %v3404_v62 = vcombine.low %v193_v6, %v194_v23  ;;  %v3406_v1 = vcombine.low %v195_v17, %v196_v45  ;;  %v447_v2 = vshrl.u32 %v3355_v22, 16  ;;  %v445_v10 = vrot.slane %v443_v43, 1  ;;  %v204_v15 = vld [vmem:[%s3254_s25 + $0x80] sm:$0xf] }
  0x28   : > { %2789 = vmatprep.mubr.msk.bf16.mxu0 %vm576_vm0, %v3333_v63  ;;  %4065 = vst [vmem:[#allocation13_spill] sm:$0xff] %v3396_v60  ;;  %v3409_v3 = vcombine.low %v200_v59, %v201_v47  ;;  %v430_v7 = vsel %vm362_vm1, %v425_v42, %v429_v36  ;;  %v467_v14 = vshll.u32 %v3379_v46, 16  ;;  %v3416_v16 = vcombine.low %v206_v4, %v3387_v54  ;;  %v3419_v18 = vld [vmem:[%s3254_s25 + $0x94] sm:$0xf]  ;;  %v208_v23 = vld [vmem:[%s3254_s25 + $0x90] sm:$0xf] }
  0x29   : > { %v438_v6 = vsel %vm362_vm1, %v433_v49, %v437_v51  ;;  %v3422_v17 = vcombine.low %v197_v33, %v198_v39  ;;  %v459_v19 = vshll.u32 %v3383_v52, 16  ;;  %v3426_v20 = vcombine.low %v204_v15, %v3399_v61 }
  0x2a   : > { %4066 = vst [vmem:[#allocation14_spill] sm:$0xff] %v3409_v3  ;;  %4067 = vst [vmem:[#allocation15_spill] sm:$0xff] %v3416_v16  ;;  %v441_v25 = vor.u32 %v439_v55, %v437_v51  ;;  %v453_v27 = vrot.slane %v451_v57, 1  ;;  %v483_v36 = vshll.u32 %v3396_v60, 16  ;;  %v449_v42 = vor.u32 %v447_v2, %v445_v10  ;;  %v210_v55 = vld [vmem:[%s3254_s25 + $0x98] sm:$0xf] }
  0x2b   : > { %4068 = vst [vmem:[#allocation16_spill] sm:$0xff] %v3426_v20  ;;  %v463_v43 = vshrl.u32 %v3383_v52, 16  ;;  %v475_v33 = vshll.u32 %v3409_v3, 16  ;;  %v3437_v39 = vcombine.low %v208_v23, %v3419_v18  ;;  %v3439_v45 = vcombine.low %v199_v28, %v200_v59 }
  0x2c   : > { %v469_v49 = vrot.slane %v467_v14, 1  ;;  %v471_v51 = vshrl.u32 %v3379_v46, 16  ;;  %v499_v57 = vshll.u32 %v3416_v16, 16  ;;  %v461_v29 = vrot.slane %v459_v19, 1 }
  0x2d   : > { %2678 = vmatmul.mubr.msk.bf16.gmra.mrb[8].mxu1 %vm576_vm0, %v414_v35  ;;  %v455_v35 = vshrl.u32 %v3364_v31, 16  ;;  %4069 = vst [vmem:[#allocation17_spill] sm:$0xff] %v3437_v39  ;;  %v479_v48 = vshrl.u32 %v3409_v3, 16  ;;  %v491_v2 = vshll.u32 %v3426_v20, 16  ;;  %v446_v28 = vsel %vm362_vm1, %v441_v25, %v445_v10 }
  0x2e   : > { %2681 = vmatprep.mubr.msk.bf16.mxu1 %vm576_vm0, %v422_v41  ;;  %v3432_v41 = vld [vmem:[%s3254_s25 + $0x9c] sm:$0xf]  ;;  %v485_v14 = vrot.slane %v483_v36, 1  ;;  %v487_v46 = vshrl.u32 %v3396_v60, 16  ;;  %v465_v19 = vor.u32 %v463_v43, %v461_v29  ;;  %v477_v3 = vrot.slane %v475_v33, 1 }
  0x2f   : > { %2790 = vmatmul.mubr.msk.bf16.gmra.mrb[12].mxu0 %vm576_vm0, %v3362_v30  ;;  %v3447_v52 = vcombine.low %v210_v55, %v3432_v41  ;;  %v457_v59 = vor.u32 %v455_v35, %v453_v27  ;;  %v495_v31 = vshrl.u32 %v3426_v20, 16  ;;  %v3459_v22 = vcombine.low %v201_v47, %v202_v53 }
  0x30   : > { %2793 = vmatprep.mubr.msk.bf16.mxu0 %vm576_vm0, %v3370_v37  ;;  %v473_v5 = vor.u32 %v471_v51, %v469_v49  ;;  %v501_v10 = vrot.slane %v499_v57, 1  ;;  %v503_v25 = vshrl.u32 %v3416_v16, 16  ;;  %v481_v35 = vor.u32 %v479_v48, %v477_v3  ;;  %v212_v16 = vld [vmem:[%s3254_s25 + $0xa0] sm:$0xf] }
  0x31   : > { %v493_v36 = vrot.slane %v491_v2, 1  ;;  %v511_v60 = vshrl.u32 %v3437_v39, 16  ;;  %v515_v43 = vshll.u32 %v3447_v52, 16  ;;  %v454_v33 = vsel %vm362_vm1, %v449_v42, %v453_v27  ;;  %v215_v27 = vld [vmem:[%s3254_s25 + $0xac] sm:$0xf] }
  0x32   : > { %v3467_v47 = vsel %vm362_vm1, %v457_v59, %v461_v29  ;;  %v3470_v53 = vcombine.low %v3374_v40, %v204_v15  ;;  %v489_v51 = vor.u32 %v487_v46, %v485_v14  ;;  %v3473_v48 = vsel %vm362_vm1, %v465_v19, %v469_v49  ;;  %v214_v46 = vld [vmem:[%s3254_s25 + $0xa8] sm:$0xf]  ;;  %v3490_v49 = vld [vmem:[%s3254_s25 + $0xb0] sm:$0xf] }
  0x33   : > { %v3476_v57 = vcombine.low %v3399_v61, %v206_v4  ;;  %v497_v2 = vor.u32 %v495_v31, %v493_v36  ;;  %v3481_v42 = vsel %vm362_vm1, %v473_v5, %v477_v3  ;;  %v3484_v29 = vcombine.low %v3387_v54, %v208_v23  ;;  %v226_v61 = vld [vmem:[%s3254_s25 + $0xd8] sm:$0xf]  ;;  %v3502_v54 = vld [vmem:[%s3254_s25 + $0xb4] sm:$0xf] }
  0x34   : > { %v505_v40 = vor.u32 %v503_v25, %v501_v10  ;;  %v3494_v31 = vsel %vm362_vm1, %v481_v35, %v485_v14  ;;  %v3497_v4 = vcombine.low %v3419_v18, %v210_v55  ;;  %v3499_v5 = vrot.slane %v515_v43, 1  ;;  %v3505_v3 = vld [vmem:[%s3254_s25 + $0xb8] sm:$0xf]  ;;  %v3521_v14 = vld [vmem:[%s3254_s25 + $0xd4] sm:$0xf] }
  0x35   : > { %2682 = vmatmul.mubr.msk.bf16.gmra.mrb[12].mxu1 %vm576_vm0, %v430_v7  ;;  %v507_v7 = vshll.u32 %v3437_v39, 16  ;;  %v4070_v23 = vshll.u32 %v3286_v24, 16  ;;  %v3513_v18 = vsel %vm362_vm1, %v489_v51, %v493_v36  ;;  %v3518_v55 = vcombine.low %v214_v46, %v215_v27  ;;  %v3536_v25 = vld [vmem:[%s3254_s25 + $0xc0] sm:$0xf]  ;;  %v3556_v51 = vld [vmem:[%s3254_s25 + $0xc8] sm:$0xf] }
  0x36   : > { %2685 = vmatprep.mubr.msk.bf16.mxu1 %vm576_vm0, %v438_v6  ;;  %v213_v6 = vld [vmem:[%s3254_s25 + $0xa4] sm:$0xf]  ;;  %v3539_v35 = vcombine.low %v3521_v14, %v226_v61  ;;  %v1615_v61 = vshll.u32 %v3267_v12, 16  ;;  %v1629_v56 = vshll.u32 %v3295_v32, 16  ;;  %v1664_v21 = vshll.u32 %v3370_v37, 16 }
  0x37   : > { %2794 = vmatmul.mubr.msk.bf16.gmra.mrb[16].mxu0 %vm576_vm0, %v3404_v62  ;;  %v509_v39 = vrot.slane %v507_v7, 1  ;;  %v3487_v15 = vcombine.low %v212_v16, %v213_v6  ;;  %v1624_v19 = vrot.slane %v4070_v23, 1  ;;  %v3529_v7 = vcombine.low %v213_v6, %v214_v46  ;;  %v3553_v6 = vld [vmem:[%s3254_s25 + $0xc4] sm:$0xf]  ;;  %v3563_v46 = vld [vmem:[%s3254_s25 + $0xcc] sm:$0xf] }
  0x38   : > { %2797 = vmatprep.mubr.msk.bf16.mxu0 %vm576_vm0, %v3406_v1  ;;  %v1619_v23 = vshrl.u32 %v3267_v12, 16  ;;  %v1617_v0 = vrot.slane %v1615_v61, 1  ;;  %v3583_v12 = vcombine.low %v3553_v6, %v3556_v51  ;;  %v1631_v61 = vrot.slane %v1629_v56, 1 }
  0x39   : > { %v513_v59 = vor.u32 %v511_v60, %v509_v39  ;;  %v3516_v60 = vcombine.low %v3432_v41, %v212_v16  ;;  %v3533_v41 = vld [vmem:[%s3254_s25 + $0xbc] sm:$0xf]  ;;  %v3542_v36 = vsel %vm362_vm1, %v505_v40, %v509_v39  ;;  %v224_v39 = vld [vmem:[%s3254_s25 + $0xd0] sm:$0xf]  ;;  %v4071_v40 = vshrl.u32 %v3262_v9, 16 }
  0x3a   : > { %v3575_v20 = vcombine.low %v3533_v41, %v3536_v25  ;;  %v1633_v9 = vshrl.u32 %v3295_v32, 16  ;;  %v1640_v16 = vshrl.u32 %v3306_v44, 16  ;;  %v1643_v32 = vshll.u32 %v3327_v58, 16 }
  0x3d   : > { %2686 = vmatmul.mubr.msk.bf16.gmra.mrb[16].mxu1 %vm576_vm0, %v446_v28  ;;  %v3527_v28 = vsel %vm362_vm1, %v497_v2, %v501_v10  ;;  %v3550_v10 = vcombine.low %v3502_v54, %v3505_v3  ;;  %v3560_v2 = vsel %vm362_vm1, %v513_v59, %v3499_v5  ;;  %v1626_v59 = vshrl.u32 %v3286_v24, 16 }
  0x3e   : > { %2689 = vmatprep.mubr.msk.bf16.mxu1 %vm576_vm0, %v454_v33  ;;  %v3546_v33 = vcombine.low %v215_v27, %v3490_v49  ;;  %v1614_v27 = vor.u32 %v3367_v34, %v4071_v40  ;;  %v1636_v34 = vshll.u32 %v3306_v44, 16  ;;  %v3586_v40 = vcombine.low %v3563_v46, %v224_v39 }
  0x3f   : > { %2798 = vmatmul.mubr.msk.bf16.gmra.mrb[20].mxu0 %vm576_vm0, %v3422_v17  ;;  %v1628_v43 = vor.u32 %v1626_v59, %v1624_v19  ;;  %v1621_v24 = vor.u32 %v1619_v23, %v1617_v0  ;;  %v1647_v39 = vshrl.u32 %v3327_v58, 16  ;;  %v1650_v59 = vshll.u32 %v3333_v63, 16 }
  0x40   : > { %2801 = vmatprep.mubr.msk.bf16.mxu0 %vm576_vm0, %v3439_v45  ;;  %v3590_v50 = vsel %vm362_vm1, %v1614_v27, %v1617_v0  ;;  %v1638_v38 = vrot.slane %v1636_v34, 1  ;;  %v1654_v44 = vshrl.u32 %v3333_v63, 16  ;;  %v1657_v27 = vshll.u32 %v3362_v30, 16 }
  0x41   : > { %v3605_v56 = vsel %vm362_vm1, %v1621_v24, %v1624_v19  ;;  %v3608_v0 = vsel %vm362_vm1, %v1628_v43, %v1631_v61  ;;  %v1645_v23 = vrot.slane %v1643_v32, 1  ;;  %v1652_v34 = vrot.slane %v1650_v59, 1 }
  0x42   : > { %v1642_v58 = vor.u32 %v1640_v16, %v1638_v38  ;;  %v1661_v63 = vshrl.u32 %v3362_v30, 16  ;;  %v1668_v19 = vshrl.u32 %v3370_v37, 16  ;;  %v1666_v32 = vrot.slane %v1664_v21, 1 }
  0x43   : > { %v1649_v43 = vor.u32 %v1647_v39, %v1645_v23  ;;  %v1675_v59 = vshrl.u32 %v3404_v62, 16  ;;  %v1678_v30 = vshll.u32 %v3406_v1, 16  ;;  %v1685_v21 = vshll.u32 %v3422_v17, 16 }
  0x44   : > { %v3618_v24 = vsel %vm362_vm1, %v1642_v58, %v1645_v23  ;;  %v1689_v23 = vshrl.u32 %v3422_v17, 16 }
  0x45   : > { %2690 = vmatmul.mubr.msk.bf16.gmra.mrb[20].mxu1 %vm576_vm0, %v3467_v47  ;;  %v1635_v47 = vor.u32 %v1633_v9, %v1631_v61  ;;  %v1656_v9 = vor.u32 %v1654_v44, %v1652_v34  ;;  %v1671_v61 = vshll.u32 %v3404_v62, 16  ;;  %v1670_v44 = vor.u32 %v1668_v19, %v1666_v32 }
  0x46   : > { %2693 = vmatprep.mubr.msk.bf16.mxu1 %vm576_vm0, %v3473_v48  ;;  %v1659_v48 = vrot.slane %v1657_v27, 1  ;;  %v1682_v27 = vshrl.u32 %v3406_v1, 16  ;;  %v1680_v58 = vrot.slane %v1678_v30, 1  ;;  %v1696_v1 = vshrl.u32 %v3439_v45, 16 }
  0x47   : > { %2802 = vmatmul.mubr.msk.bf16.gmra.mrb[24].mxu0 %vm576_vm0, %v3459_v22  ;;  %v3613_v26 = vsel %vm362_vm1, %v1635_v47, %v1638_v38  ;;  %v3624_v38 = vsel %vm362_vm1, %v1649_v43, %v1652_v34  ;;  %v1673_v37 = vrot.slane %v1671_v61, 1  ;;  %v1692_v34 = vshll.u32 %v3439_v45, 16 }
  0x48   : > { %2805 = vmatprep.mubr.msk.bf16.mxu0 %vm576_vm0, %v3470_v53  ;;  %v1663_v16 = vor.u32 %v1661_v63, %v1659_v48  ;;  %v3627_v47 = vsel %vm362_vm1, %v1656_v9, %v1659_v48  ;;  %v1687_v48 = vrot.slane %v1685_v21, 1  ;;  %v1699_v19 = vshll.u32 %v3459_v22, 16 }
  0x49   : > { %v1677_v62 = vor.u32 %v1675_v59, %v1673_v37  ;;  %v3646_v63 = vsel %vm362_vm1, %v1670_v44, %v1673_v37  ;;  %v1694_v17 = vrot.slane %v1692_v34, 1  ;;  %v1703_v9 = vshrl.u32 %v3459_v22, 16 }
  0x4a   : > { %v3631_v39 = vsel %vm362_vm1, %v1663_v16, %v1666_v32  ;;  %v1706_v45 = vshll.u32 %v3470_v53, 16  ;;  %v1691_v61 = vor.u32 %v1689_v23, %v1687_v48  ;;  %v1701_v16 = vrot.slane %v1699_v19, 1 }
  0x4b   : > { %v3650_v43 = vsel %vm362_vm1, %v1677_v62, %v1680_v58  ;;  %v1710_v32 = vshrl.u32 %v3470_v53, 16  ;;  %v1698_v59 = vor.u32 %v1696_v1, %v1694_v17  ;;  %v1713_v37 = vshll.u32 %v3476_v57, 16 }
  0x4c   : > { %v1708_v30 = vrot.slane %v1706_v45, 1  ;;  %v3661_v44 = vsel %vm362_vm1, %v1691_v61, %v1694_v17  ;;  %v1720_v22 = vshll.u32 %v3484_v29, 16  ;;  %v1724_v21 = vshrl.u32 %v3484_v29, 16 }
  0x4d   : > { %2694 = vmatmul.mubr.msk.bf16.gmra.mrb[24].mxu1 %vm576_vm0, %v3481_v42  ;;  %v1684_v42 = vor.u32 %v1682_v27, %v1680_v58  ;;  %v1717_v27 = vshrl.u32 %v3476_v57, 16  ;;  %v1705_v58 = vor.u32 %v1703_v9, %v1701_v16  ;;  %v3666_v62 = vsel %vm362_vm1, %v1698_v59, %v1701_v16 }
  0x4e   : > { %2697 = vmatprep.mubr.msk.bf16.mxu1 %vm576_vm0, %v3494_v31  ;;  %v1712_v23 = vor.u32 %v1710_v32, %v1708_v30  ;;  %v1715_v34 = vrot.slane %v1713_v37, 1  ;;  %v1727_v53 = vshll.u32 %v3497_v4, 16  ;;  %v1738_v9 = vshrl.u32 %v3516_v60, 16 }
  0x4f   : > { %2806 = vmatmul.mubr.msk.bf16.gmra.mrb[28].mxu0 %vm576_vm0, %v3476_v57  ;;  %v3655_v31 = vsel %vm362_vm1, %v1684_v42, %v1687_v48  ;;  %v3670_v1 = vsel %vm362_vm1, %v1705_v58, %v1708_v30  ;;  %v1722_v42 = vrot.slane %v1720_v22, 1  ;;  %v1731_v57 = vshrl.u32 %v3497_v4, 16 }
  0x50   : > { %2809 = vmatprep.mubr.msk.bf16.mxu0 %vm576_vm0, %v3484_v29  ;;  %v1734_v48 = vshll.u32 %v3516_v60, 16  ;;  %v3679_v29 = vsel %vm362_vm1, %v1712_v23, %v1715_v34  ;;  %v1719_v19 = vor.u32 %v1717_v27, %v1715_v34  ;;  %v1729_v17 = vrot.slane %v1727_v53, 1 }
  0x51   : > { %v1726_v45 = vor.u32 %v1724_v21, %v1722_v42  ;;  %v1745_v16 = vshrl.u32 %v3529_v7, 16  ;;  %v1748_v59 = vshll.u32 %v3546_v33, 16  ;;  %v1752_v30 = vshrl.u32 %v3546_v33, 16 }
  0x52   : > { %v1736_v61 = vrot.slane %v1734_v48, 1  ;;  %v1733_v32 = vor.u32 %v1731_v57, %v1729_v17  ;;  %v1759_v21 = vshrl.u32 %v3550_v10, 16  ;;  %v1762_v23 = vshll.u32 %v3575_v20, 16 }
  0x53   : > { %v3694_v37 = vsel %vm362_vm1, %v1726_v45, %v1729_v17  ;;  %v1750_v22 = vrot.slane %v1748_v59, 1  ;;  %v1766_v57 = vshrl.u32 %v3575_v20, 16  ;;  %v1769_v17 = vshll.u32 %v3583_v12, 16 }
  0x54   : > { %v3698_v58 = vsel %vm362_vm1, %v1733_v32, %v1736_v61  ;;  %v4072_v45 = vshll.u32 %v3487_v15, 16  ;;  %v1776_v59 = vshll.u32 %v3586_v40, 16 }
  0x55   : > { %2698 = vmatmul.mubr.msk.bf16.gmra.mrb[28].mxu1 %vm576_vm0, %v3513_v18  ;;  %v1741_v18 = vshll.u32 %v3529_v7, 16  ;;  %v1754_v48 = vor.u32 %v1752_v30, %v1750_v22 }
  0x56   : > { %2701 = vmatprep.mubr.msk.bf16.mxu1 %vm576_vm0, %v3527_v28  ;;  %v1740_v28 = vor.u32 %v1738_v9, %v1736_v61  ;;  %v1773_v9 = vshrl.u32 %v3583_v12, 16  ;;  %v525_v61 = vrot.slane %v4072_v45, 1 }
  0x57   : > { %2810 = vmatmul.mubr.msk.bf16.gmra.mrb[32].mxu0 %vm576_vm0, %v3497_v4  ;;  %v3689_v4 = vsel %vm362_vm1, %v1719_v19, %v1722_v42  ;;  %v1743_v27 = vrot.slane %v1741_v18, 1  ;;  %v1764_v19 = vrot.slane %v1762_v23, 1 }
  0x58   : > { %2813 = vmatprep.mubr.msk.bf16.mxu0 %vm576_vm0, %v3516_v60  ;;  %v1755_v60 = vshll.u32 %v3550_v10, 16 }
  0x59   : > { %v3703_v34 = vsel %vm362_vm1, %v1740_v28, %v1743_v27  ;;  %v1747_v53 = vor.u32 %v1745_v16, %v1743_v27  ;;  %v3720_v16 = vcombine.low %v3490_v49, %v3502_v54  ;;  %v1768_v28 = vor.u32 %v1766_v57, %v1764_v19 }
  0x5a   : > { %v1757_v42 = vrot.slane %v1755_v60, 1  ;;  %v1771_v27 = vrot.slane %v1769_v17, 1  ;;  %v4073_v60 = vshrl.u32 %v3447_v52, 16  ;;  %v1778_v54 = vrot.slane %v1776_v59, 1 }
  0x5b   : > { %v3711_v18 = vsel %vm362_vm1, %v1747_v53, %v1750_v22 }
  0x5c   : > { %v1761_v32 = vor.u32 %v1759_v21, %v1757_v42  ;;  %v3723_v30 = vsel %vm362_vm1, %v1754_v48, %v1757_v42  ;;  %v521_v22 = vor.u32 %v4073_v60, %v3499_v5  ;;  %v3744_v53 = vsel %vm362_vm1, %v1768_v28, %v1771_v27 }
  0x5d   : > { %2702 = vmatmul.mubr.msk.bf16.gmra.mrb[32].mxu1 %vm576_vm0, %v3542_v36  ;;  %v4074_v36 = vshrl.u32 %v3487_v15, 16  ;;  %v1775_v5 = vor.u32 %v1773_v9, %v1771_v27  ;;  %v1784_v42 = vshll.u32 %v3539_v35, 16  ;;  %v535_v48 = vshrl.u32 %v3518_v55, 16 }
  0x5e   : > { %2705 = vmatprep.mubr.msk.bf16.mxu1 %vm576_vm0, %v3560_v2  ;;  %v3737_v49 = vsel %vm362_vm1, %v1761_v32, %v1764_v19  ;;  %v4075_v2 = vshll.u32 %v3518_v55, 16  ;;  %v526_v57 = vsel %vm362_vm1, %v521_v22, %v525_v61  ;;  %v543_v9 = vshrl.u32 %v3720_v16, 16 }
  0x5f   : > { %2814 = vmatmul.mubr.msk.bf16.gmra.mrb[36].mxu0 %vm576_vm0, %v3529_v7  ;;  %v3734_v7 = vcombine.low %v3505_v3, %v3533_v41  ;;  %v529_v21 = vor.u32 %v4074_v36, %v525_v61  ;;  %v539_v3 = vshll.u32 %v3720_v16, 16  ;;  %v3750_v41 = vsel %vm362_vm1, %v1775_v5, %v1778_v54 }
  0x60   : > { %2817 = vmatprep.mubr.msk.bf16.mxu0 %vm576_vm0, %v3546_v33  ;;  %v533_v23 = vrot.slane %v4075_v2, 1  ;;  %v1780_v33 = vshrl.u32 %v3586_v40, 16  ;;  %v3754_v17 = vrot.slane %v1784_v42, 1  ;;  %v3768_v28 = vcombine.low %v3536_v25, %v3553_v6 }
  0x61   : > { %v547_v32 = vshll.u32 %v3734_v7, 16  ;;  %v541_v61 = vrot.slane %v539_v3, 1 }
  0x62   : > { %v1782_v19 = vor.u32 %v1780_v33, %v1778_v54  ;;  %v534_v45 = vsel %vm362_vm1, %v529_v21, %v533_v23  ;;  %v537_v27 = vor.u32 %v535_v48, %v533_v23  ;;  %v2415_v54 = vcombine.low %v3556_v51, %v3563_v46 }
  0x63   : > { %v545_v60 = vor.u32 %v543_v9, %v541_v61  ;;  %v549_v22 = vrot.slane %v547_v32, 1  ;;  %v555_v36 = vshll.u32 %v3768_v28, 16  ;;  %v551_v21 = vshrl.u32 %v3734_v7, 16 }
  0x64   : > { %v3761_v59 = vsel %vm362_vm1, %v1782_v19, %v3754_v17  ;;  %v559_v6 = vshrl.u32 %v3768_v28, 16  ;;  %v563_v2 = vshll.u32 %v2415_v54, 16  ;;  %v2498_v33 = vcombine.low %v3521_v14, %v3521_v14  ;;  %v4081_v14 = vld [vmem:[#allocation7_spill] sm:$0xff] }
  0x65   : > { %2706 = vmatmul.mubr.msk.bf16.gmra.mrb[36].mxu1 %vm576_vm0, %v526_v57  ;;  %v550_v25 = vsel %vm362_vm1, %v545_v60, %v549_v22  ;;  %v553_v46 = vor.u32 %v551_v21, %v549_v22 }
  0x66   : > { %2709 = vmatprep.mubr.msk.bf16.mxu1 %vm576_vm0, %v534_v45  ;;  %v565_v5 = vrot.slane %v563_v2, 1 }
  0x67   : > { %2818 = vmatmul.mubr.msk.bf16.gmra.mrb[40].mxu0 %vm576_vm0, %v3550_v10  ;;  %v542_v10 = vsel %vm362_vm1, %v537_v27, %v541_v61 }
  0x68   : > { %2821 = vmatprep.mubr.msk.bf16.mxu0 %vm576_vm0, %v3575_v20  ;;  %v557_v20 = vrot.slane %v555_v36, 1 }
  0x6a   : > { %v561_v23 = vor.u32 %v559_v6, %v557_v20  ;;  %v558_v42 = vsel %vm362_vm1, %v553_v46, %v557_v20 }
  0x6c   : > { %v566_v3 = vsel %vm362_vm1, %v561_v23, %v565_v5 }
  0x6d   : > { %2710 = vmatmul.mubr.msk.bf16.gmra.mrb[40].mxu1 %vm576_vm0, %v542_v10 }
  0x6e   : > { %2713 = vmatprep.mubr.msk.bf16.mxu1 %vm576_vm0, %v550_v25 }
  0x6f   : > { %2822 = vmatmul.mubr.msk.bf16.gmra.mrb[44].mxu0 %vm576_vm0, %v3583_v12  ;;  %v567_v12 = vshrl.u32 %v2415_v54, 16 }
  0x70   : > { %2825 = vmatprep.mubr.msk.bf16.mxu0 %vm576_vm0, %v3586_v40 }
  0x71   : > { %v569_v40 = vor.u32 %v567_v12, %v565_v5 }
  0x75   : > { %2714 = vmatmul.mubr.msk.bf16.gmra.mrb[44].mxu1 %vm576_vm0, %v558_v42 }
  0x76   : > { %2717 = vmatprep.mubr.msk.bf16.mxu1 %vm576_vm0, %v566_v3 }
  0x77   : > { %2826 = vmatmul.mubr.msk.bf16.gmra.mrb[48].mxu0 %vm576_vm0, %v2498_v33 }
  0x78   : > { %2831 = vmatprep.mubr.msk.bf16.mxu0 %vm576_vm0, %v3590_v50  ;;  %v4076_v50 = vld [vmem:[#allocation2_spill] sm:$0xff] }
  0x7d   : > { %2718 = vmatmul.mubr.msk.bf16.gmra.mrb[48].mxu1 %vm576_vm0, %v569_v40 }
  0x7e   : > { %2723 = vmatprep.mubr.msk.bf16.mxu1 %vm576_vm0, %v3270_v13  ;;  %v4077_v13 = vld [vmem:[#allocation3_spill] sm:$0xff] }
  0x7f   : > { %2832 = vmatmul.mubr.msk.bf16.vlgmr.msra.gmra.mrb[0].mxu0 %vm576_vm0, %v3605_v56  ;;  %v4082_v56 = vld [vmem:[#allocation8_spill] sm:$0xff] }
  0x80   : > { %2835 = vmatprep.mubr.msk.bf16.mxu0 %vm576_vm0, %v3608_v0  ;;  %v4083_v0 = vld [vmem:[#allocation9_spill] sm:$0xff] }
  0x85   : > { %2724 = vmatmul.mubr.msk.bf16.vlgmr.msra.gmra.mrb[0].mxu1 %vm576_vm0, %v3260_v8  ;;  %v4078_v8 = vld [vmem:[#allocation4_spill] sm:$0xff] }
  0x86   : > { %2727 = vmatprep.mubr.msk.bf16.mxu1 %vm576_vm0, %v3265_v11  ;;  %v4079_v11 = vld [vmem:[#allocation5_spill] sm:$0xff] }
  0x87   : > { %2836 = vmatmul.mubr.msk.bf16.gmra.mrb[4].mxu0 %vm576_vm0, %v3613_v26  ;;  %v4080_v26 = vld [vmem:[#allocation6_spill] sm:$0xff] }
  0x88   : > { %2839 = vmatprep.mubr.msk.bf16.mxu0 %vm576_vm0, %v3618_v24  ;;  %v4084_v24 = vld [vmem:[#allocation10_spill] sm:$0xff] }
  0x8d   : > { %2728 = vmatmul.mubr.msk.bf16.gmra.mrb[4].mxu1 %vm576_vm0, %v4076_v50 }
  0x8e   : > { %2731 = vmatprep.mubr.msk.bf16.mxu1 %vm576_vm0, %v4077_v13 }
  0x8f   : > { %2840 = vmatmul.mubr.msk.bf16.gmra.mrb[8].mxu0 %vm576_vm0, %v3624_v38  ;;  %v4085_v38 = vld [vmem:[#allocation12_spill] sm:$0xff] }
  0x90   : > { %2843 = vmatprep.mubr.msk.bf16.mxu0 %vm576_vm0, %v3627_v47  ;;  %v4086_v47 = vld [vmem:[#allocation11_spill] sm:$0xff] }
  0x95   : > { %2732 = vmatmul.mubr.msk.bf16.gmra.mrb[8].mxu1 %vm576_vm0, %v4078_v8 }
  0x96   : > { %2735 = vmatprep.mubr.msk.bf16.mxu1 %vm576_vm0, %v4079_v11 }
  0x97   : > { %2844 = vmatmul.mubr.msk.bf16.gmra.mrb[12].mxu0 %vm576_vm0, %v3631_v39  ;;  %v4087_v39 = vld [vmem:[#allocation14_spill] sm:$0xff] }
  0x98   : > { %2847 = vmatprep.mubr.msk.bf16.mxu0 %vm576_vm0, %v3646_v63  ;;  %v4088_v63 = vld [vmem:[#allocation13_spill] sm:$0xff] }
  0x9d   : > { %2736 = vmatmul.mubr.msk.bf16.gmra.mrb[12].mxu1 %vm576_vm0, %v4080_v26 }
  0x9e   : > { %2739 = vmatprep.mubr.msk.bf16.mxu1 %vm576_vm0, %v4081_v14 }
  0x9f   : > { %2848 = vmatmul.mubr.msk.bf16.gmra.mrb[16].mxu0 %vm576_vm0, %v3650_v43  ;;  %v4089_v43 = vld [vmem:[#allocation16_spill] sm:$0xff] }
  0xa0   : > { %2851 = vmatprep.mubr.msk.bf16.mxu0 %vm576_vm0, %v3655_v31  ;;  %v4090_v31 = vld [vmem:[#allocation15_spill] sm:$0xff] }
  0xa5   : > { %2740 = vmatmul.mubr.msk.bf16.gmra.mrb[16].mxu1 %vm576_vm0, %v4082_v56 }
  0xa6   : > { %2743 = vmatprep.mubr.msk.bf16.mxu1 %vm576_vm0, %v4083_v0 }
  0xa7   : > { %2852 = vmatmul.mubr.msk.bf16.gmra.mrb[20].mxu0 %vm576_vm0, %v3661_v44  ;;  %v4091_v44 = vld [vmem:[#allocation17_spill] sm:$0xff] }
  0xa8   : > { %2855 = vmatprep.mubr.msk.bf16.mxu0 %vm576_vm0, %v3666_v62  ;;  %v1788_v62 = vshrl.u32 %v3539_v35, 16 }
  0xad   : > { %2744 = vmatmul.mubr.msk.bf16.gmra.mrb[20].mxu1 %vm576_vm0, %v4084_v24 }
  0xae   : > { %2747 = vmatprep.mubr.msk.bf16.mxu1 %vm576_vm0, %v4085_v38 }
  0xaf   : > { %2856 = vmatmul.mubr.msk.bf16.gmra.mrb[24].mxu0 %vm576_vm0, %v3670_v1 }
  0xb0   : > { %2859 = vmatprep.mubr.msk.bf16.mxu0 %vm576_vm0, %v3679_v29 }
  0xb5   : > { %2748 = vmatmul.mubr.msk.bf16.gmra.mrb[24].mxu1 %vm576_vm0, %v4086_v47 }
  0xb6   : > { %2751 = vmatprep.mubr.msk.bf16.mxu1 %vm576_vm0, %v4087_v39 }
  0xb7   : > { %2860 = vmatmul.mubr.msk.bf16.gmra.mrb[28].mxu0 %vm576_vm0, %v3689_v4 }
  0xb8   : > { %2863 = vmatprep.mubr.msk.bf16.mxu0 %vm576_vm0, %v3694_v37 }
  0xbd   : > { %2752 = vmatmul.mubr.msk.bf16.gmra.mrb[28].mxu1 %vm576_vm0, %v4088_v63 }
  0xbe   : > { %2755 = vmatprep.mubr.msk.bf16.mxu1 %vm576_vm0, %v4089_v43 }
  0xbf   : > { %2864 = vmatmul.mubr.msk.bf16.gmra.mrb[32].mxu0 %vm576_vm0, %v3698_v58 }
  0xc0   : > { %2867 = vmatprep.mubr.msk.bf16.mxu0 %vm576_vm0, %v3703_v34 }
  0xc5   : > { %2756 = vmatmul.mubr.msk.bf16.gmra.mrb[32].mxu1 %vm576_vm0, %v4090_v31 }
  0xc6   : > { %2759 = vmatprep.mubr.msk.bf16.mxu1 %vm576_vm0, %v4091_v44 }
  0xc7   : > { %2868 = vmatmul.mubr.msk.bf16.gmra.mrb[36].mxu0 %vm576_vm0, %v3711_v18 }
  0xc8   : > { %2871 = vmatprep.mubr.msk.bf16.mxu0 %vm576_vm0, %v3723_v30 }
  0xcd   : > { %2760 = vmatmul.mubr.msk.bf16.gmra.mrb[36].mxu1 %vm576_vm0, %v3447_v52  ;;  %v1790_v52 = vor.u32 %v1788_v62, %v3754_v17 }
  0xce   : > { %2763 = vmatprep.mubr.msk.bf16.mxu1 %vm576_vm0, %v3487_v15  ;;  %v2443_v15 = vcombine.low %v3556_v51, %v3556_v51 }
  0xcf   : > { %2872 = vmatmul.mubr.msk.bf16.gmra.mrb[40].mxu0 %vm576_vm0, %v3737_v49  ;;  %v3915_v49 = vld [vmem:[%s4036_s2] ss:$0 sm:$0xff] }
  0xd0   : > { %2875 = vmatprep.mubr.msk.bf16.mxu0 %vm576_vm0, %v3744_v53 }
  0xd5   : > { %2764 = vmatmul.mubr.msk.bf16.gmra.mrb[40].mxu1 %vm576_vm0, %v3518_v55 }
  0xd6   : > { %2767 = vmatprep.mubr.msk.bf16.mxu1 %vm576_vm0, %v3720_v16 }
  0xd7   : > { %2876 = vmatmul.mubr.msk.bf16.gmra.mrb[44].mxu0 %vm576_vm0, %v3750_v41 }
  0xd8   : > { %2879 = vmatprep.mubr.msk.bf16.mxu0 %vm576_vm0, %v3761_v59 }
  0xdd   : > { %2768 = vmatmul.mubr.msk.bf16.gmra.mrb[44].mxu1 %vm576_vm0, %v3734_v7 }
  0xde   : > { %2771 = vmatprep.mubr.msk.bf16.mxu1 %vm576_vm0, %v3768_v28 }
  0xdf   : > { %2880 = vmatmul.mubr.msk.bf16.gmra.mrb[52].mxu0 %vm576_vm0, %v1790_v52 }
  0xe5   : > { %2772 = vmatmul.mubr.msk.bf16.gmra.mrb[52].mxu1 %vm576_vm0, %v2443_v15 }
 0x14a   : > { %v3900_v55 = vpop.f32.mrb[48].mxu0 }
 0x14b   : > { %v3902_v35 = vpop.f32.mrb[49].mxu0 }
 0x14c   : > { %v2828_v1 = vpop.f32.mrb[50].mxu0 }
 0x14d   : > { %v3904_v29 = vpop.f32.mrb[51].mxu0 }
 0x150   : > { %v3906_v4 = vpop.f32.mrb[48].mxu1 }
 0x151   : > { %v3908_v58 = vpop.f32.mrb[49].mxu1 }
 0x152   : > { %v2833_v37 = vpop.f32.mrb[0].mxu0  ;;  %v2720_v18 = vpop.f32.mrb[50].mxu1 }
 0x153   : > { %v1909_v34 = vpop.f32.mrb[1].mxu0  ;;  %v3910_v30 = vpop.f32.mrb[51].mxu1 }
 0x154   : > { %v2834_v16 = vpop.f32.mrb[2].mxu0 }
 0x155   : > { %v1912_v51 = vpop.f32.mrb[3].mxu0 }
 0x158   : > { %v2725_v7 = vpop.f32.mrb[0].mxu1 }
 0x159   : > { %v2883_v41 = vadd.f32 %v2833_v37, %v2725_v7  ;;  %v989_v57 = vpop.f32.mrb[1].mxu1 }
 0x15a   : > { %v2837_v53 = vpop.f32.mrb[4].mxu0  ;;  %v2884_v19 = vadd.f32 %v1909_v34, %v989_v57  ;;  %v2726_v17 = vpop.f32.mrb[2].mxu1 }
 0x15b   : > { %v1925_v48 = vpop.f32.mrb[5].mxu0  ;;  %v2175_v9 = vadd.f32 %v2883_v41, %v3915_v49  ;;  %v2885_v32 = vadd.f32 %v2834_v16, %v2726_v17  ;;  %v992_v59 = vpop.f32.mrb[3].mxu1 }
 0x15c   : > { %v2838_v45 = vpop.f32.mrb[6].mxu0  ;;  %v2173_v28 = vadd.f32 %v2884_v19, %v3915_v49  ;;  %v2886_v27 = vadd.f32 %v1912_v51, %v992_v59 }
 0x15d   : > { %v1928_v61 = vpop.f32.mrb[7].mxu0  ;;  %3095 = vtanh.f32 %v2175_v9  ;;  %v2176_v60 = vadd.f32 %v2885_v32, %v3915_v49 }
 0x15e   : > { %3097 = vtanh.f32 %v2173_v28  ;;  %v2174_v22 = vadd.f32 %v2886_v27, %v3915_v49 }
 0x15f   : > { %3099 = vtanh.f32 %v2176_v60 }
 0x160   : > { %3101 = vtanh.f32 %v2174_v22  ;;  %v2729_v54 = vpop.f32.mrb[4].mxu1 }
 0x161   : > { %v2887_v10 = vadd.f32 %v2837_v53, %v2729_v54  ;;  %v1005_v21 = vpop.f32.mrb[5].mxu1 }
 0x162   : > { %v2841_v36 = vpop.f32.mrb[8].mxu0  ;;  %v2888_v6 = vadd.f32 %v1925_v48, %v1005_v21  ;;  %v2730_v2 = vpop.f32.mrb[6].mxu1 }
 0x163   : > { %v1941_v25 = vpop.f32.mrb[9].mxu0  ;;  %v2179_v46 = vadd.f32 %v2887_v10, %v3915_v49  ;;  %v2889_v23 = vadd.f32 %v2838_v45, %v2730_v2  ;;  %v1008_v5 = vpop.f32.mrb[7].mxu1 }
 0x164   : > { %v2842_v20 = vpop.f32.mrb[10].mxu0  ;;  %v2177_v42 = vadd.f32 %v2888_v6, %v3915_v49  ;;  %v2890_v3 = vadd.f32 %v1928_v61, %v1008_v5 }
 0x165   : > { %v1944_v33 = vpop.f32.mrb[11].mxu0  ;;  %3103 = vtanh.f32 %v2179_v46  ;;  %v2180_v12 = vadd.f32 %v2889_v23, %v3915_v49 }
 0x166   : > { %3105 = vtanh.f32 %v2177_v42  ;;  %v2178_v40 = vadd.f32 %v2890_v3, %v3915_v49 }
 0x167   : > { %v3096_v50 = vpop.eup %3095  ;;  %3107 = vtanh.f32 %v2180_v12 }
 0x168   : > { %v3098_v13 = vpop.eup %3097  ;;  %2277 = vst [vmem:[%s3927_s4 + $0x10] sm:$0xff] %v3096_v50  ;;  %3109 = vtanh.f32 %v2178_v40  ;;  %v2733_v8 = vpop.f32.mrb[8].mxu1 }
 0x169   : > { %v3100_v26 = vpop.eup %3099  ;;  %2275 = vst [vmem:[%s3927_s4] sm:$0xff] %v3098_v13  ;;  %v2891_v14 = vadd.f32 %v2841_v36, %v2733_v8  ;;  %v1021_v56 = vpop.f32.mrb[9].mxu1 }
 0x16a   : > { %v2845_v11 = vpop.f32.mrb[12].mxu0  ;;  %v3102_v24 = vpop.eup %3101  ;;  %2278 = vst [vmem:[%s3927_s4 + $0x18] sm:$0xff] %v3100_v26  ;;  %v2892_v38 = vadd.f32 %v1941_v25, %v1021_v56 }
 0x16b   : > { %v1957_v0 = vpop.f32.mrb[13].mxu0  ;;  %v2734_v47 = vpop.f32.mrb[10].mxu1  ;;  %2276 = vst [vmem:[%s3927_s4 + $0x8] sm:$0xff] %v3102_v24  ;;  %v2183_v63 = vadd.f32 %v2891_v14, %v3915_v49 }
 0x16c   : > { %v2846_v39 = vpop.f32.mrb[14].mxu0  ;;  %v2893_v43 = vadd.f32 %v2842_v20, %v2734_v47  ;;  %v1024_v31 = vpop.f32.mrb[11].mxu1  ;;  %v2181_v62 = vadd.f32 %v2892_v38, %v3915_v49 }
 0x16d   : > { %v1960_v44 = vpop.f32.mrb[15].mxu0  ;;  %v2894_v52 = vadd.f32 %v1944_v33, %v1024_v31  ;;  %3111 = vtanh.f32 %v2183_v63 }
 0x16e   : > { %v2184_v15 = vadd.f32 %v2893_v43, %v3915_v49  ;;  %3113 = vtanh.f32 %v2181_v62 }
 0x16f   : > { %v2182_v1 = vadd.f32 %v2894_v52, %v3915_v49  ;;  %v3104_v37 = vpop.eup %3103 }
 0x170   : > { %3115 = vtanh.f32 %v2184_v15  ;;  %v3106_v34 = vpop.eup %3105  ;;  %2281 = vst [vmem:[%s3927_s4 + $0x30] sm:$0xff] %v3104_v37  ;;  %v2737_v18 = vpop.f32.mrb[12].mxu1 }
 0x171   : > { %3117 = vtanh.f32 %v2182_v1  ;;  %v3108_v51 = vpop.eup %3107  ;;  %2279 = vst [vmem:[%s3927_s4 + $0x20] sm:$0xff] %v3106_v34  ;;  %v2895_v7 = vadd.f32 %v2845_v11, %v2737_v18  ;;  %v1037_v53 = vpop.f32.mrb[13].mxu1 }
 0x172   : > { %v2849_v16 = vpop.f32.mrb[16].mxu0  ;;  %v3110_v57 = vpop.eup %3109  ;;  %2282 = vst [vmem:[%s3927_s4 + $0x38] sm:$0xff] %v3108_v51  ;;  %v2896_v48 = vadd.f32 %v1957_v0, %v1037_v53 }
 0x173   : > { %v1973_v41 = vpop.f32.mrb[17].mxu0  ;;  %v2738_v19 = vpop.f32.mrb[14].mxu1  ;;  %2280 = vst [vmem:[%s3927_s4 + $0x28] sm:$0xff] %v3110_v57  ;;  %v2187_v45 = vadd.f32 %v2895_v7, %v3915_v49 }
 0x174   : > { %v2850_v17 = vpop.f32.mrb[18].mxu0  ;;  %v2897_v9 = vadd.f32 %v2846_v39, %v2738_v19  ;;  %v1040_v32 = vpop.f32.mrb[15].mxu1  ;;  %v2185_v61 = vadd.f32 %v2896_v48, %v3915_v49 }
 0x175   : > { %v1976_v59 = vpop.f32.mrb[19].mxu0  ;;  %v2898_v28 = vadd.f32 %v1960_v44, %v1040_v32  ;;  %3119 = vtanh.f32 %v2187_v45 }
 0x176   : > { %v2188_v27 = vadd.f32 %v2897_v9, %v3915_v49  ;;  %3121 = vtanh.f32 %v2185_v61 }
 0x177   : > { %v2186_v60 = vadd.f32 %v2898_v28, %v3915_v49  ;;  %v3112_v22 = vpop.eup %3111 }
 0x178   : > { %3123 = vtanh.f32 %v2188_v27  ;;  %v3114_v54 = vpop.eup %3113  ;;  %2285 = vst [vmem:[%s3927_s4 + $0x50] sm:$0xff] %v3112_v22  ;;  %v2741_v36 = vpop.f32.mrb[16].mxu1 }
 0x179   : > { %3125 = vtanh.f32 %v2186_v60  ;;  %2283 = vst [vmem:[%s3927_s4 + $0x40] sm:$0xff] %v3114_v54  ;;  %v2899_v25 = vadd.f32 %v2849_v16, %v2741_v36  ;;  %v1053_v6 = vpop.f32.mrb[17].mxu1 }
 0x17a   : > { %v2853_v10 = vpop.f32.mrb[20].mxu0  ;;  %v3116_v21 = vpop.eup %3115  ;;  %v2900_v46 = vadd.f32 %v1973_v41, %v1053_v6 }
 0x17b   : > { %v1989_v2 = vpop.f32.mrb[21].mxu0  ;;  %v3118_v20 = vpop.eup %3117  ;;  %2286 = vst [vmem:[%s3927_s4 + $0x58] sm:$0xff] %v3116_v21  ;;  %v2191_v33 = vadd.f32 %v2899_v25, %v3915_v49 }
 0x17c   : > { %v2742_v23 = vpop.f32.mrb[18].mxu1  ;;  %v2854_v5 = vpop.f32.mrb[22].mxu0  ;;  %2284 = vst [vmem:[%s3927_s4 + $0x48] sm:$0xff] %v3118_v20  ;;  %v2189_v40 = vadd.f32 %v2900_v46, %v3915_v49 }
 0x17d   : > { %v2901_v42 = vadd.f32 %v2850_v17, %v2742_v23  ;;  %v1056_v3 = vpop.f32.mrb[19].mxu1  ;;  %v1992_v12 = vpop.f32.mrb[23].mxu0  ;;  %3127 = vtanh.f32 %v2191_v33 }
 0x17e   : > { %v2902_v50 = vadd.f32 %v1976_v59, %v1056_v3  ;;  %3129 = vtanh.f32 %v2189_v40 }
 0x17f   : > { %v2192_v13 = vadd.f32 %v2901_v42, %v3915_v49  ;;  %v3120_v11 = vpop.eup %3119 }
 0x180   : > { %v2190_v8 = vadd.f32 %v2902_v50, %v3915_v49  ;;  %v3122_v26 = vpop.eup %3121  ;;  %2289 = vst [vmem:[%s3927_s4 + $0x70] sm:$0xff] %v3120_v11  ;;  %v2745_v14 = vpop.f32.mrb[20].mxu1 }
 0x181   : > { %3131 = vtanh.f32 %v2192_v13  ;;  %2287 = vst [vmem:[%s3927_s4 + $0x60] sm:$0xff] %v3122_v26  ;;  %v2903_v24 = vadd.f32 %v2853_v10, %v2745_v14  ;;  %v1069_v38 = vpop.f32.mrb[21].mxu1 }
 0x182   : > { %3133 = vtanh.f32 %v2190_v8  ;;  %v2857_v56 = vpop.f32.mrb[24].mxu0  ;;  %v3124_v0 = vpop.eup %3123  ;;  %v2904_v63 = vadd.f32 %v1989_v2, %v1069_v38 }
 0x183   : > { %v2005_v47 = vpop.f32.mrb[25].mxu0  ;;  %v3126_v39 = vpop.eup %3125  ;;  %2290 = vst [vmem:[%s3927_s4 + $0x78] sm:$0xff] %v3124_v0  ;;  %v2195_v44 = vadd.f32 %v2903_v24, %v3915_v49 }
 0x184   : > { %v2746_v43 = vpop.f32.mrb[22].mxu1  ;;  %v2858_v31 = vpop.f32.mrb[26].mxu0  ;;  %2288 = vst [vmem:[%s3927_s4 + $0x68] sm:$0xff] %v3126_v39  ;;  %v2193_v1 = vadd.f32 %v2904_v63, %v3915_v49 }
 0x185   : > { %v2905_v62 = vadd.f32 %v2854_v5, %v2746_v43  ;;  %v1072_v52 = vpop.f32.mrb[23].mxu1  ;;  %v2008_v15 = vpop.f32.mrb[27].mxu0  ;;  %3135 = vtanh.f32 %v2195_v44 }
 0x186   : > { %v2906_v37 = vadd.f32 %v1992_v12, %v1072_v52  ;;  %3137 = vtanh.f32 %v2193_v1 }
 0x187   : > { %v2196_v34 = vadd.f32 %v2905_v62, %v3915_v49  ;;  %v3128_v16 = vpop.eup %3127 }
 0x188   : > { %v2194_v18 = vadd.f32 %v2906_v37, %v3915_v49  ;;  %v3130_v51 = vpop.eup %3129  ;;  %2293 = vst [vmem:[%s3927_s4 + $0x90] sm:$0xff] %v3128_v16  ;;  %v2749_v7 = vpop.f32.mrb[24].mxu1 }
 0x189   : > { %3139 = vtanh.f32 %v2196_v34  ;;  %2291 = vst [vmem:[%s3927_s4 + $0x80] sm:$0xff] %v3130_v51  ;;  %v2907_v57 = vadd.f32 %v2857_v56, %v2749_v7  ;;  %v1085_v48 = vpop.f32.mrb[25].mxu1 }
 0x18a   : > { %3141 = vtanh.f32 %v2194_v18  ;;  %v2861_v53 = vpop.f32.mrb[28].mxu0  ;;  %v2908_v45 = vadd.f32 %v2005_v47, %v1085_v48  ;;  %v2750_v9 = vpop.f32.mrb[26].mxu1 }
 0x18b   : > { %v3132_v41 = vpop.eup %3131  ;;  %v2021_v19 = vpop.f32.mrb[29].mxu0  ;;  %v2199_v59 = vadd.f32 %v2907_v57, %v3915_v49  ;;  %v2909_v61 = vadd.f32 %v2858_v31, %v2750_v9 }
 0x18c   : > { %v3134_v17 = vpop.eup %3133  ;;  %2294 = vst [vmem:[%s3927_s4 + $0x98] sm:$0xff] %v3132_v41  ;;  %v2862_v32 = vpop.f32.mrb[30].mxu0  ;;  %v2197_v60 = vadd.f32 %v2908_v45, %v3915_v49 }
 0x18d   : > { %2292 = vst [vmem:[%s3927_s4 + $0x88] sm:$0xff] %v3134_v17  ;;  %v1088_v28 = vpop.f32.mrb[27].mxu1  ;;  %v2024_v27 = vpop.f32.mrb[31].mxu0  ;;  %3143 = vtanh.f32 %v2199_v59  ;;  %v2200_v54 = vadd.f32 %v2909_v61, %v3915_v49 }
 0x18e   : > { %v2910_v22 = vadd.f32 %v2008_v15, %v1088_v28  ;;  %3145 = vtanh.f32 %v2197_v60 }
 0x18f   : > { %v3136_v10 = vpop.eup %3135  ;;  %3147 = vtanh.f32 %v2200_v54 }
 0x190   : > { %v2198_v36 = vadd.f32 %v2910_v22, %v3915_v49  ;;  %v3138_v21 = vpop.eup %3137  ;;  %2297 = vst [vmem:[%s3927_s4 + $0xb0] sm:$0xff] %v3136_v10  ;;  %v2753_v25 = vpop.f32.mrb[28].mxu1 }
 0x191   : > { %2295 = vst [vmem:[%s3927_s4 + $0xa0] sm:$0xff] %v3138_v21  ;;  %v2911_v20 = vadd.f32 %v2861_v53, %v2753_v25  ;;  %v1101_v46 = vpop.f32.mrb[29].mxu1 }
 0x192   : > { %3149 = vtanh.f32 %v2198_v36  ;;  %v2865_v6 = vpop.f32.mrb[32].mxu0  ;;  %v2912_v33 = vadd.f32 %v2021_v19, %v1101_v46  ;;  %v2754_v42 = vpop.f32.mrb[30].mxu1 }
 0x193   : > { %v3140_v2 = vpop.eup %3139  ;;  %v2037_v23 = vpop.f32.mrb[33].mxu0  ;;  %v2203_v12 = vadd.f32 %v2911_v20, %v3915_v49  ;;  %v2913_v40 = vadd.f32 %v2862_v32, %v2754_v42 }
 0x194   : > { %v3142_v5 = vpop.eup %3141  ;;  %2298 = vst [vmem:[%s3927_s4 + $0xb8] sm:$0xff] %v3140_v2  ;;  %v2866_v3 = vpop.f32.mrb[34].mxu0  ;;  %v2201_v8 = vadd.f32 %v2912_v33, %v3915_v49 }
 0x195   : > { %2296 = vst [vmem:[%s3927_s4 + $0xa8] sm:$0xff] %v3142_v5  ;;  %v1104_v50 = vpop.f32.mrb[31].mxu1  ;;  %v2040_v13 = vpop.f32.mrb[35].mxu0  ;;  %3151 = vtanh.f32 %v2203_v12  ;;  %v2204_v26 = vadd.f32 %v2913_v40, %v3915_v49 }
 0x196   : > { %v2914_v11 = vadd.f32 %v2024_v27, %v1104_v50  ;;  %3153 = vtanh.f32 %v2201_v8 }
 0x197   : > { %v3144_v56 = vpop.eup %3143  ;;  %3155 = vtanh.f32 %v2204_v26 }
 0x198   : > { %v2202_v14 = vadd.f32 %v2914_v11, %v3915_v49  ;;  %v3146_v0 = vpop.eup %3145  ;;  %2301 = vst [vmem:[%s3927_s4 + $0xd0] sm:$0xff] %v3144_v56  ;;  %v2757_v24 = vpop.f32.mrb[32].mxu1 }
 0x199   : > { %v3148_v47 = vpop.eup %3147  ;;  %2299 = vst [vmem:[%s3927_s4 + $0xc0] sm:$0xff] %v3146_v0  ;;  %v2915_v39 = vadd.f32 %v2865_v6, %v2757_v24  ;;  %v1117_v63 = vpop.f32.mrb[33].mxu1 }
 0x19a   : > { %3157 = vtanh.f32 %v2202_v14  ;;  %v2869_v38 = vpop.f32.mrb[36].mxu0  ;;  %2302 = vst [vmem:[%s3927_s4 + $0xd8] sm:$0xff] %v3148_v47  ;;  %v2916_v44 = vadd.f32 %v2037_v23, %v1117_v63  ;;  %v2758_v62 = vpop.f32.mrb[34].mxu1 }
 0x19b   : > { %v2053_v43 = vpop.f32.mrb[37].mxu0  ;;  %v2207_v15 = vadd.f32 %v2915_v39, %v3915_v49  ;;  %v2917_v1 = vadd.f32 %v2866_v3, %v2758_v62  ;;  %v1120_v37 = vpop.f32.mrb[35].mxu1 }
 0x19c   : > { %v3150_v31 = vpop.eup %3149  ;;  %v2870_v52 = vpop.f32.mrb[38].mxu0  ;;  %v2205_v18 = vadd.f32 %v2916_v44, %v3915_v49  ;;  %v2918_v16 = vadd.f32 %v2040_v13, %v1120_v37 }
 0x19d   : > { %2300 = vst [vmem:[%s3927_s4 + $0xc8] sm:$0xff] %v3150_v31  ;;  %v2056_v34 = vpop.f32.mrb[39].mxu0  ;;  %3159 = vtanh.f32 %v2207_v15  ;;  %v2208_v51 = vadd.f32 %v2917_v1, %v3915_v49 }
 0x19e   : > { %3161 = vtanh.f32 %v2205_v18  ;;  %v2206_v7 = vadd.f32 %v2918_v16, %v3915_v49 }
 0x19f   : > { %v3152_v53 = vpop.eup %3151  ;;  %3163 = vtanh.f32 %v2208_v51 }
 0x1a0   : > { %v3154_v41 = vpop.eup %3153  ;;  %2305 = vst [vmem:[%s3927_s4 + $0xf0] sm:$0xff] %v3152_v53  ;;  %3165 = vtanh.f32 %v2206_v7  ;;  %v2761_v57 = vpop.f32.mrb[36].mxu1 }
 0x1a1   : > { %v3156_v19 = vpop.eup %3155  ;;  %2303 = vst [vmem:[%s3927_s4 + $0xe0] sm:$0xff] %v3154_v41  ;;  %v2919_v17 = vadd.f32 %v2869_v38, %v2761_v57  ;;  %v1133_v45 = vpop.f32.mrb[37].mxu1 }
 0x1a2   : > { %v2873_v48 = vpop.f32.mrb[40].mxu0  ;;  %2306 = vst [vmem:[%s3927_s4 + $0xf8] sm:$0xff] %v3156_v19  ;;  %v2920_v59 = vadd.f32 %v2053_v43, %v1133_v45  ;;  %v2762_v61 = vpop.f32.mrb[38].mxu1 }
 0x1a3   : > { %v2069_v9 = vpop.f32.mrb[41].mxu0  ;;  %v2211_v27 = vadd.f32 %v2919_v17, %v3915_v49  ;;  %v2921_v60 = vadd.f32 %v2870_v52, %v2762_v61  ;;  %v1136_v22 = vpop.f32.mrb[39].mxu1 }
 0x1a4   : > { %v3158_v32 = vpop.eup %3157  ;;  %v2874_v28 = vpop.f32.mrb[42].mxu0  ;;  %v2209_v36 = vadd.f32 %v2920_v59, %v3915_v49  ;;  %v2922_v10 = vadd.f32 %v2056_v34, %v1136_v22 }
 0x1a5   : > { %2304 = vst [vmem:[%s3927_s4 + $0xe8] sm:$0xff] %v3158_v32  ;;  %v2072_v54 = vpop.f32.mrb[43].mxu0  ;;  %3167 = vtanh.f32 %v2211_v27  ;;  %v2212_v21 = vadd.f32 %v2921_v60, %v3915_v49 }
 0x1a6   : > { %3169 = vtanh.f32 %v2209_v36  ;;  %v2210_v25 = vadd.f32 %v2922_v10, %v3915_v49 }
 0x1a7   : > { %v3160_v6 = vpop.eup %3159  ;;  %3171 = vtanh.f32 %v2212_v21 }
 0x1a8   : > { %v3162_v2 = vpop.eup %3161  ;;  %2309 = vst [vmem:[%s3927_s4 + $0x110] sm:$0xff] %v3160_v6  ;;  %3173 = vtanh.f32 %v2210_v25  ;;  %v2765_v20 = vpop.f32.mrb[40].mxu1 }
 0x1a9   : > { %v3164_v23 = vpop.eup %3163  ;;  %2307 = vst [vmem:[%s3927_s4 + $0x100] sm:$0xff] %v3162_v2  ;;  %v2923_v5 = vadd.f32 %v2873_v48, %v2765_v20  ;;  %v1149_v33 = vpop.f32.mrb[41].mxu1 }
 0x1aa   : > { %v2877_v46 = vpop.f32.mrb[44].mxu0  ;;  %v3166_v3 = vpop.eup %3165  ;;  %2310 = vst [vmem:[%s3927_s4 + $0x118] sm:$0xff] %v3164_v23  ;;  %v2924_v12 = vadd.f32 %v2069_v9, %v1149_v33 }
 0x1ab   : > { %v2085_v42 = vpop.f32.mrb[45].mxu0  ;;  %v2766_v40 = vpop.f32.mrb[42].mxu1  ;;  %2308 = vst [vmem:[%s3927_s4 + $0x108] sm:$0xff] %v3166_v3  ;;  %v2215_v13 = vadd.f32 %v2923_v5, %v3915_v49 }
 0x1ac   : > { %v2878_v50 = vpop.f32.mrb[46].mxu0  ;;  %v2925_v8 = vadd.f32 %v2874_v28, %v2766_v40  ;;  %v1152_v11 = vpop.f32.mrb[43].mxu1  ;;  %v2213_v14 = vadd.f32 %v2924_v12, %v3915_v49 }
 0x1ad   : > { %v2088_v26 = vpop.f32.mrb[47].mxu0  ;;  %v2926_v56 = vadd.f32 %v2072_v54, %v1152_v11  ;;  %3175 = vtanh.f32 %v2215_v13 }
 0x1ae   : > { %v2216_v0 = vadd.f32 %v2925_v8, %v3915_v49  ;;  %3177 = vtanh.f32 %v2213_v14 }
 0x1af   : > { %v2214_v24 = vadd.f32 %v2926_v56, %v3915_v49  ;;  %v3168_v38 = vpop.eup %3167 }
 0x1b0   : > { %3179 = vtanh.f32 %v2216_v0  ;;  %v3170_v47 = vpop.eup %3169  ;;  %2313 = vst [vmem:[%s3927_s4 + $0x130] sm:$0xff] %v3168_v38  ;;  %v2769_v39 = vpop.f32.mrb[44].mxu1 }
 0x1b1   : > { %3181 = vtanh.f32 %v2214_v24  ;;  %v3172_v43 = vpop.eup %3171  ;;  %2311 = vst [vmem:[%s3927_s4 + $0x120] sm:$0xff] %v3170_v47  ;;  %v2927_v31 = vadd.f32 %v2877_v46, %v2769_v39  ;;  %v1165_v44 = vpop.f32.mrb[45].mxu1 }
 0x1b2   : > { %v2881_v63 = vpop.f32.mrb[52].mxu0  ;;  %v3174_v52 = vpop.eup %3173  ;;  %2314 = vst [vmem:[%s3927_s4 + $0x138] sm:$0xff] %v3172_v43  ;;  %v2928_v15 = vadd.f32 %v2085_v42, %v1165_v44 }
 0x1b3   : > { %v2101_v62 = vpop.f32.mrb[53].mxu0  ;;  %v2770_v1 = vpop.f32.mrb[46].mxu1  ;;  %2312 = vst [vmem:[%s3927_s4 + $0x128] sm:$0xff] %v3174_v52  ;;  %v2219_v34 = vadd.f32 %v2927_v31, %v3915_v49 }
 0x1b4   : > { %v2882_v37 = vpop.f32.mrb[54].mxu0  ;;  %v2929_v18 = vadd.f32 %v2878_v50, %v2770_v1  ;;  %v1168_v16 = vpop.f32.mrb[47].mxu1  ;;  %v2217_v7 = vadd.f32 %v2928_v15, %v3915_v49 }
 0x1b5   : > { %v2104_v51 = vpop.f32.mrb[55].mxu0  ;;  %v2930_v53 = vadd.f32 %v2088_v26, %v1168_v16  ;;  %3183 = vtanh.f32 %v2219_v34 }
 0x1b6   : > { %v2220_v41 = vadd.f32 %v2929_v18, %v3915_v49  ;;  %3185 = vtanh.f32 %v2217_v7 }
 0x1b7   : > { %v2218_v57 = vadd.f32 %v2930_v53, %v3915_v49  ;;  %v3176_v48 = vpop.eup %3175 }
 0x1b8   : > { %3187 = vtanh.f32 %v2220_v41  ;;  %v3178_v19 = vpop.eup %3177  ;;  %2317 = vst [vmem:[%s3927_s4 + $0x150] sm:$0xff] %v3176_v48  ;;  %v2773_v17 = vpop.f32.mrb[52].mxu1 }
 0x1b9   : > { %3189 = vtanh.f32 %v2218_v57  ;;  %2315 = vst [vmem:[%s3927_s4 + $0x140] sm:$0xff] %v3178_v19  ;;  %v1190_v9 = vadd.f32 %v2773_v17, %v3906_v4  ;;  %v1181_v32 = vpop.f32.mrb[53].mxu1 }
 0x1ba   : > { %v3180_v45 = vpop.eup %3179  ;;  %v1182_v61 = vadd.f32 %v1181_v32, %v3908_v58  ;;  %v2774_v28 = vpop.f32.mrb[54].mxu1 }
 0x1bb   : > { %v3182_v59 = vpop.eup %3181  ;;  %2318 = vst [vmem:[%s3927_s4 + $0x158] sm:$0xff] %v3180_v45  ;;  %v1602_v27 = vadd.f32 %v3900_v55, %v1190_v9  ;;  %v1184_v60 = vpop.f32.mrb[55].mxu1 }
 0x1bc   : > { %2316 = vst [vmem:[%s3927_s4 + $0x148] sm:$0xff] %v3182_v59  ;;  %v1600_v22 = vadd.f32 %v3902_v35, %v1182_v61  ;;  %v1185_v54 = vadd.f32 %v1184_v60, %v3910_v30 }
 0x1bd   : > { %v2165_v36 = vadd.f32 %v2881_v63, %v1602_v27 }
 0x1be   : > { %v2163_v4 = vadd.f32 %v2101_v62, %v1600_v22  ;;  %v1601_v10 = vadd.f32 %v3904_v29, %v1185_v54 }
 0x1bf   : > { %v3184_v21 = vpop.eup %3183  ;;  %v2223_v25 = vadd.f32 %v3915_v49, %v2165_v36 }
 0x1c0   : > { %v3186_v58 = vpop.eup %3185  ;;  %2321 = vst [vmem:[%s3927_s4 + $0x170] sm:$0xff] %v3184_v21  ;;  %v2221_v55 = vadd.f32 %v3915_v49, %v2163_v4  ;;  %v2164_v6 = vadd.f32 %v2104_v51, %v1601_v10 }
 0x1c1   : > { %2319 = vst [vmem:[%s3927_s4 + $0x160] sm:$0xff] %v3186_v58  ;;  %3191 = vtanh.f32 %v2223_v25 }
 0x1c2   : > { %v3188_v2 = vpop.eup %3187  ;;  %3193 = vtanh.f32 %v2221_v55  ;;  %v2222_v30 = vadd.f32 %v3915_v49, %v2164_v6 }
 0x1c3   : > { %v3190_v35 = vpop.eup %3189  ;;  %2322 = vst [vmem:[%s3927_s4 + $0x178] sm:$0xff] %v3188_v2 }
 0x1c4   : > { %2320 = vst [vmem:[%s3927_s4 + $0x168] sm:$0xff] %v3190_v35  ;;  %3195 = vtanh.f32 %v2222_v30 }
 0x1cb   : > { %v3192_v29 = vpop.eup %3191 }
 0x1cc   : > { %v3194_v20 = vpop.eup %3193  ;;  %2325 = vst [vmem:[%s3927_s4 + $0x190] sm:$0xff] %v3192_v29 }
 0x1cd   : > { %2323 = vst [vmem:[%s3927_s4 + $0x180] sm:$0xff] %v3194_v20 }
 0x1ce   : > { %v3196_v46 = vpop.eup %3195 }
 0x1cf   : > { %2324 = vst [vmem:[%s3927_s4 + $0x188] sm:$0xff] %v3196_v46 }
 0x1d0 PF: > { %s13_s12 = sadd.s32 1, %s3203_s12  }
 0x1d1   : > { %p10_p4 = scmp.ge.s32.totalorder %s13_s12, 4  }
 0x1d3   :  { %12 = sbr.rel (!%p10_p4) target bundleno = 1 (0x1), region = 65 }

</bundles_post_ra>
